<compile_context>
chip_gen: v6e
topology: v6e:2x2x1
jax: 0.10.0
libtpu: 0.0.40
codegen_flags: <defaults>
</compile_context>

<pallas_src>
import math
import functools

import numpy as np
import jax
import jax.numpy as jnp
from jax.experimental import pallas as pl
from jax.experimental.pallas import tpu as pltpu


# ----------------------------- module config ------------------------------ #

def _get_num_frequencies_nyquist(samples):
    nyquist_rate = 1 / (2 * (2 * 1 / samples))
    return int(math.floor(math.log(nyquist_rate, 2)))


def _num_frequencies(in_features, sidelength=None, use_nyquist=True):
    if in_features == 3:
        return 10
    elif in_features == 2:
        assert sidelength is not None
        if isinstance(sidelength, int):
            sidelength = (sidelength, sidelength)
        nf = 4
        if use_nyquist:
            nf = _get_num_frequencies_nyquist(min(sidelength[0], sidelength[1]))
        return nf
    elif in_features == 1:
        nf = 4
        if use_nyquist:
            nf = _get_num_frequencies_nyquist(sidelength)
        return nf
    else:
        return 4


def _column_tables(in_features, out_dim, pack):
    """Per-output-column metadata matching the PyTorch interleave
       [x_0..x_{F-1}, sin(f0,c0), cos(f0,c0), sin(f0,c1), cos(f0,c1), ...],
       tiled `pack` times along the lane axis (one packed point per repeat)."""
    f = in_features
    w = pack * out_dim
    src = np.zeros((1, w), np.int32)      # source column in the (pack*F) input row
    scale = np.ones((1, w), np.float32)   # 2^i * pi (1.0 for passthrough cols)
    phase = np.zeros((1, w), np.float32)  # 0 for sin/passthrough, pi/2 for cos
    is_pass = np.zeros((1, w), np.int32)  # 1 -> copy input channel straight through
    for col in range(w):
        p, k = divmod(col, out_dim)
        if k < f:
            src[0, col] = p * f + k
            is_pass[0, col] = 1
        else:
            q = k - f
            i = q // (2 * f)
            j = (q // 2) % f
            src[0, col] = p * f + j
            scale[0, col] = np.float32(float(2 ** i) * math.pi)
            if q % 2 == 1:                    # cos column -> sin(t + pi/2)
                phase[0, col] = np.float32(math.pi / 2)
    return src, scale, phase, is_pass


# -------------------------------- kernel ---------------------------------- #

def _pos_enc_kernel(src_ref, scale_ref, phase_ref, pass_ref, x_ref, o_ref, *,
                    pack_f):
    # x_ref: (TILE, pack*F)    o_ref: (TILE, pack*out_dim)
    # metadata refs: (1, pack*out_dim)
    x = x_ref[...].astype(jnp.float32)
    rows = x.shape[0]
    w = src_ref.shape[1]

    src = src_ref[...]                 # (1, w) int32
    scale = scale_ref[...]             # (1, w) f32
    phase = phase_ref[...]             # (1, w) f32
    is_pass = pass_ref[...] > 0        # (1, w) bool

    # Route each output column to its source input channel via lane broadcasts
    # + a trace-time select chain (exact; no gathers, no MXU, no lane shuffles).
    v = jnp.broadcast_to(x[:, 0:1], (rows, w))
    for j in range(1, pack_f):
        v = jnp.where(src == j, jnp.broadcast_to(x[:, j:j + 1], (rows, w)), v)

    # Single EUP pass: sin and cos columns share one sin via the phase row.
    enc = jnp.sin(v * scale + phase)
    o_ref[...] = jnp.where(is_pass, v, enc).astype(o_ref.dtype)


# ------------------------------- wrapper ----------------------------------- #

def _round_up(a, b):
    return ((a + b - 1) // b) * b


def _choose_pack(m, out_dim, max_lanes=128):
    """Largest divisor of m that keeps pack*out_dim <= max_lanes (lane-dense
    output without any padding / post-kernel slice copy)."""
    max_p = max(1, max_lanes // out_dim)
    for p in range(max_p, 0, -1):
        if m % p == 0:
            return p
    return 1


def pos_encoding(coords, in_features, sidelength=None, use_nyquist=True,
                 tile=8192, out_dtype=None):
    """Pallas implementation of PosEncoding.forward.

    coords: (B, ..., in_features)  (matches PyTorch coords.view(B,-1,F)).
    Returns: (B, N, out_dim), out_dim = F + 2*F*num_frequencies.
    """
    nf = _num_frequencies(in_features, sidelength, use_nyquist)
    f = in_features
    out_dim = f + 2 * f * nf
    if out_dtype is None:
        # TODO(synk): emit bf16 here for v5e store-bound cases if the consumer
        # accepts it (halves output HBM bytes).
        out_dtype = coords.dtype

    b = coords.shape[0]
    coords = coords.reshape(b, -1, f)                 # (B, N, F)
    n = coords.shape[1]
    m = b * n

    pack = _choose_pack(m, out_dim)
    mr = m // pack
    w = pack * out_dim

    x = coords.reshape(mr, pack * f)                  # free row-major reshape

    # Row tile: big enough to amortize the ~0.35 us per-step overhead, but
    # capped so the (parallel) grid has >= 2 steps when possible (v7x megacore).
    tile = int(tile)
    tile = max(8, min(tile, _round_up(pl.cdiv(mr, 2), 8)))
    grid = (pl.cdiv(mr, tile),)

    src, scale, phase, is_pass = _column_tables(f, out_dim, pack)

    meta_spec = pl.BlockSpec((1, w), lambda i: (0, 0))
    kernel = functools.partial(_pos_enc_kernel, pack_f=pack * f)

    out = pl.pallas_call(
        kernel,
        out_shape=jax.ShapeDtypeStruct((mr, w), out_dtype),
        grid=grid,
        in_specs=[meta_spec, meta_spec, meta_spec, meta_spec,
                  pl.BlockSpec((tile, pack * f), lambda i: (i, 0))],
        out_specs=pl.BlockSpec((tile, w), lambda i: (i, 0)),
        compiler_params=pltpu.CompilerParams(
            dimension_semantics=("parallel",)),
        cost_estimate=pl.CostEstimate(
            flops=8 * m * out_dim,
            transcendentals=m * out_dim,
            bytes_accessed=(m * f + m * out_dim) * 4),
    )(jnp.asarray(src), jnp.asarray(scale), jnp.asarray(phase),
      jnp.asarray(is_pass), x)

    # (Mr, pack*out_dim) -> (M, out_dim) -> (B, N, out_dim): free reshapes.
    return out.reshape(b, n, out_dim)


# ----------------------------- pure-JAX ref -------------------------------- #

def _pos_encoding_ref(coords, in_features, sidelength=None, use_nyquist=True):
    """Pure-JAX reference mirroring the PyTorch loop exactly."""
    nf = _num_frequencies(in_features, sidelength, use_nyquist)
    b = coords.shape[0]
    coords = coords.reshape(b, -1, in_features)
    parts = [coords]
    for i in range(nf):
        for j in range(in_features):
            c = coords[..., j]
            parts.append(jnp.sin((2 ** i) * math.pi * c)[..., None])
            parts.append(jnp.cos((2 ** i) * math.pi * c)[..., None])
    out = jnp.concatenate(parts, axis=-1)
    out_dim = in_features + 2 * in_features * nf
    return out.reshape(b, -1, out_dim)


if __name__ == "__main__":
    key = jax.random.PRNGKey(0)
    k1, k2 = jax.random.split(key)

    # Test 1: in_features=3 (NeRF 3D coords) -> num_frequencies=10, out_dim=63.
    # pack=2 -> 126-lane output tile.
    coords3 = jax.random.uniform(
        k1, (2, 16, 16, 3), dtype=jnp.float32, minval=-1.0, maxval=1.0
    )
    out3 = jax.block_until_ready(pos_encoding(coords3, in_features=3))
    ref3 = _pos_encoding_ref(coords3, in_features=3)
    assert out3.shape == (2, 256, 63), out3.shape
    # atol relaxed vs exact sin/cos: cos == sin(t + pi/2) folding perturbs the
    # fp32 argument by ~1 ulp at the top frequency (|t| ~ 2^9 * pi).
    assert jnp.allclose(out3, ref3, atol=2e-3, rtol=1e-5), float(
        jnp.max(jnp.abs(out3 - ref3)))

    # Test 2: in_features=2 with nyquist sidelength -> nf=2, out_dim=10.
    # M=50 points -> pack=10, 100-lane tile; also exercises the ragged last
    # block path (Mr=5 rows with an 8-row block).
    coords2 = jax.random.uniform(
        k2, (2, 5, 5, 2), dtype=jnp.float32, minval=-1.0, maxval=1.0
    )
    out2 = jax.block_until_ready(
        pos_encoding(coords2, in_features=2, sidelength=16)
    )
    ref2 = _pos_encoding_ref(coords2, in_features=2, sidelength=16)
    assert out2.shape == (2, 25, 10), out2.shape
    assert jnp.allclose(out2, ref2, atol=2e-3, rtol=1e-5), float(
        jnp.max(jnp.abs(out2 - ref2)))

    print("KERNEL_OK")
</pallas_src>

<mosaic_0001>
module attributes {stable_mosaic.version = 11 : i64} {
  func.func @_pos_enc_kernel(%arg0: i32, %arg1: memref<1x126xi32, #tpu.memory_space<vmem>>, %arg2: memref<1x126xf32, #tpu.memory_space<vmem>>, %arg3: memref<1x126xf32, #tpu.memory_space<vmem>>, %arg4: memref<1x126xi32, #tpu.memory_space<vmem>>, %arg5: memref<128x6xf32, #tpu.memory_space<vmem>>, %arg6: memref<128x126xf32, #tpu.memory_space<vmem>>) attributes {dimension_semantics = [#tpu.dimension_semantics<parallel>], iteration_bounds = array<i64: 2>, scalar_prefetch = 0 : i64, scratch_operands = 0 : i64, tpu.core_type = #tpu.core_type<tc>, window_params = [{pipeline_mode = #tpu.pipeline_mode<synchronous>, transform_indices = @transform_0, window_bounds = array<i64: 1, 126>}, {pipeline_mode = #tpu.pipeline_mode<synchronous>, transform_indices = @transform_1, window_bounds = array<i64: 1, 126>}, {pipeline_mode = #tpu.pipeline_mode<synchronous>, transform_indices = @transform_2, window_bounds = array<i64: 1, 126>}, {pipeline_mode = #tpu.pipeline_mode<synchronous>, transform_indices = @transform_3, window_bounds = array<i64: 1, 126>}, {transform_indices = @transform_4, window_bounds = array<i64: 128, 6>}, {transform_indices = @transform_5, window_bounds = array<i64: 128, 126>}]} {
    %c0 = arith.constant 0 : index
    %c0_0 = arith.constant 0 : index
    %0 = vector.load %arg5[%c0, %c0_0] : memref<128x6xf32, #tpu.memory_space<vmem>>, vector<128x6xf32>
    %c0_1 = arith.constant 0 : index
    %c0_2 = arith.constant 0 : index
    %1 = vector.load %arg1[%c0_1, %c0_2] : memref<1x126xi32, #tpu.memory_space<vmem>>, vector<1x126xi32>
    %c0_3 = arith.constant 0 : index
    %c0_4 = arith.constant 0 : index
    %2 = vector.load %arg2[%c0_3, %c0_4] : memref<1x126xf32, #tpu.memory_space<vmem>>, vector<1x126xf32>
    %c0_5 = arith.constant 0 : index
    %c0_6 = arith.constant 0 : index
    %3 = vector.load %arg3[%c0_5, %c0_6] : memref<1x126xf32, #tpu.memory_space<vmem>>, vector<1x126xf32>
    %c0_7 = arith.constant 0 : index
    %c0_8 = arith.constant 0 : index
    %4 = vector.load %arg4[%c0_7, %c0_8] : memref<1x126xi32, #tpu.memory_space<vmem>>, vector<1x126xi32>
    %c0_i32 = arith.constant 0 : i32
    %5 = vector.broadcast %c0_i32 : i32 to vector<1x126xi32>
    %6 = arith.cmpi sgt, %4, %5 : vector<1x126xi32>
    %7 = vector.extract_strided_slice %0 {offsets = [0, 0], sizes = [128, 1], strides = [1, 1]} : vector<128x6xf32> to vector<128x1xf32>
    %8 = vector.shape_cast %7 : vector<128x1xf32> to vector<128x1xf32>
    %9 = vector.broadcast %8 : vector<128x1xf32> to vector<128x126xf32>
    %c1_i32 = arith.constant 1 : i32
    %10 = vector.broadcast %c1_i32 : i32 to vector<1x126xi32>
    %11 = arith.cmpi eq, %1, %10 : vector<1x126xi32>
    %12 = vector.extract_strided_slice %0 {offsets = [0, 1], sizes = [128, 1], strides = [1, 1]} : vector<128x6xf32> to vector<128x1xf32>
    %13 = vector.shape_cast %12 : vector<128x1xf32> to vector<128x1xf32>
    %14 = vector.broadcast %13 : vector<128x1xf32> to vector<128x126xf32>
    %15 = vector.shape_cast %11 : vector<1x126xi1> to vector<1x126xi1>
    %16 = vector.broadcast %15 : vector<1x126xi1> to vector<128x126xi1>
    %17 = arith.select %16, %14, %9 : vector<128x126xi1>, vector<128x126xf32>
    %c2_i32 = arith.constant 2 : i32
    %18 = vector.broadcast %c2_i32 : i32 to vector<1x126xi32>
    %19 = arith.cmpi eq, %1, %18 : vector<1x126xi32>
    %20 = vector.extract_strided_slice %0 {offsets = [0, 2], sizes = [128, 1], strides = [1, 1]} : vector<128x6xf32> to vector<128x1xf32>
    %21 = vector.shape_cast %20 : vector<128x1xf32> to vector<128x1xf32>
    %22 = vector.broadcast %21 : vector<128x1xf32> to vector<128x126xf32>
    %23 = vector.shape_cast %19 : vector<1x126xi1> to vector<1x126xi1>
    %24 = vector.broadcast %23 : vector<1x126xi1> to vector<128x126xi1>
    %25 = arith.select %24, %22, %17 : vector<128x126xi1>, vector<128x126xf32>
    %c3_i32 = arith.constant 3 : i32
    %26 = vector.broadcast %c3_i32 : i32 to vector<1x126xi32>
    %27 = arith.cmpi eq, %1, %26 : vector<1x126xi32>
    %28 = vector.extract_strided_slice %0 {offsets = [0, 3], sizes = [128, 1], strides = [1, 1]} : vector<128x6xf32> to vector<128x1xf32>
    %29 = vector.shape_cast %28 : vector<128x1xf32> to vector<128x1xf32>
    %30 = vector.broadcast %29 : vector<128x1xf32> to vector<128x126xf32>
    %31 = vector.shape_cast %27 : vector<1x126xi1> to vector<1x126xi1>
    %32 = vector.broadcast %31 : vector<1x126xi1> to vector<128x126xi1>
    %33 = arith.select %32, %30, %25 : vector<128x126xi1>, vector<128x126xf32>
    %c4_i32 = arith.constant 4 : i32
    %34 = vector.broadcast %c4_i32 : i32 to vector<1x126xi32>
    %35 = arith.cmpi eq, %1, %34 : vector<1x126xi32>
    %36 = vector.extract_strided_slice %0 {offsets = [0, 4], sizes = [128, 1], strides = [1, 1]} : vector<128x6xf32> to vector<128x1xf32>
    %37 = vector.shape_cast %36 : vector<128x1xf32> to vector<128x1xf32>
    %38 = vector.broadcast %37 : vector<128x1xf32> to vector<128x126xf32>
    %39 = vector.shape_cast %35 : vector<1x126xi1> to vector<1x126xi1>
    %40 = vector.broadcast %39 : vector<1x126xi1> to vector<128x126xi1>
    %41 = arith.select %40, %38, %33 : vector<128x126xi1>, vector<128x126xf32>
    %c5_i32 = arith.constant 5 : i32
    %42 = vector.broadcast %c5_i32 : i32 to vector<1x126xi32>
    %43 = arith.cmpi eq, %1, %42 : vector<1x126xi32>
    %44 = vector.extract_strided_slice %0 {offsets = [0, 5], sizes = [128, 1], strides = [1, 1]} : vector<128x6xf32> to vector<128x1xf32>
    %45 = vector.shape_cast %44 : vector<128x1xf32> to vector<128x1xf32>
    %46 = vector.broadcast %45 : vector<128x1xf32> to vector<128x126xf32>
    %47 = vector.shape_cast %43 : vector<1x126xi1> to vector<1x126xi1>
    %48 = vector.broadcast %47 : vector<1x126xi1> to vector<128x126xi1>
    %49 = arith.select %48, %46, %41 : vector<128x126xi1>, vector<128x126xf32>
    %50 = vector.broadcast %2 : vector<1x126xf32> to vector<128x126xf32>
    %51 = arith.mulf %49, %50 : vector<128x126xf32>
    %52 = vector.broadcast %3 : vector<1x126xf32> to vector<128x126xf32>
    %53 = arith.addf %51, %52 : vector<128x126xf32>
    %54 = math.sin %53 : vector<128x126xf32>
    %55 = vector.shape_cast %6 : vector<1x126xi1> to vector<1x126xi1>
    %56 = vector.broadcast %55 : vector<1x126xi1> to vector<128x126xi1>
    %57 = arith.select %56, %49, %54 : vector<128x126xi1>, vector<128x126xf32>
    %c0_9 = arith.constant 0 : index
    %c0_10 = arith.constant 0 : index
    %58 = vector.load %arg6[%c0_9, %c0_10] : memref<128x126xf32, #tpu.memory_space<vmem>>, vector<128x126xf32>
    tpu.vector_store %arg6[%c0_9, %c0_10], %57 {strides = array<i32>} : memref<128x126xf32, #tpu.memory_space<vmem>>, vector<128x126xf32>,
    return
  }
  func.func @transform_0(%arg0: i32) -> (i32, i32) {
    %c0_i32 = arith.constant 0 : i32
    %c0_i32_0 = arith.constant 0 : i32
    %c0_i32_1 = arith.constant 0 : i32
    return %c0_i32, %c0_i32_0 : i32, i32
  }
  func.func @transform_1(%arg0: i32) -> (i32, i32) {
    %c0_i32 = arith.constant 0 : i32
    %c0_i32_0 = arith.constant 0 : i32
    %c0_i32_1 = arith.constant 0 : i32
    return %c0_i32, %c0_i32_0 : i32, i32
  }
  func.func @transform_2(%arg0: i32) -> (i32, i32) {
    %c0_i32 = arith.constant 0 : i32
    %c0_i32_0 = arith.constant 0 : i32
    %c0_i32_1 = arith.constant 0 : i32
    return %c0_i32, %c0_i32_0 : i32, i32
  }
  func.func @transform_3(%arg0: i32) -> (i32, i32) {
    %c0_i32 = arith.constant 0 : i32
    %c0_i32_0 = arith.constant 0 : i32
    %c0_i32_1 = arith.constant 0 : i32
    return %c0_i32, %c0_i32_0 : i32, i32
  }
  func.func @transform_4(%arg0: i32) -> (i32, i32) {
    %c0_i32 = arith.constant 0 : i32
    %c0_i32_0 = arith.constant 0 : i32
    return %arg0, %c0_i32 : i32, i32
  }
  func.func @transform_5(%arg0: i32) -> (i32, i32) {
    %c0_i32 = arith.constant 0 : i32
    %c0_i32_0 = arith.constant 0 : i32
    return %arg0, %c0_i32 : i32, i32
  }
}

</mosaic_0001>

<bundles_post_ra>
// kernel: tpu_custom_call.1
= control target key start
LH: loop header
LB: loop body
LE: loop exit
PB: predicated region body
PF: predicated region fallthrough
CT: control target
= control target key end

     0   :  { %10 = vsyncpa [#allocation3], 0  ;;  %s4916_s0 = inlined_call_operand.vmem [shape: s32[1,126], index: 0, kind: input, shape index: {}]   ;;  %s4917_s1 = inlined_call_operand.vmem [shape: f32[1,126], index: 1, kind: input, shape index: {}]   ;;  %s4918_s2 = inlined_call_operand.vmem [shape: f32[1,126], index: 2, kind: input, shape index: {}]   ;;  %s4919_s3 = inlined_call_operand.vmem [shape: s32[1,126], index: 3, kind: input, shape index: {}]   ;;  %s4920_s4 = inlined_call_operand.vmem [shape: f32[256,6], index: 4, kind: input, shape index: {}]   ;;  %s4921_s5 = inlined_call_operand.hbm [shape: f32[256,126], index: 5, kind: output, shape index: {}]  }
   0x1   :  { %12 = vsyncpa [#allocation3 + $0x1], 0  ;;  %s2968_s18 = smov 0   ;;  %s2970_s19 = smov 0  }
   0x2   :  { %s2972_s20 = smov 0   ;;  %s2974_s21 = smov 0  }
   0x3 LB: > { %s2989_s22 = sadd.s32 4294967295, %s2921_s21   ;;  %s2585_s23 = sadd.s32 4294967294, %s2921_s21   ;;  %s2921_s21 = sphi %s2974_s21, %s4983_s21   ;;  %s2917_s20 = sphi %s2972_s20, %s4982_s20   ;;  %s2913_s19 = sphi %s2970_s19, %s4981_s19   ;;  %s2909_s18 = sphi %s2968_s18, %s4980_s18  }
   0x4   : > { %s2993_s24 = sadd.s32 1, %s2921_s21   ;;  %s135_s25 = sadd.s32 1, %s2917_s20 }
   0x5   : > { %s132_s26 = ssub.s32 %s2921_s21, %s2993_s24  ;;  %p145_p0 = scmp.ne.s32.totalorder %s2917_s20, %s2913_s19 }
   0x6   : > { %p133_p1 = scmp.eq.s32.totalorder %s132_s26, 0  ;;  %p146_p2 = scmp.eq.s32.totalorder %s2989_s22, 1 }
   0x7   : > { %p151_p3 = scmp.ne.s32.totalorder %s2913_s19, %s2909_s18  ;;  %p152_p4 = scmp.eq.s32.totalorder %s2585_s23, 1 }
   0x8   : > { %s3004_s27 = scalar_select %p133_p1, %s2917_s20, %s135_s25  }
   0x9   : > { %p3006_p5 = por %p146_p2, %p145_p0  ;;  %p3010_p6 = por %p152_p4, %p151_p3 }
   0xa   : > { %p2588_p7 = scmp.ge.s32.totalorder %s2921_s21, 1  ;;  %p191_p8 = scmp.lt.s32.totalorder %s2921_s21, 3 }
   0xc   : > { %p192_p9 = pnand %p2588_p7, %p191_p8 }
   0xd   : > { %s2590_s30 = sshll.u32 (!%p192_p9), %s2989_s22, 4  ;;  %s216_s23 = sand.u32 (!%p192_p9), 1, %s2913_s19  }
   0xe   : > { %195 = sbr.rel (%p192_p9) target bundleno = 773 (0x305), region = 40  ;;  %p220_p10 = scmp.lt.s32.totalorder (!%p192_p9), %s2590_s30, 31 }
   0xf   : > { %s2589_s25 = sshll.u32 (!%p192_p9), %s216_s23, 7  ;;  %s2663_s13 = sshll.u32 (!%p192_p9), %s2989_s22, 11 }
  0x10   : > { %s3814_s26 = scalar_lea.vmem (!%p192_p9), [#allocation2], %s2589_s25  ;;  %s4865_s17 = scalar_lea.hbm (!%p192_p9), %s4921_s5, %s2663_s13 }
  0x11   : > { %s2523_s14 = sshll.u32 (!%p192_p9), %s3814_s26, 4  ;;  %s4876_s22 = scalar_lea.sflag (!%p192_p9), [#allocation3], %s216_s23  ;;  %s4867_s14 = int_to_ptr.vmem [resolvable:$true] %s2523_s14 }
  0x12   : > { %s2861_s25 = scalar_lea.vmem (!%p192_p9), %s4867_s14, 2048 }
  0x13   : > { %v2923_v0 = vmov 0   ;;  %s4985_s30 = smov (!%p220_p10, %s2590_s30), 31  ;;  %v2924_v17 = vmov 1   ;;  %v2925_v18 = vmov 2   ;;  %v2926_v19 = vmov 3   ;;  %p2862_p11 = scmp.ne.s32.totalorder %s4867_s14, %s2861_s25 }
  0x14   : > { %2782 = vset.pattern.permute.xlu1 %v2923_v0  ;;  %2781 = vset.pattern.permute.xlu0 %v2923_v0  ;;  %s2591_s6 = sshll.u32 %s4985_s30, 3  ;;  %v2927_v23 = vmov 4   ;;  %v393_v29 = vlaneseq  ;;  %v3147_v32 = vld [vmem:[%s4916_s0] sm:$0x1]  ;;  %v2928_v45 = vmov 5   ;;  %s2935_s30 = smov [#allocation2]  }
  0x15   : > { %s223_s9 = scalar_lea.vmem %s4920_s4, %s2591_s6  ;;  %vm327_vm0 = vcmp.eq.s32.totalorder %v3147_v32, 1  ;;  %vm414_vm2 = vcmp.eq.s32.totalorder %v3147_v32, 2  ;;  %vm501_vm4 = vcmp.eq.s32.totalorder %v3147_v32, 3  ;;  %vm588_vm6 = vcmp.eq.s32.totalorder %v3147_v32, 4  ;;  %p2863_p12 = pnand %p2862_p11, %p3006_p5 }
  0x16   : > { %v3022_v1 = vld [vmem:[%s223_s9 + $0x10] sm:$0xff]  ;;  %v3024_v2 = vld [vmem:[%s223_s9] sm:$0xff]  ;;  %v3028_v3 = vld [vmem:[%s223_s9 + $0x18] sm:$0xff]  ;;  %v394_v33 = vshrl.u32 %v393_v29, 7  ;;  %v392_v39 = vsel %vm327_vm0, 1, %v2923_v0  ;;  %vm675_vm8 = vcmp.eq.s32.totalorder %v3147_v32, 5 }
  0x17   : > { %259 = vperm.xlu1 %2782, %v3022_v1   ;;  %249 = vperm.xlu0 %2781, %v3024_v2   ;;  %v3030_v4 = vld [vmem:[%s223_s9 + $0x8] sm:$0xff]  ;;  %v3036_v6 = vld [vmem:[%s223_s9 + $0x20] sm:$0xff]  ;;  %v3040_v7 = vld [vmem:[%s223_s9 + $0x38] sm:$0xff]  ;;  %p2864_p13 = pneg %p2863_p12  ;;  %s2865_s6 = sshll.u32 %s2935_s30, 4  ;;  %s2866_s6 = int_to_ptr.vmem [resolvable:$false] %s2865_s6 }
  0x18   : > { %v3034_v5 = vld [vmem:[%s223_s9 + $0x28] sm:$0xff]  ;;  %v3042_v8 = vld [vmem:[%s223_s9 + $0x30] sm:$0xff]  ;;  %v3048_v10 = vld [vmem:[%s223_s9 + $0x40] sm:$0xff]  ;;  %v3156_v36 = vsub.s32 0, %v394_v33  ;;  %s2867_s7 = scalar_lea.vmem %s2866_s6, 4096  ;;  %p2868_p0 = scmp.lt.s32.totalorder %s4867_s14, %s2866_s6 }
  0x19   : > { %v3046_v9 = vld [vmem:[%s223_s9 + $0x48] sm:$0xff]  ;;  %v3052_v11 = vld [vmem:[%s223_s9 + $0x58] sm:$0xff]  ;;  %v3054_v12 = vld [vmem:[%s223_s9 + $0x50] sm:$0xff]  ;;  %p2869_p1 = scmp.lt.s32.totalorder %s2867_s7, %s2861_s25 }
  0x1a   : > { %v3058_v13 = vld [vmem:[%s223_s9 + $0x68] sm:$0xff]  ;;  %v3060_v14 = vld [vmem:[%s223_s9 + $0x60] sm:$0xff]  ;;  %v3064_v15 = vld [vmem:[%s223_s9 + $0x78] sm:$0xff]  ;;  %v396_v40 = vrot.slane %v392_v39, %v3156_v36 }
  0x1b   : > { %264 = vperm.xlu1 %2782, %v3028_v3   ;;  %254 = vperm.xlu0 %2781, %v3030_v4   ;;  %v3066_v16 = vld [vmem:[%s223_s9 + $0x70] sm:$0xff]  ;;  %p2870_p2 = por %p2869_p1, %p2868_p0 }
  0x1c   : > { %vm3172_vm1 = vcmp.eq.s32.totalorder %v396_v40, 1 }
  0x1d   : > { %p2871_p3 = pnand %p2870_p2, %p2864_p13 }
  0x1f   : > { %274 = vperm.xlu1 %2782, %v3034_v5   ;;  %269 = vperm.xlu0 %2781, %v3036_v6  }
  0x23   : > { %284 = vperm.xlu1 %2782, %v3040_v7   ;;  %279 = vperm.xlu0 %2781, %v3042_v8  }
  0x27   : > { %294 = vperm.xlu1 %2782, %v3046_v9   ;;  %289 = vperm.xlu0 %2781, %v3048_v10  }
  0x2b   : > { %304 = vperm.xlu1 %2782, %v3052_v11   ;;  %299 = vperm.xlu0 %2781, %v3054_v12  }
  0x2f   : > { %314 = vperm.xlu1 %2782, %v3058_v13   ;;  %309 = vperm.xlu0 %2781, %v3060_v14  }
  0x33   : > { %324 = vperm.xlu1 %2782, %v3064_v15   ;;  %319 = vperm.xlu0 %2781, %v3066_v16  }
  0x37   : > { %2784 = vset.pattern.permute.xlu1 %v2924_v17  ;;  %2783 = vset.pattern.permute.xlu0 %v2924_v17 }
  0x38   : > { %333 = vperm.xlu1 %2784, %v3030_v4   ;;  %329 = vperm.xlu0 %2783, %v3024_v2  }
  0x3c   : > { %337 = vperm.xlu1 %2784, %v3022_v1   ;;  %341 = vperm.xlu0 %2783, %v3028_v3  }
  0x40   : > { %345 = vperm.xlu1 %2784, %v3036_v6   ;;  %349 = vperm.xlu0 %2783, %v3034_v5  }
  0x44   : > { %353 = vperm.xlu1 %2784, %v3042_v8   ;;  %357 = vperm.xlu0 %2783, %v3040_v7  }
  0x48   : > { %361 = vperm.xlu1 %2784, %v3048_v10   ;;  %365 = vperm.xlu0 %2783, %v3046_v9  }
  0x4c   : > { %369 = vperm.xlu1 %2784, %v3054_v12   ;;  %373 = vperm.xlu0 %2783, %v3052_v11  }
  0x50   : > { %377 = vperm.xlu1 %2784, %v3060_v14   ;;  %381 = vperm.xlu0 %2783, %v3058_v13  }
  0x54   : > { %385 = vperm.xlu1 %2784, %v3066_v16   ;;  %389 = vperm.xlu0 %2783, %v3064_v15  }
  0x58   : > { %2785 = vset.pattern.permute.xlu1 %v2925_v18  ;;  %2786 = vset.pattern.permute.xlu0 %v2925_v18 }
  0x59   : > { %416 = vperm.xlu1 %2785, %v3024_v2   ;;  %420 = vperm.xlu0 %2786, %v3030_v4  }
  0x5d   : > { %424 = vperm.xlu1 %2785, %v3022_v1   ;;  %432 = vperm.xlu0 %2786, %v3036_v6  }
  0x61   : > { %428 = vperm.xlu1 %2785, %v3028_v3   ;;  %440 = vperm.xlu0 %2786, %v3042_v8  }
  0x65   : > { %436 = vperm.xlu1 %2785, %v3034_v5   ;;  %448 = vperm.xlu0 %2786, %v3048_v10  }
  0x69   : > { %444 = vperm.xlu1 %2785, %v3040_v7   ;;  %456 = vperm.xlu0 %2786, %v3054_v12  }
  0x6d   : > { %452 = vperm.xlu1 %2785, %v3046_v9   ;;  %464 = vperm.xlu0 %2786, %v3060_v14  }
  0x71   : > { %460 = vperm.xlu1 %2785, %v3052_v11   ;;  %472 = vperm.xlu0 %2786, %v3066_v16  }
  0x75   : > { %468 = vperm.xlu1 %2785, %v3058_v13   ;;  %2787 = vset.pattern.permute.xlu0 %v2926_v19 }
  0x76   : > { %503 = vperm.xlu0 %2787, %v3024_v2  }
  0x79   : > { %476 = vperm.xlu1 %2785, %v3064_v15  }
  0x7a   : > { %515 = vperm.xlu0 %2787, %v3028_v3  }
  0x7d   : > { %2788 = vset.pattern.permute.xlu1 %v2926_v19 }
  0x7e   : > { %507 = vperm.xlu1 %2788, %v3030_v4   ;;  %523 = vperm.xlu0 %2787, %v3034_v5  }
  0x82   : > { %511 = vperm.xlu1 %2788, %v3022_v1   ;;  %531 = vperm.xlu0 %2787, %v3040_v7  }
  0x86   : > { %519 = vperm.xlu1 %2788, %v3036_v6   ;;  %539 = vperm.xlu0 %2787, %v3046_v9  }
  0x8a   : > { %527 = vperm.xlu1 %2788, %v3042_v8   ;;  %547 = vperm.xlu0 %2787, %v3052_v11  }
  0x8e   : > { %535 = vperm.xlu1 %2788, %v3048_v10   ;;  %555 = vperm.xlu0 %2787, %v3058_v13  }
  0x92   : > { %v3114_v20 = vpop.permute.xlu1 %259  ;;  %543 = vperm.xlu1 %2788, %v3054_v12   ;;  %563 = vperm.xlu0 %2787, %v3064_v15   ;;  %v3118_v21 = vpop.permute.xlu0 %249 }
  0x96   : > { %v3120_v22 = vpop.permute.xlu1 %264  ;;  %551 = vperm.xlu1 %2788, %v3060_v14   ;;  %2790 = vset.pattern.permute.xlu0 %v2927_v23  ;;  %v3123_v24 = vpop.permute.xlu0 %254 }
  0x97   : > { %594 = vperm.xlu0 %2790, %v3030_v4  }
  0x9a   : > { %v3126_v25 = vpop.permute.xlu1 %274  ;;  %559 = vperm.xlu1 %2788, %v3066_v16   ;;  %v3129_v26 = vpop.permute.xlu0 %269 }
  0x9b   : > { %606 = vperm.xlu0 %2790, %v3036_v6  }
  0x9e   : > { %v3132_v27 = vpop.permute.xlu1 %284  ;;  %2789 = vset.pattern.permute.xlu1 %v2927_v23  ;;  %v3134_v28 = vpop.permute.xlu0 %279 }
  0x9f   : > { %590 = vperm.xlu1 %2789, %v3024_v2   ;;  %614 = vperm.xlu0 %2790, %v3042_v8  }
  0xa2   : > { %v3138_v30 = vpop.permute.xlu1 %294  ;;  %v3140_v31 = vpop.permute.xlu0 %289 }
  0xa3   : > { %598 = vperm.xlu1 %2789, %v3022_v1   ;;  %622 = vperm.xlu0 %2790, %v3048_v10  }
  0xa6   : > { %v3149_v34 = vpop.permute.xlu1 %304  ;;  %v3151_v35 = vpop.permute.xlu0 %299 }
  0xa7   : > { %602 = vperm.xlu1 %2789, %v3028_v3   ;;  %630 = vperm.xlu0 %2790, %v3054_v12  }
  0xaa   : > { %v3158_v37 = vpop.permute.xlu1 %314  ;;  %v3160_v38 = vpop.permute.xlu0 %309 }
  0xab   : > { %610 = vperm.xlu1 %2789, %v3034_v5   ;;  %638 = vperm.xlu0 %2790, %v3060_v14  }
  0xae   : > { %v3166_v41 = vpop.permute.xlu1 %324  ;;  %v3168_v42 = vpop.permute.xlu0 %319 }
  0xaf   : > { %618 = vperm.xlu1 %2789, %v3040_v7   ;;  %646 = vperm.xlu0 %2790, %v3066_v16  }
  0xb3   : > { %v334_v44 = vpop.permute.xlu1 %333  ;;  %626 = vperm.xlu1 %2789, %v3046_v9   ;;  %2791 = vset.pattern.permute.xlu0 %v2928_v45  ;;  %v330_v46 = vpop.permute.xlu0 %329 }
  0xb4   : > { %v399_v47 = vsel %vm3172_vm1, %v334_v44, %v3123_v24  ;;  %v398_v48 = vsel %vm3172_vm1, %v330_v46, %v3118_v21  ;;  %677 = vperm.xlu0 %2791, %v3024_v2  }
  0xb7   : > { %v338_v49 = vpop.permute.xlu1 %337  ;;  %634 = vperm.xlu1 %2789, %v3052_v11   ;;  %v342_v50 = vpop.permute.xlu0 %341 }
  0xb8   : > { %v400_v51 = vsel %vm3172_vm1, %v338_v49, %v3114_v20  ;;  %v401_v52 = vsel %vm3172_vm1, %v342_v50, %v3120_v22  ;;  %689 = vperm.xlu0 %2791, %v3028_v3  }
  0xbb   : > { %v346_v53 = vpop.permute.xlu1 %345  ;;  %642 = vperm.xlu1 %2789, %v3058_v13   ;;  %v350_v54 = vpop.permute.xlu0 %349 }
  0xbc   : > { %v402_v55 = vsel %vm3172_vm1, %v346_v53, %v3129_v26  ;;  %v403_v56 = vsel %vm3172_vm1, %v350_v54, %v3126_v25  ;;  %697 = vperm.xlu0 %2791, %v3034_v5  }
  0xbf   : > { %v354_v57 = vpop.permute.xlu1 %353  ;;  %650 = vperm.xlu1 %2789, %v3064_v15   ;;  %v358_v58 = vpop.permute.xlu0 %357 }
  0xc0   : > { %v404_v59 = vsel %vm3172_vm1, %v354_v57, %v3134_v28  ;;  %v405_v60 = vsel %vm3172_vm1, %v358_v58, %v3132_v27  ;;  %705 = vperm.xlu0 %2791, %v3040_v7  }
  0xc3   : > { %v362_v61 = vpop.permute.xlu1 %361  ;;  %2792 = vset.pattern.permute.xlu1 %v2928_v45  ;;  %v366_v62 = vpop.permute.xlu0 %365 }
  0xc4   : > { %v406_v63 = vsel %vm3172_vm1, %v362_v61, %v3140_v31  ;;  %v407_v2 = vsel %vm3172_vm1, %v366_v62, %v3138_v30  ;;  %681 = vperm.xlu1 %2792, %v3030_v4   ;;  %713 = vperm.xlu0 %2791, %v3046_v9   ;;  %v479_v9 = vsel %vm414_vm2, 1, %v2923_v0 }
  0xc7   : > { %v370_v3 = vpop.permute.xlu1 %369  ;;  %v374_v5 = vpop.permute.xlu0 %373 }
  0xc8   : > { %v408_v7 = vsel %vm3172_vm1, %v370_v3, %v3151_v35  ;;  %v409_v17 = vsel %vm3172_vm1, %v374_v5, %v3149_v34  ;;  %685 = vperm.xlu1 %2792, %v3022_v1   ;;  %721 = vperm.xlu0 %2791, %v3052_v11   ;;  %v483_v1 = vrot.slane %v479_v9, %v3156_v36 }
  0xca   : > { %vm3243_vm3 = vcmp.eq.s32.totalorder %v483_v1, 1 }
  0xcb   : > { %v378_v18 = vpop.permute.xlu1 %377  ;;  %v382_v4 = vpop.permute.xlu0 %381 }
  0xcc   : > { %v410_v19 = vsel %vm3172_vm1, %v378_v18, %v3160_v38  ;;  %v411_v20 = vsel %vm3172_vm1, %v382_v4, %v3158_v37  ;;  %693 = vperm.xlu1 %2792, %v3036_v6   ;;  %729 = vperm.xlu0 %2791, %v3058_v13  }
  0xcf   : > { %v386_v11 = vpop.permute.xlu1 %385  ;;  %v390_v21 = vpop.permute.xlu0 %389 }
  0xd0   : > { %v412_v22 = vsel %vm3172_vm1, %v386_v11, %v3168_v42  ;;  %v413_v23 = vsel %vm3172_vm1, %v390_v21, %v3166_v41  ;;  %701 = vperm.xlu1 %2792, %v3042_v8   ;;  %737 = vperm.xlu0 %2791, %v3064_v15   ;;  %v653_v11 = vsel %vm588_vm6, 1, %v2923_v0 }
  0xd4   : > { %709 = vperm.xlu1 %2792, %v3048_v10   ;;  %v417_v13 = vpop.permute.xlu1 %416  ;;  %v421_v24 = vpop.permute.xlu0 %420 }
  0xd5   : > { %v3250_v25 = vsel %vm3243_vm3, %v417_v13, %v398_v48  ;;  %v3254_v26 = vsel %vm3243_vm3, %v421_v24, %v399_v47  ;;  %v566_v47 = vsel %vm501_vm4, 1, %v2923_v0 }
  0xd6   : > { %v570_v50 = vrot.slane %v566_v47, %v3156_v36 }
  0xd8   : > { %717 = vperm.xlu1 %2792, %v3054_v12   ;;  %v425_v8 = vpop.permute.xlu1 %424  ;;  %v433_v15 = vpop.permute.xlu0 %432  ;;  %vm3316_vm5 = vcmp.eq.s32.totalorder %v570_v50, 1 }
  0xd9   : > { %v3259_v27 = vsel %vm3243_vm3, %v425_v8, %v400_v51  ;;  %v3263_v10 = vsel %vm3243_vm3, %v433_v15, %v402_v55  ;;  %v2929_v8 = vmov 683565275  }
  0xdc   : > { %725 = vperm.xlu1 %2792, %v3060_v14   ;;  %v429_v28 = vpop.permute.xlu1 %428  ;;  %v441_v29 = vpop.permute.xlu0 %440 }
  0xdd   : > { %v3268_v30 = vsel %vm3243_vm3, %v429_v28, %v401_v52  ;;  %v3272_v12 = vsel %vm3243_vm3, %v441_v29, %v404_v59 }
  0xe0   : > { %733 = vperm.xlu1 %2792, %v3066_v16   ;;  %v437_v31 = vpop.permute.xlu1 %436  ;;  %v449_v33 = vpop.permute.xlu0 %448 }
  0xe1   : > { %v3277_v34 = vsel %vm3243_vm3, %v437_v31, %v403_v56  ;;  %v3281_v14 = vsel %vm3243_vm3, %v449_v33, %v406_v63 }
  0xe4   : > { %v445_v35 = vpop.permute.xlu1 %444  ;;  %v457_v37 = vpop.permute.xlu0 %456 }
  0xe5   : > { %v3285_v38 = vsel %vm3243_vm3, %v445_v35, %v405_v60  ;;  %v3289_v39 = vsel %vm3243_vm3, %v457_v37, %v408_v7 }
  0xe8   : > { %v453_v16 = vpop.permute.xlu1 %452  ;;  %v465_v40 = vpop.permute.xlu0 %464 }
  0xe9   : > { %v3293_v41 = vsel %vm3243_vm3, %v453_v16, %v407_v2  ;;  %v3297_v42 = vsel %vm3243_vm3, %v465_v40, %v410_v19 }
  0xec   : > { %v461_v43 = vpop.permute.xlu1 %460  ;;  %v473_v44 = vpop.permute.xlu0 %472 }
  0xed   : > { %v3302_v45 = vsel %vm3243_vm3, %v461_v43, %v409_v17  ;;  %v3306_v46 = vsel %vm3243_vm3, %v473_v44, %v412_v22 }
  0xf0   : > { %v469_v48 = vpop.permute.xlu1 %468 }
  0xf1   : > { %v3311_v49 = vsel %vm3243_vm3, %v469_v48, %v411_v20  ;;  %v3314_v51 = vpop.permute.xlu0 %503 }
  0xf4   : > { %v477_v52 = vpop.permute.xlu1 %476 }
  0xf5   : > { %v3322_v54 = vsel %vm3243_vm3, %v477_v52, %v413_v23  ;;  %v3324_v55 = vpop.permute.xlu0 %515  ;;  %v657_v23 = vrot.slane %v653_v11, %v3156_v36 }
  0xf6   : > { %v575_v56 = vsel %vm3316_vm5, %v3324_v55, %v3268_v30 }
  0xf7   : > { %vm3375_vm7 = vcmp.eq.s32.totalorder %v657_v23, 1 }
  0xf9   : > { %v508_v57 = vpop.permute.xlu1 %507  ;;  %v3330_v58 = vpop.permute.xlu0 %523 }
  0xfa   : > { %v573_v59 = vsel %vm3316_vm5, %v508_v57, %v3254_v26  ;;  %v577_v60 = vsel %vm3316_vm5, %v3330_v58, %v3277_v34 }
  0xfd   : > { %v512_v61 = vpop.permute.xlu1 %511  ;;  %v532_v62 = vpop.permute.xlu0 %531 }
  0xfe   : > { %v574_v63 = vsel %vm3316_vm5, %v512_v61, %v3259_v27  ;;  %v579_v2 = vsel %vm3316_vm5, %v532_v62, %v3285_v38  ;;  %v3435_v62 = vld [vmem:[%s4917_s1] ss:$0 sm:$0xff] }
 0x101   : > { %v520_v3 = vpop.permute.xlu1 %519  ;;  %v540_v5 = vpop.permute.xlu0 %539 }
 0x102   : > { %v576_v7 = vsel %vm3316_vm5, %v520_v3, %v3263_v10  ;;  %v581_v17 = vsel %vm3316_vm5, %v540_v5, %v3293_v41  ;;  %v3446_v5 = vld [vmem:[%s4918_s2] ss:$0 sm:$0xff] }
 0x105   : > { %v528_v18 = vpop.permute.xlu1 %527  ;;  %v548_v4 = vpop.permute.xlu0 %547 }
 0x106   : > { %v578_v9 = vsel %vm3316_vm5, %v528_v18, %v3272_v12  ;;  %v583_v19 = vsel %vm3316_vm5, %v548_v4, %v3302_v45 }
 0x109   : > { %v536_v20 = vpop.permute.xlu1 %535  ;;  %v556_v1 = vpop.permute.xlu0 %555 }
 0x10a   : > { %v580_v21 = vsel %vm3316_vm5, %v536_v20, %v3281_v14  ;;  %v585_v22 = vsel %vm3316_vm5, %v556_v1, %v3311_v49 }
 0x10d   : > { %v544_v6 = vpop.permute.xlu1 %543  ;;  %v3366_v13 = vpop.permute.xlu0 %563 }
 0x10e   : > { %v582_v24 = vsel %vm3316_vm5, %v544_v6, %v3289_v39  ;;  %v587_v26 = vsel %vm3316_vm5, %v3366_v13, %v3322_v54 }
 0x111   : > { %v552_v15 = vpop.permute.xlu1 %551 }
 0x112   : > { %v584_v27 = vsel %vm3316_vm5, %v552_v15, %v3297_v42  ;;  %v595_v10 = vpop.permute.xlu0 %594 }
 0x113   : > { %v3384_v28 = vsel %vm3375_vm7, %v595_v10, %v573_v59  ;;  %v572_v59 = vsel %vm3316_vm5, %v3314_v51, %v3250_v25 }
 0x115   : > { %v560_v29 = vpop.permute.xlu1 %559 }
 0x116   : > { %v586_v12 = vsel %vm3316_vm5, %v560_v29, %v3306_v46  ;;  %v607_v31 = vpop.permute.xlu0 %606  ;;  %v740_v46 = vsel %vm675_vm8, 1, %v2923_v0 }
 0x117   : > { %v3391_v33 = vsel %vm3375_vm7, %v607_v31, %v576_v7  ;;  %v744_v48 = vrot.slane %v740_v46, %v3156_v36 }
 0x119   : > { %vm3424_vm9 = vcmp.eq.s32.totalorder %v744_v48, 1  ;;  %v4929_v48 = vmov 2475754826  }
 0x11a   : > { %v591_v14 = vpop.permute.xlu1 %590  ;;  %v615_v35 = vpop.permute.xlu0 %614 }
 0x11b   : > { %v3395_v37 = vsel %vm3375_vm7, %v615_v35, %v578_v9 }
 0x11e   : > { %v599_v38 = vpop.permute.xlu1 %598  ;;  %v623_v39 = vpop.permute.xlu0 %622 }
 0x11f   : > { %v3399_v16 = vsel %vm3375_vm7, %v599_v38, %v574_v63  ;;  %v3403_v40 = vsel %vm3375_vm7, %v623_v39, %v580_v21  ;;  %v659_v63 = vsel %vm3375_vm7, %v591_v14, %v572_v59  ;;  %v4927_v59 = vmov 2131351028  }
 0x122   : > { %v603_v41 = vpop.permute.xlu1 %602  ;;  %v631_v42 = vpop.permute.xlu0 %630 }
 0x123   : > { %v3407_v43 = vsel %vm3375_vm7, %v631_v42, %v582_v24 }
 0x126   : > { %v611_v44 = vpop.permute.xlu1 %610  ;;  %v639_v45 = vpop.permute.xlu0 %638 }
 0x127   : > { %v3413_v47 = vsel %vm3375_vm7, %v639_v45, %v584_v27 }
 0x12a   : > { %v619_v49 = vpop.permute.xlu1 %618  ;;  %v647_v50 = vpop.permute.xlu0 %646 }
 0x12b   : > { %v3418_v52 = vsel %vm3375_vm7, %v619_v49, %v579_v2  ;;  %v3422_v57 = vsel %vm3375_vm7, %v647_v50, %v586_v12 }
 0x12e   : > { %v627_v61 = vpop.permute.xlu1 %626 }
 0x12f   : > { %v3441_v2 = vsel %vm3375_vm7, %v627_v61, %v581_v17  ;;  %v678_v3 = vpop.permute.xlu0 %677  ;;  %v662_v17 = vsel %vm3375_vm7, %v603_v41, %v575_v56  ;;  %v664_v56 = vsel %vm3375_vm7, %v611_v44, %v577_v60 }
 0x130   : > { %v3450_v25 = vsel %vm3424_vm9, %v678_v3, %v659_v63  ;;  %v4925_v63 = vmov 2102212464  }
 0x131   : > { %v768_v51 = vmul.f32 %v3435_v62, %v3450_v25 }
 0x132   : > { %v635_v7 = vpop.permute.xlu1 %634 }
 0x133   : > { %v3462_v18 = vadd.f32 %v3446_v5, %v768_v51  ;;  %v3466_v4 = vsel %vm3375_vm7, %v635_v7, %v583_v19  ;;  %v690_v9 = vpop.permute.xlu0 %689  ;;  %v2933_v51 = vmov 920167782  }
 0x134   : > { %v3470_v20 = vsel %vm3424_vm9, %v690_v9, %v662_v17 }
 0x135   : > { %v806_v1 = vand.u32 2147483647, %v3462_v18  ;;  %v809_v11 = vand.u32 2139095040, %v3462_v18  ;;  %v771_v30 = vmul.f32 %v3435_v62, %v3470_v20 }
 0x136   : > { %v643_v55 = vpop.permute.xlu1 %642 }
 0x137   : > { %v810_v19 = vshrl.u32 %v809_v11, 23  ;;  %v3485_v21 = vsel %vm3375_vm7, %v643_v55, %v585_v22  ;;  %v698_v23 = vpop.permute.xlu0 %697  ;;  %v813_v6 = vand.u32 8388607, %v806_v1  ;;  %v3490_v24 = vadd.f32 %v3446_v5, %v771_v30 }
 0x138   : > { %v3494_v15 = vsel %vm3424_vm9, %v698_v23, %v664_v56  ;;  %v4923_v56 = vmov 1326507024   ;;  %vm3627_vm8 = vcmp.le.f32.partialorder %v806_v1, 0.7853982 }
 0x139   : > { %v2594_v34 = vadd.s32 4294967169, %v810_v19  ;;  %v773_v58 = vmul.f32 %v3435_v62, %v3494_v15  ;;  %v1118_v60 = vand.u32 2147483647, %v3490_v24  ;;  %v1121_v22 = vand.u32 2139095040, %v3490_v24 }
 0x13a   : > { %v651_v27 = vpop.permute.xlu1 %650  ;;  %v814_v31 = vor.u32 8388608, %v813_v6 }
 0x13b   : > { %v816_v10 = vadd.s32 1, %v2594_v34  ;;  %v3501_v29 = vadd.f32 %v3446_v5, %v773_v58  ;;  %v3510_v12 = vsel %vm3375_vm7, %v651_v27, %v587_v26  ;;  %v1122_v14 = vshrl.u32 %v1121_v22, 23 }
 0x13c   : > { %v1125_v35 = vand.u32 8388607, %v1118_v60  ;;  %v3515_v53 = vshll.u32 %v814_v31, 8  ;;  %vm808_vm7 = vcmp.lt.s32.totalorder %v3462_v18, 0 }
 0x13d   : > { %vm817_vm10 = vcmp.gt.s32.totalorder %v816_v10, 0  ;;  %v1329_v38 = vand.u32 2139095040, %v3501_v29  ;;  %v2606_v41 = vadd.s32 4294967169, %v1122_v14  ;;  %v4922_v54 = vand.u32 2147483647, %v3501_v29 }
 0x13e   : > { %v818_v39 = vsel %vm817_vm10, %v816_v10, 0  ;;  %v1126_v45 = vor.u32 8388608, %v1125_v35  ;;  %vm1120_vm10 = vcmp.lt.s32.totalorder %v3490_v24, 0 }
 0x13f   : > { %v819_v42 = vshrl.u32 %v818_v39, 5  ;;  %v820_v44 = vand.u32 31, %v818_v39  ;;  %v1330_v13 = vshrl.u32 %v1329_v38, 23  ;;  %v1128_v50 = vadd.s32 1, %v2606_v41 }
 0x141   : > { %v821_v26 = vsub.s32 32, %v820_v44  ;;  %v823_v46 = vshll.u32 %v2929_v8, %v820_v44  ;;  %v826_v49 = vshll.u32 %v4929_v48, %v820_v44  ;;  %v829_v61 = vshll.u32 %v4927_v59, %v820_v44 }
 0x142   : > { %v832_v3 = vshll.u32 %v4925_v63, %v820_v44  ;;  %v835_v7 = vshll.u32 %v2933_v51, %v820_v44  ;;  %vm838_vm11 = vcmp.lt.s32.totalorder %v819_v42, 1  ;;  %vm839_vm12 = vcmp.lt.s32.totalorder %v819_v42, 2 }
 0x143   : > { %v824_v17 = vshrl.u32 %v4929_v48, %v821_v26  ;;  %v827_v9 = vshrl.u32 %v4927_v59, %v821_v26  ;;  %v830_v11 = vshrl.u32 %v4925_v63, %v821_v26  ;;  %v822_v30 = vshrl.u32 %v2929_v8, %v821_v26 }
 0x144   : > { %v833_v55 = vshrl.u32 %v2933_v51, %v821_v26  ;;  %v836_v19 = vshrl.u32 %v4923_v56, %v821_v26  ;;  %vm840_vm13 = vcmp.lt.s32.totalorder %v819_v42, 3  ;;  %vm1129_vm14 = vcmp.gt.s32.totalorder %v1128_v50, 0 }
 0x145   : > { %v825_v23 = vor.u32 %v824_v17, %v823_v46  ;;  %v828_v6 = vor.u32 %v827_v9, %v826_v49  ;;  %v831_v34 = vor.u32 %v830_v11, %v829_v61  ;;  %vm841_vm15 = vcmp.lt.s32.totalorder %v819_v42, 4 }
 0x146   : > { %v834_v58 = vor.u32 %v833_v55, %v832_v3  ;;  %v837_v22 = vor.u32 %v836_v19, %v835_v7  ;;  %v1130_v27 = vsel %vm1129_vm14, %v1128_v50, 0  ;;  %v3538_v7 = vshll.u32 %v1126_v45, 8 }
 0x147   : > { %v842_v10 = vsel %vm838_vm11, %v822_v30, %v825_v23  ;;  %v843_v31 = vsel %vm841_vm15, %v831_v34, 2102212464  ;;  %v846_v14 = vsel %vm838_vm11, %v825_v23, %v828_v6  ;;  %v850_v35 = vsel %vm838_vm11, %v828_v6, %v831_v34 }
 0x148   : > { %v844_v38 = vsel %vm840_vm13, %v828_v6, %v843_v31  ;;  %v847_v39 = vsel %vm841_vm15, %v834_v58, 920167782  ;;  %v851_v41 = vsel %vm841_vm15, %v837_v22, 1326507024  ;;  %v1131_v44 = vshrl.u32 %v1130_v27, 5 }
 0x149   : > { %v845_v26 = vsel %vm839_vm12, %v842_v10, %v844_v38  ;;  %v848_v46 = vsel %vm840_vm13, %v831_v34, %v847_v39  ;;  %v852_v49 = vsel %vm840_vm13, %v834_v58, %v851_v41  ;;  %v1132_v61 = vand.u32 31, %v1130_v27 }
 0x14a   : > { %v849_v50 = vsel %vm839_vm12, %v846_v14, %v848_v46  ;;  %v853_v3 = vsel %vm839_vm12, %v850_v35, %v852_v49  ;;  %v861_v55 = vmul.u32 %v3515_v53, %v845_v26  ;;  %v2614_v23 = vadd.s32 4294967169, %v1330_v13 }
 0x14b   : > { %v3541_v17 = vmul.u32.u64.low %v3515_v53, %v853_v3  ;;  %v3542_v9 = vmul.u32.u64.high %v3515_v53, %v853_v3, %v3541_v17  ;;  %v3545_v11 = vmul.u32.u64.low %v3515_v53, %v849_v50  ;;  %v3546_v30 = vmul.u32.u64.high %v3515_v53, %v849_v50, %v3545_v11 }
 0x14c   : > { %v1133_v19 = vsub.s32 32, %v1132_v61  ;;  %v3552_v6 = vand.u32 8388607, %v4922_v54  ;;  %v1135_v42 = vshll.u32 %v2929_v8, %v1132_v61  ;;  %v1138_v45 = vshll.u32 %v4929_v48, %v1132_v61 }
 0x14d   : > { %v1141_v34 = vshll.u32 %v4927_v59, %v1132_v61  ;;  %vm1150_vm0 = vcmp.lt.s32.totalorder %v1131_v44, 1  ;;  %v1144_v53 = vshll.u32 %v4925_v63, %v1132_v61  ;;  %vm863_vm1 = vc.u32 %v3542_v9, %v3545_v11 }
 0x14e   : > { %v1136_v58 = vshrl.u32 %v4929_v48, %v1133_v19  ;;  %v1139_v22 = vshrl.u32 %v4927_v59, %v1133_v19  ;;  %v1142_v27 = vshrl.u32 %v4925_v63, %v1133_v19  ;;  %v864_v13 = vadd.s32 1, %v3546_v30 }
 0x14f   : > { %v1145_v10 = vshrl.u32 %v2933_v51, %v1133_v19  ;;  %v1147_v31 = vshll.u32 %v2933_v51, %v1132_v61  ;;  %v1148_v39 = vshrl.u32 %v4923_v56, %v1133_v19  ;;  %vm1151_vm2 = vcmp.lt.s32.totalorder %v1131_v44, 2 }
 0x150   : > { %v1137_v14 = vor.u32 %v1136_v58, %v1135_v42  ;;  %v1140_v35 = vor.u32 %v1139_v22, %v1138_v45  ;;  %v1143_v38 = vor.u32 %v1142_v27, %v1141_v34  ;;  %v865_v41 = vsel %vm863_vm1, %v864_v13, %v3546_v30 }
 0x151   : > { %v1146_v26 = vor.u32 %v1145_v10, %v1144_v53  ;;  %vm1153_vm3 = vcmp.lt.s32.totalorder %v1131_v44, 4  ;;  %v866_v46 = vadd.s32 %v865_v41, %v861_v55  ;;  %v1134_v49 = vshrl.u32 %v2929_v8, %v1133_v19  ;;  %v706_v53 = vpop.permute.xlu0 %705 }
 0x152   : > { %v1149_v50 = vor.u32 %v1148_v39, %v1147_v31  ;;  %v1155_v3 = vsel %vm1153_vm3, %v1143_v38, 2102212464  ;;  %vm1152_vm4 = vcmp.lt.s32.totalorder %v1131_v44, 3  ;;  %v1158_v17 = vsel %vm1150_vm0, %v1137_v14, %v1140_v35 }
 0x153   : > { %v1159_v54 = vsel %vm1153_vm3, %v1146_v26, 920167782  ;;  %v1162_v61 = vsel %vm1150_vm0, %v1140_v35, %v1143_v38  ;;  %v867_v42 = vadd.s32 536870912, %v866_v46  ;;  %v1154_v45 = vsel %vm1150_vm0, %v1134_v49, %v1137_v14 }
 0x154   : > { %v1160_v34 = vsel %vm1152_vm4, %v1143_v38, %v1159_v54  ;;  %v1163_v58 = vsel %vm1153_vm3, %v1149_v50, 1326507024  ;;  %v1156_v30 = vsel %vm1152_vm4, %v1140_v35, %v1155_v3  ;;  %v1336_v55 = vadd.s32 1, %v2614_v23 }
 0x155   : > { %v1161_v22 = vsel %vm1151_vm2, %v1158_v17, %v1160_v34  ;;  %v1164_v27 = vsel %vm1152_vm4, %v1146_v26, %v1163_v58  ;;  %v868_v19 = vshrl.u32 %v867_v42, 30  ;;  %v1157_v14 = vsel %vm1151_vm2, %v1154_v45, %v1156_v30  ;;  %v682_v42 = vpop.permute.xlu1 %681 }
 0x156   : > { %v1165_v13 = vsel %vm1151_vm2, %v1162_v61, %v1164_v27  ;;  %v3575_v10 = vmul.u32.u64.low %v3538_v7, %v1161_v22  ;;  %v3576_v31 = vmul.u32.u64.high %v3538_v7, %v1161_v22, %v3575_v10  ;;  %vm1337_vm5 = vcmp.gt.s32.totalorder %v1336_v55, 0 }
 0x157   : > { %v3580_v39 = vmul.u32.u64.low %v3538_v7, %v1165_v13  ;;  %v3581_v41 = vmul.u32.u64.high %v3538_v7, %v1165_v13, %v3580_v39  ;;  %v869_v54 = vshll.u32 %v868_v19, 30  ;;  %v1338_v35 = vsel %vm1337_vm5, %v1336_v55, 0 }
 0x158   : > { %v3587_v23 = vsel %vm3424_vm9, %v706_v53, %v3418_v52  ;;  %v1340_v38 = vand.u32 31, %v1338_v35  ;;  %v1176_v49 = vadd.s32 1, %v3576_v31  ;;  %v1334_v50 = vor.u32 8388608, %v3552_v6 }
 0x159   : > { %v3589_v26 = vsub.s32 %v866_v46, %v869_v54  ;;  %v1173_v3 = vmul.u32 %v3538_v7, %v1157_v14  ;;  %vm1175_vm6 = vc.u32 %v3581_v41, %v3575_v10  ;;  %v775_v17 = vmul.f32 %v3435_v62, %v3587_v23 }
 0x15a   : > { %v1341_v44 = vsub.s32 32, %v1340_v38  ;;  %v1177_v52 = vsel %vm1175_vm6, %v1176_v49, %v3576_v31  ;;  %v862_v6 = vadd.s32 %v3545_v11, %v3542_v9  ;;  %v892_v45 = vsub.s32 4, %v868_v19 }
 0x15b   : > { %v872_v61 = vsub.s32 0, %v3589_v26  ;;  %v1178_v46 = vadd.s32 %v1177_v52, %v1173_v3  ;;  %v3604_v34 = vshll.u32 %v1334_v50, 8  ;;  %v3609_v27 = vadd.f32 %v3446_v5, %v775_v17 }
 0x15c   : > { %v1344_v30 = vshrl.u32 %v4929_v48, %v1341_v44  ;;  %v1347_v22 = vshrl.u32 %v4927_v59, %v1341_v44  ;;  %v3611_v53 = vshrl.u32 %v1338_v35, 5  ;;  %v1350_v13 = vshrl.u32 %v4925_v63, %v1341_v44 }
 0x15d   : > { %v2595_v7 = vmin.u32 %v872_v61, %v3589_v26  ;;  %v1179_v58 = vadd.s32 536870912, %v1178_v46  ;;  %v3617_v9 = vsel %vm3424_vm9, %v682_v42, %v3384_v28  ;;  %v1343_v31 = vshll.u32 %v2929_v8, %v1340_v38 }
 0x15e   : > { %v1346_v39 = vshll.u32 %v4929_v48, %v1340_v38  ;;  %v1353_v54 = vshrl.u32 %v2933_v51, %v1341_v44  ;;  %v1349_v49 = vshll.u32 %v4927_v59, %v1340_v38  ;;  %v1352_v35 = vshll.u32 %v4925_v63, %v1340_v38 }
 0x15f   : > { %v874_v55 = vclz %v2595_v7  ;;  %v1180_v11 = vshrl.u32 %v1179_v58, 30  ;;  %v1356_v50 = vshrl.u32 %v4923_v56, %v1341_v44  ;;  %v893_v28 = vsel %vm808_vm7, %v892_v45, %v868_v19  ;;  %v3642_v19 = vld [vmem:[%s4919_s3] sm:$0x1] }
 0x160   : > { %v1345_v61 = vor.u32 %v1344_v30, %v1343_v31  ;;  %v1348_v52 = vor.u32 %v1347_v22, %v1346_v39  ;;  %v1351_v42 = vor.u32 %v1350_v13, %v1349_v49  ;;  %v1354_v7 = vor.u32 %v1353_v54, %v1352_v35 }
 0x161   : > { %v2596_v14 = vadd.s32 4294967294, %v874_v55  ;;  %v1181_v17 = vshll.u32 %v1180_v11, 30  ;;  %v1355_v58 = vshll.u32 %v2933_v51, %v1340_v38  ;;  %v1204_v1 = vsub.s32 4, %v1180_v11 }
 0x162   : > { %vm1358_vm12 = vcmp.lt.s32.totalorder %v3611_v53, 1  ;;  %vm1360_vm13 = vcmp.lt.s32.totalorder %v3611_v53, 3  ;;  %vm1361_vm14 = vcmp.lt.s32.totalorder %v3611_v53, 4  ;;  %vm3651_vm15 = vcmp.le.f32.partialorder %v1118_v60, 0.7853982 }
 0x163   : > { %vm2597_vm11 = vcmp.lt.s32.totalorder %v2596_v14, 0  ;;  %v3635_v56 = vsub.s32 %v1178_v46, %v1181_v17  ;;  %v1357_v48 = vor.u32 %v1356_v50, %v1355_v58  ;;  %v1366_v46 = vsel %vm1358_vm12, %v1345_v61, %v1348_v52 }
 0x164   : > { %v877_v55 = vsel %vm2597_vm11, 0, %v2596_v14  ;;  %v1363_v31 = vsel %vm1361_vm14, %v1351_v42, 2102212464  ;;  %v1342_v54 = vshrl.u32 %v2929_v8, %v1341_v44  ;;  %vm1359_vm0 = vcmp.lt.s32.totalorder %v3611_v53, 2 }
 0x165   : > { %v878_v63 = vsub.s32 32, %v877_v55  ;;  %v882_v59 = vsub.s32 4294967266, %v877_v55  ;;  %v879_v45 = vshll.u32 %v3589_v26, %v877_v55  ;;  %v1184_v38 = vsub.s32 0, %v3635_v56 }
 0x166   : > { %v1367_v26 = vsel %vm1361_vm14, %v1354_v7, 920167782  ;;  %v4931_v14 = vand.u32 2147483647, %v3609_v27  ;;  %vm246_vm1 = vcmp.gt.s32.totalorder %v3642_v19, 0  ;;  %v1362_v35 = vsel %vm1358_vm12, %v1342_v54, %v1345_v61 }
 0x167   : > { %v880_v30 = vshrl.u32 %v862_v6, %v878_v63  ;;  %v883_v22 = vadd.s32 127, %v882_v59  ;;  %v2607_v39 = vmin.u32 %v1184_v38, %v3635_v56  ;;  %v1368_v59 = vsel %vm1360_vm13, %v1351_v42, %v1367_v26 }
 0x168   : > { %v1369_v6 = vsel %vm1359_vm0, %v1366_v46, %v1368_v59  ;;  %v1364_v44 = vsel %vm1360_vm13, %v1348_v52, %v1363_v31  ;;  %v1370_v50 = vsel %vm1358_vm12, %v1348_v52, %v1351_v42  ;;  %v895_v58 = vsel %vm3627_vm8, 0, %v893_v28 }
 0x169   : > { %v881_v63 = vor.u32 %v880_v30, %v879_v45  ;;  %v884_v60 = vshll.u32 %v883_v22, 23  ;;  %v1186_v49 = vclz %v2607_v39  ;;  %v1205_v55 = vsel %vm1120_vm10, %v1204_v1, %v1180_v11 }
 0x16a   : > { %v1371_v45 = vsel %vm1361_vm14, %v1357_v48, 1326507024  ;;  %v3683_v46 = vmul.u32.u64.low %v3604_v34, %v1369_v6  ;;  %v3684_v30 = vmul.u32.u64.high %v3604_v34, %v1369_v6, %v3683_v46  ;;  %v1365_v42 = vsel %vm1359_vm0, %v1362_v35, %v1364_v44 }
 0x16b   : > { %v885_v17 = vor.u32 4788187, %v884_v60  ;;  %v2608_v38 = vadd.s32 4294967294, %v1186_v49  ;;  %v1372_v61 = vsel %vm1360_vm13, %v1354_v7, %v1371_v45  ;;  %v888_v52 = vcvt.s32.f32 %v881_v63 }
 0x16c   : > { %v1373_v28 = vsel %vm1359_vm0, %v1370_v50, %v1372_v61  ;;  %v1537_v1 = vand.u32 2139095040, %v3609_v27  ;;  %v899_v31 = vadd.s32 3, %v895_v58  ;;  %v1174_v26 = vadd.s32 %v3575_v10, %v3581_v41 }
 0x16d   : > { %v886_v22 = vand.u32 2147483647, %v885_v17  ;;  %vm2609_vm2 = vcmp.lt.s32.totalorder %v2608_v38, 0  ;;  %v3691_v11 = vmul.u32.u64.low %v3604_v34, %v1373_v28  ;;  %v3692_v48 = vmul.u32.u64.high %v3604_v34, %v1373_v28, %v3691_v11 }
 0x16e   : > { %v1189_v39 = vsel %vm2609_vm2, 0, %v2608_v38  ;;  %v1207_v63 = vsel %vm3651_vm15, 0, %v1205_v55  ;;  %v1384_v53 = vadd.s32 1, %v3684_v30  ;;  %v1381_v6 = vmul.u32 %v3604_v34, %v1365_v42 }
 0x16f   : > { %v889_v7 = vmul.f32 %v888_v52, %v886_v22  ;;  %v1190_v54 = vsub.s32 32, %v1189_v39  ;;  %v1194_v59 = vsub.s32 4294967266, %v1189_v39  ;;  %v1538_v49 = vshrl.u32 %v1537_v1, 23  ;;  %v714_v1 = vpop.permute.xlu0 %713 }
 0x170   : > { %v1541_v35 = vand.u32 8388607, %v4931_v14  ;;  %v1191_v44 = vshll.u32 %v3635_v56, %v1189_v39  ;;  %vm1383_vm3 = vc.u32 %v3692_v48, %v3683_v46  ;;  %v769_v55 = vmul.f32 %v3435_v62, %v3617_v9 }
 0x171   : > { %v890_v60 = vxor.u32 2147483648, %v889_v7  ;;  %v1192_v50 = vshrl.u32 %v1174_v26, %v1190_v54  ;;  %v1195_v17 = vadd.s32 127, %v1194_v59  ;;  %v1385_v41 = vsel %vm1383_vm3, %v1384_v53, %v3684_v30 }
 0x172   : > { %v2622_v58 = vadd.s32 4294967169, %v1538_v49  ;;  %v1386_v56 = vadd.s32 %v1385_v41, %v1381_v6  ;;  %v2470_v61 = vsel %vm246_vm1, 1, %v2923_v0  ;;  %v3716_v52 = vand.u32 3, %v899_v31 }
 0x173   : > { %v891_v10 = vsel %vm808_vm7, %v890_v60, %v889_v7  ;;  %v1193_v45 = vor.u32 %v1192_v50, %v1191_v44  ;;  %v1196_v38 = vshll.u32 %v1195_v17, 23  ;;  %v1211_v28 = vadd.s32 3, %v1207_v63 }
 0x174   : > { %v894_v34 = vsel %vm3627_vm8, %v3462_v18, %v891_v10  ;;  %v1544_v22 = vadd.s32 1, %v2622_v58  ;;  %v1387_v42 = vadd.s32 536870912, %v1386_v56  ;;  %v1542_v11 = vor.u32 8388608, %v1541_v35 }
 0x175   : > { %2793 = vcosq.f32 %v894_v34  ;;  %v1197_v30 = vor.u32 4788187, %v1196_v38  ;;  %v3719_v3 = vadd.f32 %v3446_v5, %v769_v55  ;;  %v1200_v26 = vcvt.s32.f32 %v1193_v45 }
 0x176   : > { %2795 = vsinq.f32 %v894_v34  ;;  %vm1545_vm4 = vcmp.gt.s32.totalorder %v1544_v22, 0  ;;  %v1388_v39 = vshrl.u32 %v1387_v42, 30  ;;  %v2474_v0 = vrot.slane %v2470_v61, %v3156_v36 }
 0x177   : > { %v1198_v7 = vand.u32 2147483647, %v1197_v30  ;;  %v1546_v54 = vsel %vm1545_vm4, %v1544_v22, 0  ;;  %vm1328_vm5 = vcmp.lt.s32.totalorder %v3501_v29, 0  ;;  %v3726_v63 = vsel %vm3424_vm9, %v714_v1, %v3441_v2 }
 0x178   : > { %v1548_v19 = vand.u32 31, %v1546_v54  ;;  %v1389_v31 = vshll.u32 %v1388_v39, 30  ;;  %v3728_v53 = vand.u32 3, %v1211_v28  ;;  %v3731_v60 = vadd.s32 %v3683_v46, %v3692_v48 }
 0x179   : > { %v1201_v59 = vmul.f32 %v1200_v26, %v1198_v7  ;;  %v3733_v49 = vshll.u32 %v1542_v11, 8  ;;  %vm905_vm6 = vcmp.eq.s32.totalorder %v3716_v52, 2  ;;  %v3738_v44 = vshrl.u32 %v1546_v54, 5 }
 0x17a   : > { %v1549_v6 = vsub.s32 32, %v1548_v19  ;;  %v3736_v35 = vsub.s32 %v1386_v56, %v1389_v31  ;;  %v913_v50 = vand.u32 2139095040, %v3719_v3  ;;  %vm902_vm7 = vcmp.eq.s32.totalorder %v3716_v52, 0 }
 0x17b   : > { %v1202_v36 = vxor.u32 2147483648, %v1201_v59  ;;  %v1412_v2 = vsub.s32 4, %v1388_v39  ;;  %v1551_v17 = vshll.u32 %v2929_v8, %v1548_v19  ;;  %v4948_v10 = vmov 2475754826  }
 0x17c   : > { %v1552_v46 = vshrl.u32 %v4948_v10, %v1549_v6  ;;  %v4949_v48 = vmov 2131351028   ;;  %vm3745_vm8 = vcmp.eq.s32.totalorder %v2474_v0, 1  ;;  %vm901_vm11 = vcmp.lt.s32.totalorder %v3716_v52, 2 }
 0x17d   : > { %v1555_v41 = vshrl.u32 %v4949_v48, %v1549_v6  ;;  %v1203_v55 = vsel %vm1120_vm10, %v1202_v36, %v1201_v59  ;;  %v1392_v34 = vsub.s32 0, %v3736_v35  ;;  %v1554_v45 = vshll.u32 %v4948_v10, %v1548_v19 }
 0x17e   : > { %v4952_v38 = vmov 2102212464   ;;  %vm2492_vm12 = vcmask 1031168   ;;  %vm898_vm13 = vweird.f32 %v3462_v18  ;;  %v1206_v61 = vsel %vm3651_vm15, %v3490_v24, %v1203_v55 }
 0x17f   : > { %v1558_v56 = vshrl.u32 %v4952_v38, %v1549_v6  ;;  %v1557_v22 = vshll.u32 %v4949_v48, %v1548_v19  ;;  %v1560_v30 = vshll.u32 %v4952_v38, %v1548_v19  ;;  %v1561_v42 = vshrl.u32 %v2933_v51, %v1549_v6 }
 0x180   : > { %2797 = vcosq.f32 %v1206_v61  ;;  %v2615_v28 = vmin.u32 %v1392_v34, %v3736_v35  ;;  %v1553_v11 = vor.u32 %v1552_v46, %v1551_v17  ;;  %v1556_v1 = vor.u32 %v1555_v41, %v1554_v45 }
 0x181   : > { %2799 = vsinq.f32 %v1206_v61  ;;  %v1559_v7 = vor.u32 %v1558_v56, %v1557_v22  ;;  %v1563_v26 = vshll.u32 %v2933_v51, %v1548_v19  ;;  %v4953_v54 = vmov 1326507024  }
 0x182   : > { %v1564_v13 = vshrl.u32 %v4953_v54, %v1549_v6  ;;  %v2794_v0 = vpop.eup %2793  ;;  %v1394_v59 = vclz %v2615_v28  ;;  %v3768_v31 = vsel %vm1328_vm5, %v1412_v2, %v1388_v39  ;;  %v1562_v36 = vor.u32 %v1561_v42, %v1560_v30 }
 0x183   : > { %v914_v55 = vshrl.u32 %v913_v50, 23  ;;  %v2796_v14 = vpop.eup %2795  ;;  %v906_v34 = vxor.u32 2147483648, %v2794_v0  ;;  %v1550_v17 = vshrl.u32 %v2929_v8, %v1549_v6  ;;  %vm1566_vm10 = vcmp.lt.s32.totalorder %v3738_v44, 1 }
 0x184   : > { %v1565_v46 = vor.u32 %v1564_v13, %v1563_v26  ;;  %v903_v19 = vxor.u32 2147483648, %v2796_v14  ;;  %v2616_v41 = vadd.s32 4294967294, %v1394_v59  ;;  %vm1568_vm14 = vcmp.lt.s32.totalorder %v3738_v44, 3 }
 0x185   : > { %vm1569_vm15 = vcmp.lt.s32.totalorder %v3738_v44, 4  ;;  %v907_v39 = vsel %vm905_vm6, %v906_v34, %v2796_v14  ;;  %v4954_v50 = vand.u32 2147483647, %v3501_v29  ;;  %v1570_v6 = vsel %vm1566_vm10, %v1550_v17, %v1553_v11 }
 0x186   : > { %v1571_v45 = vsel %vm1569_vm15, %v1559_v7, 2102212464  ;;  %v1574_v56 = vsel %vm1566_vm10, %v1553_v11, %v1556_v1  ;;  %v904_v61 = vsel %vm902_vm7, %v2794_v0, %v903_v19  ;;  %vm2617_vm1 = vcmp.lt.s32.totalorder %v2616_v41, 0 }
 0x187   : > { %vm3780_vm0 = vcmp.le.f32.partialorder %v4954_v50, 0.7853982  ;;  %v1572_v14 = vsel %vm1568_vm14, %v1556_v1, %v1571_v45  ;;  %v1575_v22 = vsel %vm1569_vm15, %v1562_v36, 920167782  ;;  %v908_v30 = vsel %vm901_vm11, %v904_v61, %v907_v39 }
 0x188   : > { %v1397_v42 = vsel %vm2617_vm1, 0, %v2616_v41  ;;  %vm1567_vm2 = vcmp.lt.s32.totalorder %v3738_v44, 2  ;;  %v1576_v28 = vsel %vm1568_vm14, %v1559_v7, %v1575_v22  ;;  %v909_v11 = vsel %vm898_vm13, nan, %v908_v30 }
 0x189   : > { %v1398_v26 = vsub.s32 32, %v1397_v42  ;;  %v1402_v13 = vsub.s32 4294967266, %v1397_v42  ;;  %v1573_v0 = vsel %vm1567_vm2, %v1570_v6, %v1572_v14  ;;  %v2476_v59 = vsel %vm3745_vm8, %v3450_v25, %v909_v11 }
 0x18a   : > { %v1577_v52 = vsel %vm1567_vm2, %v1574_v56, %v1576_v28  ;;  %v1578_v34 = vsel %vm1566_vm10, %v1556_v1, %v1559_v7  ;;  %v1579_v17 = vsel %vm1569_vm15, %v1565_v46, 1326507024  ;;  %2493 = vst.msk [vmem:[%s3814_s26] sm:$0xff] %vm2492_vm12, %v2476_v59  ;;  %v1399_v18 = vshll.u32 %v3736_v35, %v1397_v42 }
 0x18b   : > { %v1400_v19 = vshrl.u32 %v3731_v60, %v1398_v26  ;;  %v1403_v41 = vadd.s32 127, %v1402_v13  ;;  %v1580_v25 = vsel %vm1568_vm14, %v1562_v36, %v1579_v17  ;;  %v2598_v46 = vadd.s32 4294967169, %v914_v55 }
 0x18c   : > { %v1581_v39 = vsel %vm1567_vm2, %v1578_v34, %v1580_v25  ;;  %v3825_v1 = vmul.u32.u64.low %v3733_v49, %v1577_v52  ;;  %v3826_v7 = vmul.u32.u64.high %v3733_v49, %v1577_v52, %v3825_v1  ;;  %vm1213_vm3 = vcmp.lt.s32.totalorder %v3728_v53, 2 }
 0x18d   : > { %v1401_v50 = vor.u32 %v1400_v19, %v1399_v18  ;;  %v1404_v6 = vshll.u32 %v1403_v41, 23  ;;  %v3830_v45 = vmul.u32.u64.low %v3733_v49, %v1581_v39  ;;  %v3831_v35 = vmul.u32.u64.high %v3733_v49, %v1581_v39, %v3830_v45  ;;  %v2798_v60 = vpop.eup %2797 }
 0x18e   : > { %vm1214_vm4 = vcmp.eq.s32.totalorder %v3728_v53, 0  ;;  %vm1217_vm6 = vcmp.eq.s32.totalorder %v3728_v53, 2  ;;  %v920_v44 = vadd.s32 1, %v2598_v46  ;;  %v2800_v36 = vpop.eup %2799  ;;  %v1218_v56 = vxor.u32 2147483648, %v2798_v60 }
 0x18f   : > { %v1405_v61 = vor.u32 4788187, %v1404_v6  ;;  %v1415_v55 = vsel %vm3780_vm0, 0, %v3768_v31  ;;  %v910_v14 = vand.u32 2147483647, %v3719_v3  ;;  %v1215_v22 = vxor.u32 2147483648, %v2800_v36 }
 0x190   : > { %v1589_v30 = vmul.u32 %v3733_v49, %v1573_v0  ;;  %v1592_v42 = vadd.s32 1, %v3826_v7  ;;  %vm921_vm7 = vcmp.gt.s32.totalorder %v920_v44, 0  ;;  %v1219_v28 = vsel %vm1217_vm6, %v1218_v56, %v2800_v36 }
 0x191   : > { %v1406_v11 = vand.u32 2147483647, %v1405_v61  ;;  %v1408_v26 = vcvt.s32.f32 %v1401_v50  ;;  %vm1591_vm11 = vc.u32 %v3831_v35, %v3825_v1  ;;  %v1216_v13 = vsel %vm1214_vm4, %v2798_v60, %v1215_v22 }
 0x192   : > { %v1419_v59 = vadd.s32 3, %v1415_v55  ;;  %v1593_v31 = vsel %vm1591_vm11, %v1592_v42, %v3826_v7  ;;  %v922_v52 = vsel %vm921_vm7, %v920_v44, 0  ;;  %vm1210_vm13 = vweird.f32 %v3490_v24 }
 0x193   : > { %v1220_v49 = vsel %vm1213_vm3, %v1216_v13, %v1219_v28  ;;  %v1409_v0 = vmul.f32 %v1408_v26, %v1406_v11  ;;  %v1594_v34 = vadd.s32 %v1593_v31, %v1589_v30  ;;  %v924_v18 = vand.u32 31, %v922_v52 }
 0x194   : > { %v1221_v17 = vsel %vm1210_vm13, nan, %v1220_v49  ;;  %v777_v39 = vmul.f32 %v3435_v62, %v3726_v63  ;;  %v3857_v7 = vand.u32 3, %v1419_v59  ;;  %v917_v24 = vand.u32 8388607, %v910_v14 }
 0x195   : > { %v2479_v19 = vsel %vm3745_vm8, %v3470_v20, %v1221_v17  ;;  %v1410_v41 = vxor.u32 2147483648, %v1409_v0  ;;  %v1595_v25 = vadd.s32 536870912, %v1594_v34  ;;  %v923_v53 = vshrl.u32 %v922_v52, 5 }
 0x196   : > { %2496 = vst.msk [vmem:[%s3814_s26 + $0x18] sm:$0xff] %vm2492_vm12, %v2479_v19  ;;  %v925_v46 = vsub.s32 32, %v924_v18  ;;  %v927_v20 = vshll.u32 %v2929_v8, %v924_v18  ;;  %v930_v45 = vshll.u32 %v4948_v10, %v924_v18  ;;  %v933_v56 = vshll.u32 %v4949_v48, %v924_v18 }
 0x197   : > { %v1411_v50 = vsel %vm1328_vm5, %v1410_v41, %v1409_v0  ;;  %v1596_v6 = vshrl.u32 %v1595_v25, 30  ;;  %v936_v22 = vshll.u32 %v4952_v38, %v924_v18  ;;  %v939_v26 = vshll.u32 %v2933_v51, %v924_v18 }
 0x198   : > { %v1414_v60 = vsel %vm3780_vm0, %v3501_v29, %v1411_v50  ;;  %v928_v44 = vshrl.u32 %v4948_v10, %v925_v46  ;;  %v931_v36 = vshrl.u32 %v4949_v48, %v925_v46  ;;  %v934_v55 = vshrl.u32 %v4952_v38, %v925_v46 }
 0x199   : > { %2801 = vcosq.f32 %v1414_v60  ;;  %v1597_v61 = vshll.u32 %v1596_v6, 30  ;;  %v937_v28 = vshrl.u32 %v2933_v51, %v925_v46  ;;  %v940_v13 = vshrl.u32 %v4953_v54, %v925_v46 }
 0x19a   : > { %2803 = vsinq.f32 %v1414_v60  ;;  %v929_v30 = vor.u32 %v928_v44, %v927_v20  ;;  %v932_v42 = vor.u32 %v931_v36, %v930_v45  ;;  %v935_v2 = vor.u32 %v934_v55, %v933_v56 }
 0x19b   : > { %v3874_v11 = vsub.s32 %v1594_v34, %v1597_v61  ;;  %v918_v59 = vor.u32 8388608, %v917_v24  ;;  %v938_v31 = vor.u32 %v937_v28, %v936_v22  ;;  %vm942_vm5 = vcmp.lt.s32.totalorder %v923_v53, 1  ;;  %v686_v28 = vpop.permute.xlu1 %685 }
 0x19c   : > { %v3879_v52 = vadd.f32 %v3446_v5, %v777_v39  ;;  %v4957_v49 = vand.u32 2147483647, %v3609_v27  ;;  %v926_v17 = vshrl.u32 %v2929_v8, %v925_v46  ;;  %v941_v19 = vor.u32 %v940_v13, %v939_v26 }
 0x19d   : > { %v1600_v34 = vsub.s32 0, %v3874_v11  ;;  %vm945_vm14 = vcmp.lt.s32.totalorder %v923_v53, 4  ;;  %vm944_vm15 = vcmp.lt.s32.totalorder %v923_v53, 3  ;;  %v950_v41 = vsel %vm942_vm5, %v929_v30, %v932_v42 }
 0x19e   : > { %vm3883_vm10 = vcmp.le.f32.partialorder %v4957_v49, 0.7853982  ;;  %v947_v18 = vsel %vm945_vm14, %v935_v2, 2102212464  ;;  %v951_v25 = vsel %vm945_vm14, %v938_v31, 920167782  ;;  %v954_v45 = vsel %vm942_vm5, %v932_v42, %v935_v2 }
 0x19f   : > { %v2623_v39 = vmin.u32 %v1600_v34, %v3874_v11  ;;  %v1620_v24 = vsub.s32 4, %v1596_v6  ;;  %vm943_vm0 = vcmp.lt.s32.totalorder %v923_v53, 2  ;;  %v952_v50 = vsel %vm944_vm15, %v935_v2, %v951_v25 }
 0x1a0   : > { %v953_v20 = vsel %vm943_vm0, %v950_v41, %v952_v50  ;;  %v955_v60 = vsel %vm945_vm14, %v941_v19, 1326507024  ;;  %v958_v44 = vshll.u32 %v918_v59, 8  ;;  %vm1536_vm1 = vcmp.lt.s32.totalorder %v3609_v27, 0 }
 0x1a1   : > { %v1602_v46 = vclz %v2623_v39  ;;  %v946_v36 = vsel %vm942_vm5, %v926_v17, %v929_v30  ;;  %v948_v56 = vsel %vm944_vm15, %v932_v42, %v947_v18  ;;  %vm1421_vm2 = vcmp.lt.s32.totalorder %v3857_v7, 2 }
 0x1a2   : > { %vm1422_vm3 = vcmp.eq.s32.totalorder %v3857_v7, 0  ;;  %v956_v61 = vsel %vm944_vm15, %v938_v31, %v955_v60  ;;  %v3900_v55 = vmul.u32.u64.low %v958_v44, %v953_v20  ;;  %v3901_v22 = vmul.u32.u64.high %v958_v44, %v953_v20, %v3900_v55 }
 0x1a3   : > { %v2624_v2 = vadd.s32 4294967294, %v1602_v46  ;;  %v1621_v26 = vsel %vm1536_vm1, %v1620_v24, %v1596_v6  ;;  %v957_v13 = vsel %vm943_vm0, %v954_v45, %v956_v61  ;;  %v1745_v30 = vand.u32 2139095040, %v3879_v52 }
 0x1a4   : > { %vm1425_vm4 = vcmp.eq.s32.totalorder %v3857_v7, 2  ;;  %v949_v42 = vsel %vm943_vm0, %v946_v36, %v948_v56  ;;  %v3909_v59 = vmul.u32.u64.low %v958_v44, %v957_v13  ;;  %v3910_v49 = vmul.u32.u64.high %v958_v44, %v957_v13, %v3909_v59 }
 0x1a5   : > { %v1590_v31 = vadd.s32 %v3825_v1, %v3831_v35  ;;  %vm2625_vm6 = vcmp.lt.s32.totalorder %v2624_v2, 0  ;;  %v1746_v34 = vshrl.u32 %v1745_v30, 23  ;;  %v3917_v6 = vsel %vm3424_vm9, %v686_v28, %v3399_v16 }
 0x1a6   : > { %v2802_v17 = vpop.eup %2801  ;;  %v1605_v19 = vsel %vm2625_vm6, 0, %v2624_v2  ;;  %v1623_v18 = vsel %vm3883_vm10, 0, %v1621_v26  ;;  %v968_v53 = vadd.s32 1, %v3901_v22  ;;  %v1742_v41 = vand.u32 2147483647, %v3879_v52 }
 0x1a7   : > { %v2804_v25 = vpop.eup %2803  ;;  %v1426_v39 = vxor.u32 2147483648, %v2802_v17  ;;  %v1606_v24 = vsub.s32 32, %v1605_v19  ;;  %v1610_v1 = vsub.s32 4294967266, %v1605_v19  ;;  %v965_v35 = vmul.u32 %v958_v44, %v949_v42 }
 0x1a8   : > { %v1423_v50 = vxor.u32 2147483648, %v2804_v25  ;;  %v1607_v20 = vshll.u32 %v3874_v11, %v1605_v19  ;;  %vm967_vm7 = vc.u32 %v3910_v49, %v3900_v55  ;;  %v2630_v16 = vadd.s32 4294967169, %v1746_v34 }
 0x1a9   : > { %v1427_v45 = vsel %vm1425_vm4, %v1426_v39, %v2804_v25  ;;  %v1608_v60 = vshrl.u32 %v1590_v31, %v1606_v24  ;;  %v1611_v46 = vadd.s32 127, %v1610_v1  ;;  %v969_v36 = vsel %vm967_vm7, %v968_v53, %v3901_v22 }
 0x1aa   : > { %v1424_v56 = vsel %vm1422_vm3, %v2802_v17, %v1423_v50  ;;  %v970_v61 = vadd.s32 %v969_v36, %v965_v35  ;;  %v1752_v28 = vadd.s32 1, %v2630_v16  ;;  %v770_v44 = vmul.f32 %v3435_v62, %v3917_v6 }
 0x1ab   : > { %vm1418_vm11 = vweird.f32 %v3501_v29  ;;  %v1428_v11 = vsel %vm1421_vm2, %v1424_v56, %v1427_v45  ;;  %v1609_v2 = vor.u32 %v1608_v60, %v1607_v20  ;;  %v1612_v26 = vshll.u32 %v1611_v46, 23 }
 0x1ac   : > { %v1429_v13 = vsel %vm1418_vm11, nan, %v1428_v11  ;;  %v1627_v30 = vadd.s32 3, %v1623_v18  ;;  %v971_v42 = vadd.s32 536870912, %v970_v61  ;;  %vm1753_vm13 = vcmp.gt.s32.totalorder %v1752_v28, 0 }
 0x1ad   : > { %v2481_v22 = vsel %vm3745_vm8, %v3494_v15, %v1429_v13  ;;  %v1613_v59 = vor.u32 4788187, %v1612_v26  ;;  %v1749_v31 = vand.u32 8388607, %v1742_v41  ;;  %v1754_v62 = vsel %vm1753_vm13, %v1752_v28, 0 }
 0x1ae   : > { %2498 = vst.msk [vmem:[%s3814_s26 + $0x28] sm:$0xff] %vm2492_vm12, %v2481_v22  ;;  %v3942_v29 = vshrl.u32 %v971_v42, 30  ;;  %v1756_v7 = vand.u32 31, %v1754_v62  ;;  %v3945_v34 = vadd.f32 %v3446_v5, %v770_v44  ;;  %v1616_v19 = vcvt.s32.f32 %v1609_v2 }
 0x1af   : > { %v1614_v17 = vand.u32 2147483647, %v1613_v59  ;;  %v3948_v15 = vand.u32 3, %v1627_v30  ;;  %v1750_v39 = vor.u32 8388608, %v1749_v31  ;;  %v966_v24 = vadd.s32 %v3900_v55, %v3910_v49 }
 0x1b0   : > { %v973_v18 = vshll.u32 %v3942_v29, 30  ;;  %v1757_v53 = vsub.s32 32, %v1756_v7  ;;  %v1017_v50 = vand.u32 2139095040, %v3945_v34  ;;  %v1759_v5 = vshll.u32 %v2929_v8, %v1756_v7 }
 0x1b1   : > { %v1617_v25 = vmul.f32 %v1616_v19, %v1614_v17  ;;  %v1762_v46 = vshll.u32 %v4948_v10, %v1756_v7  ;;  %v1765_v36 = vshll.u32 %v4949_v48, %v1756_v7  ;;  %v1755_v56 = vshrl.u32 %v1754_v62, 5 }
 0x1b2   : > { %v3951_v1 = vsub.s32 %v970_v61, %v973_v18  ;;  %v1760_v35 = vshrl.u32 %v4948_v10, %v1757_v53  ;;  %v1763_v16 = vshrl.u32 %v4949_v48, %v1757_v53  ;;  %v1766_v45 = vshrl.u32 %v4952_v38, %v1757_v53 }
 0x1b3   : > { %v1618_v20 = vxor.u32 2147483648, %v1617_v25  ;;  %v1769_v55 = vshrl.u32 %v2933_v51, %v1757_v53  ;;  %v1768_v28 = vshll.u32 %v4952_v38, %v1756_v7  ;;  %v1771_v30 = vshll.u32 %v2933_v51, %v1756_v7  ;;  %v4060_v7 = vld [vmem:[%s4918_s2] ss:$0 sm:$0xff] }
 0x1b4   : > { %v976_v60 = vsub.s32 0, %v3951_v1  ;;  %v1761_v61 = vor.u32 %v1760_v35, %v1759_v5  ;;  %v1764_v2 = vor.u32 %v1763_v16, %v1762_v46  ;;  %v1767_v26 = vor.u32 %v1766_v45, %v1765_v36 }
 0x1b5   : > { %v1619_v49 = vsel %vm1536_vm1, %v1618_v20, %v1617_v25  ;;  %v1770_v13 = vor.u32 %v1769_v55, %v1768_v28  ;;  %v1772_v42 = vshrl.u32 %v4953_v54, %v1757_v53  ;;  %vm912_vm5 = vcmp.lt.s32.totalorder %v3719_v3, 0 }
 0x1b6   : > { %v1622_v44 = vsel %vm3883_vm10, %v3609_v27, %v1619_v49  ;;  %v2599_v11 = vmin.u32 %v976_v60, %v3951_v1  ;;  %v1790_v59 = vshll.u32 %v1750_v39, 8  ;;  %v1018_v31 = vshrl.u32 %v1017_v50, 23 }
 0x1b7   : > { %2805 = vcosq.f32 %v1622_v44  ;;  %v996_v62 = vsub.s32 4, %v3942_v29  ;;  %v1758_v0 = vshrl.u32 %v2929_v8, %v1757_v53  ;;  %v1773_v17 = vor.u32 %v1772_v42, %v1771_v30 }
 0x1b8   : > { %2807 = vsinq.f32 %v1622_v44  ;;  %v978_v22 = vclz %v2599_v11  ;;  %vm1774_vm10 = vcmp.lt.s32.totalorder %v1755_v56, 1  ;;  %vm1776_vm14 = vcmp.lt.s32.totalorder %v1755_v56, 3 }
 0x1b9   : > { %vm1777_vm15 = vcmp.lt.s32.totalorder %v1755_v56, 4  ;;  %v1782_v18 = vsel %vm1774_vm10, %v1761_v61, %v1764_v2  ;;  %vm3976_vm0 = vcmp.le.f32.partialorder %v910_v14, 0.7853982  ;;  %v1786_v39 = vsel %vm1774_vm10, %v1764_v2, %v1767_v26 }
 0x1ba   : > { %v2600_v19 = vadd.s32 4294967294, %v978_v22  ;;  %v1779_v25 = vsel %vm1777_vm15, %v1767_v26, 2102212464  ;;  %v1783_v35 = vsel %vm1777_vm15, %v1770_v13, 920167782  ;;  %vm1775_vm2 = vcmp.lt.s32.totalorder %v1755_v56, 2 }
 0x1bb   : > { %v1787_v50 = vsel %vm1777_vm15, %v1773_v17, 1326507024  ;;  %v1784_v53 = vsel %vm1776_vm14, %v1767_v26, %v1783_v35  ;;  %v1778_v16 = vsel %vm1774_vm10, %v1758_v0, %v1761_v61  ;;  %v1780_v36 = vsel %vm1776_vm14, %v1764_v2, %v1779_v25  ;;  %v722_v26 = vpop.permute.xlu0 %721 }
 0x1bc   : > { %vm2601_vm1 = vcmp.lt.s32.totalorder %v2600_v19, 0  ;;  %v1788_v20 = vsel %vm1776_vm14, %v1770_v13, %v1787_v50  ;;  %v1785_v45 = vsel %vm1775_vm2, %v1782_v18, %v1784_v53  ;;  %v2602_v55 = vadd.s32 4294967169, %v1018_v31 }
 0x1bd   : > { %v981_v5 = vsel %vm2601_vm1, 0, %v2600_v19  ;;  %v1789_v60 = vsel %vm1775_vm2, %v1786_v39, %v1788_v20  ;;  %v3988_v44 = vmul.u32.u64.low %v1790_v59, %v1785_v45  ;;  %v3989_v11 = vmul.u32.u64.high %v1790_v59, %v1785_v45, %v3988_v44 }
 0x1be   : > { %v982_v14 = vsub.s32 32, %v981_v5  ;;  %v986_v46 = vsub.s32 4294967266, %v981_v5  ;;  %v3985_v49 = vmul.u32.u64.low %v1790_v59, %v1789_v60  ;;  %v3986_v28 = vmul.u32.u64.high %v1790_v59, %v1789_v60, %v3985_v49 }
 0x1bf   : > { %v983_v13 = vshll.u32 %v3951_v1, %v981_v5  ;;  %v1024_v42 = vadd.s32 1, %v2602_v55  ;;  %vm1626_vm3 = vweird.f32 %v3609_v27  ;;  %vm1629_vm4 = vcmp.lt.s32.totalorder %v3948_v15, 2 }
 0x1c0   : > { %v984_v61 = vshrl.u32 %v966_v24, %v982_v14  ;;  %v987_v30 = vadd.s32 127, %v986_v46  ;;  %vm1630_vm6 = vcmp.eq.s32.totalorder %v3948_v15, 0  ;;  %v997_v2 = vsel %vm912_vm5, %v996_v62, %v3942_v29 }
 0x1c1   : > { %v1781_v22 = vsel %vm1775_vm2, %v1778_v16, %v1780_v36  ;;  %vm1025_vm7 = vcmp.gt.s32.totalorder %v1024_v42, 0  ;;  %v4003_v24 = vsel %vm3424_vm9, %v722_v26, %v3466_v4  ;;  %vm1799_vm11 = vc.u32 %v3986_v28, %v3988_v44 }
 0x1c2   : > { %v985_v31 = vor.u32 %v984_v61, %v983_v13  ;;  %v988_v0 = vshll.u32 %v987_v30, 23  ;;  %v1800_v1 = vadd.s32 1, %v3989_v11  ;;  %v1014_v17 = vand.u32 2147483647, %v3945_v34 }
 0x1c3   : > { %v1026_v19 = vsel %vm1025_vm7, %v1024_v42, 0  ;;  %v999_v56 = vsel %vm3976_vm0, 0, %v997_v2  ;;  %v1797_v62 = vmul.u32 %v1790_v59, %v1781_v22  ;;  %vm1633_vm13 = vcmp.eq.s32.totalorder %v3948_v15, 2  ;;  %v4018_v59 = vld [vmem:[%s4917_s1] ss:$0 sm:$0xff] }
 0x1c4   : > { %v2806_v18 = vpop.eup %2805  ;;  %v989_v29 = vor.u32 4788187, %v988_v0  ;;  %v1028_v25 = vand.u32 31, %v1026_v19  ;;  %v992_v39 = vcvt.s32.f32 %v985_v31  ;;  %v1801_v50 = vsel %vm1799_vm11, %v1800_v1, %v3989_v11 }
 0x1c5   : > { %v2808_v35 = vpop.eup %2807  ;;  %v1634_v4 = vxor.u32 2147483648, %v2806_v18  ;;  %v1802_v5 = vadd.s32 %v1801_v50, %v1797_v62  ;;  %v1003_v60 = vadd.s32 3, %v999_v56  ;;  %v1021_v14 = vand.u32 8388607, %v1014_v17 }
 0x1c6   : > { %v1631_v53 = vxor.u32 2147483648, %v2808_v35  ;;  %v990_v20 = vand.u32 2147483647, %v989_v29  ;;  %v1029_v16 = vsub.s32 32, %v1028_v25  ;;  %v779_v46 = vmul.f32 %v4018_v59, %v4003_v24 }
 0x1c7   : > { %v1635_v45 = vsel %vm1633_vm13, %v1634_v4, %v2808_v35  ;;  %v1803_v49 = vadd.s32 536870912, %v1802_v5  ;;  %v4024_v11 = vshrl.u32 %v1026_v19, 5  ;;  %v1031_v13 = vshll.u32 %v2929_v8, %v1028_v25 }
 0x1c8   : > { %v1632_v36 = vsel %vm1630_vm6, %v2806_v18, %v1631_v53  ;;  %v993_v55 = vmul.f32 %v992_v39, %v990_v20  ;;  %v1032_v61 = vshrl.u32 %v4948_v10, %v1029_v16  ;;  %v1035_v30 = vshrl.u32 %v4949_v48, %v1029_v16 }
 0x1c9   : > { %v1636_v26 = vsel %vm1629_vm4, %v1632_v36, %v1635_v45  ;;  %v1804_v22 = vshrl.u32 %v1803_v49, 30  ;;  %v1038_v31 = vshrl.u32 %v4952_v38, %v1029_v16  ;;  %v1034_v15 = vshll.u32 %v4948_v10, %v1028_v25 }
 0x1ca   : > { %v1637_v42 = vsel %vm1626_vm3, nan, %v1636_v26  ;;  %v994_v2 = vxor.u32 2147483648, %v993_v55  ;;  %v1037_v1 = vshll.u32 %v4949_v48, %v1028_v25  ;;  %v1040_v19 = vshll.u32 %v4952_v38, %v1028_v25 }
 0x1cb   : > { %v2483_v0 = vsel %vm3745_vm8, %v3587_v23, %v1637_v42  ;;  %v1805_v18 = vshll.u32 %v1804_v22, 30  ;;  %v1033_v29 = vor.u32 %v1032_v61, %v1031_v13  ;;  %v1041_v56 = vshrl.u32 %v2933_v51, %v1029_v16 }
 0x1cc   : > { %2500 = vst.msk [vmem:[%s3814_s26 + $0x38] sm:$0xff] %vm2492_vm12, %v2483_v0  ;;  %v995_v27 = vsel %vm912_vm5, %v994_v2, %v993_v55  ;;  %v1036_v23 = vor.u32 %v1035_v30, %v1034_v15  ;;  %v1043_v35 = vshll.u32 %v2933_v51, %v1028_v25  ;;  %v1044_v4 = vshrl.u32 %v4953_v54, %v1029_v16 }
 0x1cd   : > { %v998_v62 = vsel %vm3976_vm0, %v3719_v3, %v995_v27  ;;  %v4050_v39 = vsub.s32 %v1802_v5, %v1805_v18  ;;  %v1039_v50 = vor.u32 %v1038_v31, %v1037_v1  ;;  %v1042_v53 = vor.u32 %v1041_v56, %v1040_v19 }
 0x1ce   : > { %2809 = vcosq.f32 %v998_v62  ;;  %v4052_v20 = vand.u32 3, %v1003_v60  ;;  %v1022_v45 = vor.u32 8388608, %v1021_v14  ;;  %v1045_v36 = vor.u32 %v1044_v4, %v1043_v35 }
 0x1cf   : > { %2811 = vsinq.f32 %v998_v62  ;;  %v1808_v55 = vsub.s32 0, %v4050_v39  ;;  %vm1046_vm5 = vcmp.lt.s32.totalorder %v4024_v11, 1  ;;  %vm1049_vm10 = vcmp.lt.s32.totalorder %v4024_v11, 4  ;;  %v694_v62 = vpop.permute.xlu1 %693 }
 0x1d0   : > { %v4063_v25 = vadd.f32 %v4060_v7, %v779_v46  ;;  %v1030_v5 = vshrl.u32 %v2929_v8, %v1029_v16  ;;  %vm1048_vm14 = vcmp.lt.s32.totalorder %v4024_v11, 3  ;;  %v1054_v60 = vsel %vm1046_vm5, %v1033_v29, %v1036_v23 }
 0x1d1   : > { %v1055_v14 = vsel %vm1049_vm10, %v1042_v53, 920167782  ;;  %v2631_v49 = vmin.u32 %v1808_v55, %v4050_v39  ;;  %vm1047_vm15 = vcmp.lt.s32.totalorder %v4024_v11, 2  ;;  %v1051_v26 = vsel %vm1049_vm10, %v1039_v50, 2102212464 }
 0x1d2   : > { %v1056_v13 = vsel %vm1048_vm14, %v1039_v50, %v1055_v14  ;;  %v1058_v16 = vsel %vm1046_vm5, %v1036_v23, %v1039_v50  ;;  %v1059_v61 = vsel %vm1049_vm10, %v1045_v36, 1326507024  ;;  %v1062_v30 = vshll.u32 %v1022_v45, 8 }
 0x1d3   : > { %v1057_v46 = vsel %vm1047_vm15, %v1054_v60, %v1056_v13  ;;  %vm4079_vm0 = vcmp.le.f32.partialorder %v1742_v41, 0.7853982  ;;  %v1810_v2 = vclz %v2631_v49  ;;  %v1828_v31 = vsub.s32 4, %v1804_v22 }
 0x1d4   : > { %v1050_v0 = vsel %vm1046_vm5, %v1030_v5, %v1033_v29  ;;  %v1052_v15 = vsel %vm1048_vm14, %v1036_v23, %v1051_v26  ;;  %v1060_v1 = vsel %vm1048_vm14, %v1042_v53, %v1059_v61  ;;  %vm1744_vm1 = vcmp.lt.s32.totalorder %v3879_v52, 0 }
 0x1d5   : > { %v4089_v19 = vmul.u32.u64.low %v1062_v30, %v1057_v46  ;;  %v4090_v27 = vmul.u32.u64.high %v1062_v30, %v1057_v46, %v4089_v19  ;;  %v2632_v41 = vadd.s32 4294967294, %v1810_v2  ;;  %v1061_v18 = vsel %vm1047_vm15, %v1058_v16, %v1060_v1 }
 0x1d6   : > { %v1953_v56 = vand.u32 2139095040, %v4063_v25  ;;  %vm1005_vm2 = vcmp.lt.s32.totalorder %v4052_v20, 2  ;;  %vm1009_vm3 = vcmp.eq.s32.totalorder %v4052_v20, 2  ;;  %vm1002_vm4 = vweird.f32 %v3719_v3 }
 0x1d7   : > { %v4098_v29 = vmul.u32.u64.low %v1062_v30, %v1061_v18  ;;  %v4099_v23 = vmul.u32.u64.high %v1062_v30, %v1061_v18, %v4098_v29  ;;  %vm2633_vm6 = vcmp.lt.s32.totalorder %v2632_v41, 0  ;;  %v1829_v35 = vsel %vm1744_vm1, %v1828_v31, %v1804_v22 }
 0x1d8   : > { %v1053_v4 = vsel %vm1047_vm15, %v1050_v0, %v1052_v15  ;;  %v1954_v50 = vshrl.u32 %v1953_v56, 23  ;;  %v1813_v53 = vsel %vm2633_vm6, 0, %v2632_v41  ;;  %v1072_v45 = vadd.s32 1, %v4090_v27 }
 0x1d9   : > { %v1950_v36 = vand.u32 2147483647, %v4063_v25  ;;  %v4111_v55 = vsel %vm3424_vm9, %v694_v62, %v3391_v33  ;;  %v1798_v5 = vadd.s32 %v3988_v44, %v3986_v28  ;;  %v1814_v60 = vsub.s32 32, %v1813_v53 }
 0x1da   : > { %v1818_v14 = vsub.s32 4294967266, %v1813_v53  ;;  %v2638_v22 = vadd.s32 4294967169, %v1954_v50  ;;  %v1815_v11 = vshll.u32 %v4050_v39, %v1813_v53  ;;  %v1831_v26 = vsel %vm4079_vm0, 0, %v1829_v35 }
 0x1db   : > { %v2810_v49 = vpop.eup %2809  ;;  %v1069_v13 = vmul.u32 %v1062_v30, %v1053_v4  ;;  %vm1071_vm7 = vc.u32 %v4099_v23, %v4089_v19  ;;  %v1816_v61 = vshrl.u32 %v1798_v5, %v1814_v60  ;;  %v1957_v44 = vand.u32 8388607, %v1950_v36 }
 0x1dc   : > { %v2812_v46 = vpop.eup %2811  ;;  %v1010_v16 = vxor.u32 2147483648, %v2810_v49  ;;  %v1819_v33 = vadd.s32 127, %v1818_v14  ;;  %v1073_v2 = vsel %vm1071_vm7, %v1072_v45, %v4090_v27  ;;  %v1960_v0 = vadd.s32 1, %v2638_v22 }
 0x1dd   : > { %v1007_v31 = vxor.u32 2147483648, %v2812_v46  ;;  %v1074_v28 = vadd.s32 %v1073_v2, %v1069_v13  ;;  %vm1006_vm11 = vcmp.eq.s32.totalorder %v4052_v20, 0  ;;  %v1817_v30 = vor.u32 %v1816_v61, %v1815_v11 }
 0x1de   : > { %v1011_v39 = vsel %vm1009_vm3, %v1010_v16, %v2812_v46  ;;  %v1820_v15 = vshll.u32 %v1819_v33, 23  ;;  %v1835_v41 = vadd.s32 3, %v1831_v26  ;;  %vm1961_vm13 = vcmp.gt.s32.totalorder %v1960_v0, 0 }
 0x1df   : > { %v1008_v1 = vsel %vm1006_vm11, %v2810_v49, %v1007_v31  ;;  %v1075_v18 = vadd.s32 536870912, %v1074_v28  ;;  %v1962_v62 = vsel %vm1961_vm13, %v1960_v0, 0  ;;  %v772_v29 = vmul.f32 %v4018_v59, %v4111_v55 }
 0x1e0   : > { %v1012_v27 = vsel %vm1005_vm2, %v1008_v1, %v1011_v39  ;;  %v1821_v56 = vor.u32 4788187, %v1820_v15  ;;  %v1958_v50 = vor.u32 8388608, %v1957_v44  ;;  %v1964_v53 = vand.u32 31, %v1962_v62 }
 0x1e1   : > { %v1013_v35 = vsel %vm1002_vm4, nan, %v1012_v27  ;;  %v4131_v4 = vshrl.u32 %v1075_v18, 30  ;;  %v1824_v60 = vcvt.s32.f32 %v1817_v30  ;;  %v4139_v49 = vand.u32 3, %v1835_v41 }
 0x1e2   : > { %v2477_v45 = vsel %vm3745_vm8, %v3617_v9, %v1013_v35  ;;  %v1822_v5 = vand.u32 2147483647, %v1821_v56  ;;  %v1965_v14 = vsub.s32 32, %v1964_v53  ;;  %v1070_v3 = vadd.s32 %v4089_v19, %v4099_v23 }
 0x1e3   : > { %2494 = vst.msk [vmem:[%s3814_s26 + $0x8] sm:$0xff] %vm2492_vm12, %v2477_v45  ;;  %v1077_v20 = vshll.u32 %v4131_v4, 30  ;;  %v4145_v13 = vshll.u32 %v1958_v50, 8  ;;  %v4148_v9 = vadd.f32 %v4060_v7, %v772_v29  ;;  %v1967_v16 = vshll.u32 %v2929_v8, %v1964_v53 }
 0x1e4   : > { %v1825_v22 = vmul.f32 %v1824_v60, %v1822_v5  ;;  %v1968_v26 = vshrl.u32 %v4948_v10, %v1965_v14  ;;  %v1971_v61 = vshrl.u32 %v4949_v48, %v1965_v14  ;;  %v1974_v33 = vshrl.u32 %v4952_v38, %v1965_v14 }
 0x1e5   : > { %v4142_v11 = vsub.s32 %v1074_v28, %v1077_v20  ;;  %v1970_v19 = vshll.u32 %v4948_v10, %v1964_v53  ;;  %v1973_v23 = vshll.u32 %v4949_v48, %v1964_v53  ;;  %v1977_v31 = vshrl.u32 %v2933_v51, %v1965_v14 }
 0x1e6   : > { %v1826_v46 = vxor.u32 2147483648, %v1825_v22  ;;  %v1963_v44 = vshrl.u32 %v1962_v62, 5  ;;  %v1969_v0 = vor.u32 %v1968_v26, %v1967_v16  ;;  %v1976_v39 = vshll.u32 %v4952_v38, %v1964_v53 }
 0x1e7   : > { %v1080_v2 = vsub.s32 0, %v4142_v11  ;;  %v1972_v1 = vor.u32 %v1971_v61, %v1970_v19  ;;  %v1975_v41 = vor.u32 %v1974_v33, %v1973_v23  ;;  %v1979_v27 = vshll.u32 %v2933_v51, %v1964_v53 }
 0x1e8   : > { %v1827_v28 = vsel %vm1744_vm1, %v1826_v46, %v1825_v22  ;;  %v1978_v18 = vor.u32 %v1977_v31, %v1976_v39  ;;  %v1980_v56 = vshrl.u32 %v4953_v54, %v1965_v14  ;;  %v1222_v62 = vand.u32 2147483647, %v4148_v9  ;;  %v730_v39 = vpop.permute.xlu0 %729 }
 0x1e9   : > { %v1830_v30 = vsel %vm4079_vm0, %v3879_v52, %v1827_v28  ;;  %v2603_v15 = vmin.u32 %v1080_v2, %v4142_v11  ;;  %v1225_v35 = vand.u32 2139095040, %v4148_v9  ;;  %v1100_v50 = vsub.s32 4, %v4131_v4 }
 0x1ea   : > { %2813 = vcosq.f32 %v1830_v30  ;;  %v1966_v42 = vshrl.u32 %v2929_v8, %v1965_v14  ;;  %v1981_v45 = vor.u32 %v1980_v56, %v1979_v27  ;;  %vm1982_vm5 = vcmp.lt.s32.totalorder %v1963_v44, 1 }
 0x1eb   : > { %2815 = vsinq.f32 %v1830_v30  ;;  %v1082_v29 = vclz %v2603_v15  ;;  %vm1984_vm10 = vcmp.lt.s32.totalorder %v1963_v44, 3  ;;  %vm1985_vm14 = vcmp.lt.s32.totalorder %v1963_v44, 4 }
 0x1ec   : > { %v1990_v60 = vsel %vm1982_vm5, %v1969_v0, %v1972_v1  ;;  %v1987_v20 = vsel %vm1985_vm14, %v1975_v41, 2102212464  ;;  %v1991_v53 = vsel %vm1985_vm14, %v1978_v18, 920167782  ;;  %v1994_v22 = vsel %vm1982_vm5, %v1972_v1, %v1975_v41 }
 0x1ed   : > { %v2604_v5 = vadd.s32 4294967294, %v1082_v29  ;;  %v1995_v26 = vsel %vm1985_vm14, %v1981_v45, 1326507024  ;;  %vm1983_vm0 = vcmp.lt.s32.totalorder %v1963_v44, 2  ;;  %v1992_v46 = vsel %vm1984_vm10, %v1975_v41, %v1991_v53 }
 0x1ee   : > { %v1996_v16 = vsel %vm1984_vm10, %v1978_v18, %v1995_v26  ;;  %v1986_v33 = vsel %vm1982_vm5, %v1966_v42, %v1969_v0  ;;  %v1993_v14 = vsel %vm1983_vm0, %v1990_v60, %v1992_v46  ;;  %v1988_v31 = vsel %vm1984_vm10, %v1972_v1, %v1987_v20  ;;  %v702_v42 = vpop.permute.xlu1 %701 }
 0x1ef   : > { %vm2605_vm15 = vcmp.lt.s32.totalorder %v2604_v5, 0  ;;  %v1997_v2 = vsel %vm1983_vm0, %v1994_v22, %v1996_v16  ;;  %v1226_v28 = vshrl.u32 %v1225_v35, 23  ;;  %vm1834_vm1 = vweird.f32 %v3879_v52 }
 0x1f0   : > { %v1085_v61 = vsel %vm2605_vm15, 0, %v2604_v5  ;;  %v4176_v30 = vmul.u32.u64.low %v4145_v13, %v1997_v2  ;;  %v4177_v15 = vmul.u32.u64.high %v4145_v13, %v1997_v2, %v4176_v30  ;;  %vm4188_vm2 = vcmp.le.f32.partialorder %v1014_v17, 0.7853982 }
 0x1f1   : > { %v1086_v19 = vsub.s32 32, %v1085_v61  ;;  %v1090_v23 = vsub.s32 4294967266, %v1085_v61  ;;  %v4180_v41 = vmul.u32.u64.low %v4145_v13, %v1993_v14  ;;  %v4181_v27 = vmul.u32.u64.high %v4145_v13, %v1993_v14, %v4180_v41 }
 0x1f2   : > { %v1087_v0 = vshll.u32 %v4142_v11, %v1085_v61  ;;  %v2610_v29 = vadd.s32 4294967169, %v1226_v28  ;;  %vm1016_vm3 = vcmp.lt.s32.totalorder %v3945_v34, 0  ;;  %v1989_v35 = vsel %vm1983_vm0, %v1986_v33, %v1988_v31 }
 0x1f3   : > { %v1088_v18 = vshrl.u32 %v1070_v3, %v1086_v19  ;;  %v1091_v56 = vadd.s32 127, %v1090_v23  ;;  %v4197_v11 = vsel %vm3424_vm9, %v730_v39, %v3485_v21  ;;  %v1101_v5 = vsel %vm1016_vm3, %v1100_v50, %v4131_v4 }
 0x1f4   : > { %v1232_v60 = vadd.s32 1, %v2610_v29  ;;  %vm1841_vm4 = vcmp.eq.s32.totalorder %v4139_v49, 2  ;;  %vm2007_vm6 = vc.u32 %v4177_v15, %v4180_v41  ;;  %v2008_v17 = vadd.s32 1, %v4181_v27 }
 0x1f5   : > { %v1089_v3 = vor.u32 %v1088_v18, %v1087_v0  ;;  %v1092_v45 = vshll.u32 %v1091_v56, 23  ;;  %v4209_v44 = vsel %vm3424_vm9, %v702_v42, %v3395_v37  ;;  %v2005_v53 = vmul.u32 %v4145_v13, %v1989_v35 }
 0x1f6   : > { %v1229_v4 = vand.u32 8388607, %v1222_v62  ;;  %vm1233_vm7 = vcmp.gt.s32.totalorder %v1232_v60, 0  ;;  %v1103_v26 = vsel %vm4188_vm2, 0, %v1101_v5  ;;  %v2009_v46 = vsel %vm2007_vm6, %v2008_v17, %v4181_v27 }
 0x1f7   : > { %v2814_v21 = vpop.eup %2813  ;;  %v1093_v20 = vor.u32 4788187, %v1092_v45  ;;  %v1234_v16 = vsel %vm1233_vm7, %v1232_v60, 0  ;;  %v1096_v37 = vcvt.s32.f32 %v1089_v3  ;;  %v2010_v14 = vadd.s32 %v2009_v46, %v2005_v53 }
 0x1f8   : > { %v2816_v50 = vpop.eup %2815  ;;  %v1842_v22 = vxor.u32 2147483648, %v2814_v21  ;;  %vm1837_vm11 = vcmp.lt.s32.totalorder %v4139_v49, 2  ;;  %vm1838_vm13 = vcmp.eq.s32.totalorder %v4139_v49, 0  ;;  %v1236_v2 = vand.u32 31, %v1234_v16 }
 0x1f9   : > { %v1839_v61 = vxor.u32 2147483648, %v2816_v50  ;;  %v1094_v33 = vand.u32 2147483647, %v1093_v20  ;;  %v2011_v31 = vadd.s32 536870912, %v2010_v14  ;;  %v781_v28 = vmul.f32 %v4018_v59, %v4197_v11 }
 0x1fa   : > { %v1843_v13 = vsel %vm1841_vm4, %v1842_v22, %v2816_v50  ;;  %v1107_v30 = vadd.s32 3, %v1103_v26  ;;  %v1237_v27 = vsub.s32 32, %v1236_v2  ;;  %v4225_v0 = vmul.f32 %v4018_v59, %v4209_v44 }
 0x1fb   : > { %v1840_v19 = vsel %vm1838_vm13, %v2814_v21, %v1839_v61  ;;  %v1097_v23 = vmul.f32 %v1096_v37, %v1094_v33  ;;  %v4229_v56 = vshrl.u32 %v2011_v31, 30  ;;  %v1230_v29 = vor.u32 8388608, %v1229_v4 }
 0x1fc   : > { %v1844_v39 = vsel %vm1837_vm11, %v1840_v19, %v1843_v13  ;;  %v1239_v35 = vshll.u32 %v2929_v8, %v1236_v2  ;;  %v1240_v3 = vshrl.u32 %v4948_v10, %v1237_v27  ;;  %v1243_v45 = vshrl.u32 %v4949_v48, %v1237_v27 }
 0x1fd   : > { %v1845_v18 = vsel %vm1834_vm1, nan, %v1844_v39  ;;  %v1098_v49 = vxor.u32 2147483648, %v1097_v23  ;;  %v2013_v5 = vshll.u32 %v4229_v56, 30  ;;  %v1242_v60 = vshll.u32 %v4948_v10, %v1236_v2 }
 0x1fe   : > { %v2485_v42 = vsel %vm3745_vm8, %v3726_v63, %v1845_v18  ;;  %v1246_v17 = vshrl.u32 %v4952_v38, %v1237_v27  ;;  %v1235_v21 = vshrl.u32 %v1234_v16, 5  ;;  %v1245_v20 = vshll.u32 %v4949_v48, %v1236_v2 }
 0x1ff   : > { %2502 = vst.msk [vmem:[%s3814_s26 + $0x48] sm:$0xff] %vm2492_vm12, %v2485_v42  ;;  %v1099_v52 = vsel %vm1016_vm3, %v1098_v49, %v1097_v23  ;;  %v4249_v53 = vadd.f32 %v4060_v7, %v781_v28  ;;  %v4251_v4 = vsub.s32 %v2010_v14, %v2013_v5  ;;  %v1241_v50 = vor.u32 %v1240_v3, %v1239_v35 }
 0x200   : > { %v1102_v63 = vsel %vm4188_vm2, %v3945_v34, %v1099_v52  ;;  %v1244_v22 = vor.u32 %v1243_v45, %v1242_v60  ;;  %v1247_v26 = vor.u32 %v1246_v17, %v1245_v20  ;;  %v1248_v46 = vshll.u32 %v4952_v38, %v1236_v2 }
 0x201   : > { %2817 = vcosq.f32 %v1102_v63  ;;  %v1249_v61 = vshrl.u32 %v2933_v51, %v1237_v27  ;;  %v4255_v33 = vand.u32 3, %v1107_v30  ;;  %v2016_v1 = vsub.s32 0, %v4251_v4 }
 0x202   : > { %2819 = vsinq.f32 %v1102_v63  ;;  %v1251_v16 = vshll.u32 %v2933_v51, %v1236_v2  ;;  %v1252_v37 = vshrl.u32 %v4953_v54, %v1237_v27  ;;  %vm1254_vm5 = vcmp.lt.s32.totalorder %v1235_v21, 1 }
 0x203   : > { %v1250_v13 = vor.u32 %v1249_v61, %v1248_v46  ;;  %v1270_v14 = vshll.u32 %v1230_v29, 8  ;;  %v2161_v19 = vand.u32 2139095040, %v4249_v53  ;;  %vm1952_vm10 = vcmp.lt.s32.totalorder %v4063_v25, 0 }
 0x204   : > { %v2639_v23 = vmin.u32 %v2016_v1, %v4251_v4  ;;  %v1238_v31 = vshrl.u32 %v2929_v8, %v1237_v27  ;;  %v1253_v28 = vor.u32 %v1252_v37, %v1251_v16  ;;  %vm1257_vm14 = vcmp.lt.s32.totalorder %v1235_v21, 4 }
 0x205   : > { %v2036_v39 = vsub.s32 4, %v4229_v56  ;;  %v1259_v30 = vsel %vm1257_vm14, %v1247_v26, 2102212464  ;;  %v1262_v2 = vsel %vm1254_vm5, %v1241_v50, %v1244_v22  ;;  %v1263_v18 = vsel %vm1257_vm14, %v1250_v13, 920167782 }
 0x206   : > { %v2018_v49 = vclz %v2639_v23  ;;  %vm1255_vm15 = vcmp.lt.s32.totalorder %v1235_v21, 2  ;;  %vm1256_vm0 = vcmp.lt.s32.totalorder %v1235_v21, 3  ;;  %v1266_v29 = vsel %vm1254_vm5, %v1244_v22, %v1247_v26 }
 0x207   : > { %v1258_v42 = vsel %vm1254_vm5, %v1238_v31, %v1241_v50  ;;  %v1264_v35 = vsel %vm1256_vm0, %v1247_v26, %v1263_v18  ;;  %v1267_v3 = vsel %vm1257_vm14, %v1253_v28, 1326507024  ;;  %v2162_v45 = vshrl.u32 %v2161_v19, 23 }
 0x208   : > { %v2640_v52 = vadd.s32 4294967294, %v2018_v49  ;;  %v1260_v27 = vsel %vm1256_vm0, %v1244_v22, %v1259_v30  ;;  %v1265_v5 = vsel %vm1255_vm15, %v1262_v2, %v1264_v35  ;;  %v1268_v60 = vsel %vm1256_vm0, %v1250_v13, %v1267_v3 }
 0x209   : > { %vm4271_vm1 = vcmp.le.f32.partialorder %v1950_v36, 0.7853982  ;;  %v1269_v63 = vsel %vm1255_vm15, %v1266_v29, %v1268_v60  ;;  %v4276_v20 = vmul.u32.u64.low %v1270_v14, %v1265_v5  ;;  %v4277_v46 = vmul.u32.u64.high %v1270_v14, %v1265_v5, %v4276_v20 }
 0x20a   : > { %v2646_v50 = vadd.s32 4294967169, %v2162_v45  ;;  %vm1109_vm2 = vcmp.lt.s32.totalorder %v4255_v33, 2  ;;  %vm2641_vm3 = vcmp.lt.s32.totalorder %v2640_v52, 0  ;;  %vm1110_vm4 = vcmp.eq.s32.totalorder %v4255_v33, 0 }
 0x20b   : > { %v4281_v22 = vmul.u32.u64.low %v1270_v14, %v1269_v63  ;;  %v4282_v26 = vmul.u32.u64.high %v1270_v14, %v1269_v63, %v4281_v22  ;;  %vm1113_vm6 = vcmp.eq.s32.totalorder %v4255_v33, 2  ;;  %v2021_v36 = vsel %vm2641_vm3, 0, %v2640_v52 }
 0x20c   : > { %v2168_v61 = vadd.s32 1, %v2646_v50  ;;  %v2006_v1 = vadd.s32 %v4180_v41, %v4177_v15  ;;  %v2022_v16 = vsub.s32 32, %v2021_v36  ;;  %v2026_v37 = vsub.s32 4294967266, %v2021_v36 }
 0x20d   : > { %v1261_v13 = vsel %vm1255_vm15, %v1258_v42, %v1260_v27  ;;  %v2037_v23 = vsel %vm1952_vm10, %v2036_v39, %v4229_v56  ;;  %v1280_v31 = vadd.s32 1, %v4277_v46  ;;  %v2158_v28 = vand.u32 2147483647, %v4249_v53 }
 0x20e   : > { %v2818_v19 = vpop.eup %2817  ;;  %vm2169_vm7 = vcmp.gt.s32.totalorder %v2168_v61, 0  ;;  %v2023_v18 = vshll.u32 %v4251_v4, %v2021_v36  ;;  %v2024_v49 = vshrl.u32 %v2006_v1, %v2022_v16  ;;  %v2027_v15 = vadd.s32 127, %v2026_v37 }
 0x20f   : > { %v2820_v30 = vpop.eup %2819  ;;  %v1114_v2 = vxor.u32 2147483648, %v2818_v19  ;;  %v1277_v29 = vmul.u32 %v1270_v14, %v1261_v13  ;;  %vm1279_vm11 = vc.u32 %v4282_v26, %v4276_v20  ;;  %v2170_v21 = vsel %vm2169_vm7, %v2168_v61, 0 }
 0x210   : > { %v1111_v41 = vxor.u32 2147483648, %v2820_v30  ;;  %v2025_v39 = vor.u32 %v2024_v49, %v2023_v18  ;;  %v2028_v42 = vshll.u32 %v2027_v15, 23  ;;  %v1281_v35 = vsel %vm1279_vm11, %v1280_v31, %v4277_v46 }
 0x211   : > { %v1115_v56 = vsel %vm1113_vm6, %v1114_v2, %v2820_v30  ;;  %v1282_v4 = vadd.s32 %v1281_v35, %v1277_v29  ;;  %v2165_v45 = vand.u32 8388607, %v2158_v28  ;;  %v2172_v14 = vand.u32 31, %v2170_v21 }
 0x212   : > { %v1112_v3 = vsel %vm1110_vm4, %v2818_v19, %v1111_v41  ;;  %vm1106_vm13 = vweird.f32 %v3945_v34  ;;  %v2029_v27 = vor.u32 4788187, %v2028_v42  ;;  %v2039_v5 = vsel %vm4271_vm1, 0, %v2037_v23 }
 0x213   : > { %v1116_v52 = vsel %vm1109_vm2, %v1112_v3, %v1115_v56  ;;  %v1283_v63 = vadd.s32 536870912, %v1282_v4  ;;  %v2173_v46 = vsub.s32 32, %v2172_v14  ;;  %v4311_v50 = vadd.f32 %v4060_v7, %v4225_v0 }
 0x214   : > { %v1117_v60 = vsel %vm1106_vm13, nan, %v1116_v52  ;;  %v2030_v36 = vand.u32 2147483647, %v2029_v27  ;;  %v2032_v34 = vcvt.s32.f32 %v2025_v39  ;;  %v2043_v33 = vadd.s32 3, %v2039_v5 }
 0x215   : > { %v2478_v22 = vsel %vm3745_vm8, %v3917_v6, %v1117_v60  ;;  %v4318_v61 = vshrl.u32 %v1283_v63, 30  ;;  %v2166_v1 = vor.u32 8388608, %v2165_v45  ;;  %v2176_v16 = vshrl.u32 %v4948_v10, %v2173_v46 }
 0x216   : > { %2495 = vst.msk [vmem:[%s3814_s26 + $0x10] sm:$0xff] %vm2492_vm12, %v2478_v22  ;;  %v2033_v37 = vmul.f32 %v2032_v34, %v2030_v36  ;;  %v2179_v13 = vshrl.u32 %v4949_v48, %v2173_v46  ;;  %v2182_v0 = vshrl.u32 %v4952_v38, %v2173_v46  ;;  %v2185_v19 = vshrl.u32 %v2933_v51, %v2173_v46 }
 0x217   : > { %v1285_v23 = vshll.u32 %v4318_v61, 30  ;;  %v2171_v6 = vshrl.u32 %v2170_v21, 5  ;;  %v2181_v31 = vshll.u32 %v4949_v48, %v2172_v14  ;;  %v1433_v30 = vand.u32 2139095040, %v4311_v50 }
 0x218   : > { %v2034_v2 = vxor.u32 2147483648, %v2033_v37  ;;  %v2175_v18 = vshll.u32 %v2929_v8, %v2172_v14  ;;  %v2178_v49 = vshll.u32 %v4948_v10, %v2172_v14  ;;  %v2184_v15 = vshll.u32 %v4952_v38, %v2172_v14 }
 0x219   : > { %v4330_v41 = vsub.s32 %v1282_v4, %v1285_v23  ;;  %v2183_v29 = vor.u32 %v2182_v0, %v2181_v31  ;;  %v2187_v56 = vshll.u32 %v2933_v51, %v2172_v14  ;;  %v2188_v39 = vshrl.u32 %v4953_v54, %v2173_v46 }
 0x21a   : > { %v2035_v21 = vsel %vm1952_vm10, %v2034_v2, %v2033_v37  ;;  %v2177_v42 = vor.u32 %v2176_v16, %v2175_v18  ;;  %v2180_v35 = vor.u32 %v2179_v13, %v2178_v49  ;;  %v2186_v3 = vor.u32 %v2185_v19, %v2184_v15  ;;  %v738_v2 = vpop.permute.xlu0 %737 }
 0x21b   : > { %v2038_v45 = vsel %vm4271_vm1, %v4063_v25, %v2035_v21  ;;  %v1288_v52 = vsub.s32 0, %v4330_v41  ;;  %v2189_v27 = vor.u32 %v2188_v39, %v2187_v56  ;;  %v2206_v4 = vshll.u32 %v2166_v1, 8 }
 0x21c   : > { %2821 = vcosq.f32 %v2038_v45  ;;  %vm1224_vm5 = vcmp.lt.s32.totalorder %v4148_v9, 0  ;;  %v2174_v14 = vshrl.u32 %v2929_v8, %v2173_v46  ;;  %vm2193_vm14 = vcmp.lt.s32.totalorder %v2171_v6, 4 }
 0x21d   : > { %v1434_v5 = vshrl.u32 %v1433_v30, 23  ;;  %2823 = vsinq.f32 %v2038_v45  ;;  %v2611_v60 = vmin.u32 %v1288_v52, %v4330_v41  ;;  %vm2190_vm10 = vcmp.lt.s32.totalorder %v2171_v6, 1 }
 0x21e   : > { %v2195_v63 = vsel %vm2193_vm14, %v2183_v29, 2102212464  ;;  %v2198_v22 = vsel %vm2190_vm10, %v2177_v42, %v2180_v35  ;;  %v2199_v36 = vsel %vm2193_vm14, %v2186_v3, 920167782  ;;  %v2202_v17 = vsel %vm2190_vm10, %v2180_v35, %v2183_v29 }
 0x21f   : > { %v2203_v34 = vsel %vm2193_vm14, %v2189_v27, 1326507024  ;;  %v1290_v16 = vclz %v2611_v60  ;;  %vm2191_vm15 = vcmp.lt.s32.totalorder %v2171_v6, 2  ;;  %vm2192_vm0 = vcmp.lt.s32.totalorder %v2171_v6, 3 }
 0x220   : > { %v2194_v1 = vsel %vm2190_vm10, %v2174_v14, %v2177_v42  ;;  %v2196_v37 = vsel %vm2192_vm0, %v2180_v35, %v2195_v63  ;;  %v2200_v13 = vsel %vm2192_vm0, %v2183_v29, %v2199_v36  ;;  %v2204_v0 = vsel %vm2192_vm0, %v2186_v3, %v2203_v34 }
 0x221   : > { %v2618_v19 = vadd.s32 4294967169, %v1434_v5  ;;  %v2612_v46 = vadd.s32 4294967294, %v1290_v16  ;;  %v1308_v23 = vsub.s32 4, %v4318_v61  ;;  %v2201_v31 = vsel %vm2191_vm15, %v2198_v22, %v2200_v13 }
 0x222   : > { %v2205_v30 = vsel %vm2191_vm15, %v2202_v17, %v2204_v0  ;;  %v4349_v15 = vmul.u32.u64.low %v2206_v4, %v2201_v31  ;;  %v4350_v56 = vmul.u32.u64.high %v2206_v4, %v2201_v31, %v4349_v15  ;;  %vm4355_vm1 = vcmp.le.f32.partialorder %v1222_v62, 0.7853982 }
 0x223   : > { %v4346_v18 = vmul.u32.u64.low %v2206_v4, %v2205_v30  ;;  %v4347_v49 = vmul.u32.u64.high %v2206_v4, %v2205_v30, %v4346_v18  ;;  %vm2613_vm2 = vcmp.lt.s32.totalorder %v2612_v46, 0  ;;  %v2197_v39 = vsel %vm2191_vm15, %v2194_v1, %v2196_v37 }
 0x224   : > { %v1440_v21 = vadd.s32 1, %v2618_v19  ;;  %v2044_v42 = vand.u32 3, %v2043_v33  ;;  %v1293_v35 = vsel %vm2613_vm2, 0, %v2612_v46  ;;  %v1430_v3 = vand.u32 2147483647, %v4311_v50 }
 0x225   : > { %v4364_v45 = vsel %vm3424_vm9, %v738_v2, %v3510_v12  ;;  %v1278_v52 = vadd.s32 %v4276_v20, %v4282_v26  ;;  %v1294_v62 = vsub.s32 32, %v1293_v35  ;;  %v1298_v27 = vsub.s32 4294967266, %v1293_v35 }
 0x226   : > { %v1309_v6 = vsel %vm1224_vm5, %v1308_v23, %v4318_v61  ;;  %vm2042_vm3 = vweird.f32 %v4063_v25  ;;  %v2213_v33 = vmul.u32 %v2206_v4, %v2197_v39  ;;  %vm2215_vm4 = vc.u32 %v4347_v49, %v4349_v15 }
 0x227   : > { %v2216_v14 = vadd.s32 1, %v4350_v56  ;;  %vm1441_vm6 = vcmp.gt.s32.totalorder %v1440_v21, 0  ;;  %v1295_v12 = vshll.u32 %v4330_v41, %v1293_v35  ;;  %v1296_v5 = vshrl.u32 %v1278_v52, %v1294_v62 }
 0x228   : > { %v1299_v60 = vadd.s32 127, %v1298_v27  ;;  %v1442_v20 = vsel %vm1441_vm6, %v1440_v21, 0  ;;  %vm2045_vm7 = vcmp.lt.s32.totalorder %v2044_v42, 2  ;;  %v1437_v61 = vand.u32 8388607, %v1430_v3 }
 0x229   : > { %v2217_v26 = vsel %vm2215_vm4, %v2216_v14, %v4350_v56  ;;  %v1444_v63 = vand.u32 31, %v1442_v20  ;;  %v2822_v22 = vpop.eup %2821  ;;  %vm2046_vm11 = vcmp.eq.s32.totalorder %v2044_v42, 0  ;;  %v1297_v4 = vor.u32 %v1296_v5, %v1295_v12 }
 0x22a   : > { %v1300_v36 = vshll.u32 %v1299_v60, 23  ;;  %v2218_v17 = vadd.s32 %v2217_v26, %v2213_v33  ;;  %v2824_v34 = vpop.eup %2823  ;;  %vm2049_vm13 = vcmp.eq.s32.totalorder %v2044_v42, 2  ;;  %v2050_v16 = vxor.u32 2147483648, %v2822_v22 }
 0x22b   : > { %v1311_v41 = vsel %vm4355_vm1, 0, %v1309_v6  ;;  %v1445_v1 = vsub.s32 32, %v1444_v63  ;;  %v2047_v37 = vxor.u32 2147483648, %v2824_v34  ;;  %v783_v19 = vmul.f32 %v4018_v59, %v4364_v45 }
 0x22c   : > { %v1301_v13 = vor.u32 4788187, %v1300_v36  ;;  %v2219_v0 = vadd.s32 536870912, %v2218_v17  ;;  %v2051_v46 = vsel %vm2049_vm13, %v2050_v16, %v2824_v34  ;;  %v1304_v23 = vcvt.s32.f32 %v1297_v4 }
 0x22d   : > { %v1438_v31 = vor.u32 8388608, %v1437_v61  ;;  %v1448_v30 = vshrl.u32 %v4948_v10, %v1445_v1  ;;  %v2048_v2 = vsel %vm2046_vm11, %v2822_v22, %v2047_v37  ;;  %v1451_v39 = vshrl.u32 %v4949_v48, %v1445_v1 }
 0x22e   : > { %v1302_v18 = vand.u32 2147483647, %v1301_v13  ;;  %v4385_v56 = vshrl.u32 %v2219_v0, 30  ;;  %v2052_v21 = vsel %vm2045_vm7, %v2048_v2, %v2051_v46  ;;  %v1443_v35 = vshrl.u32 %v1442_v20, 5 }
 0x22f   : > { %v1447_v52 = vshll.u32 %v2929_v8, %v1444_v63  ;;  %v1454_v62 = vshrl.u32 %v4952_v38, %v1445_v1  ;;  %v2053_v27 = vsel %vm2042_vm3, nan, %v2052_v21  ;;  %v1450_v14 = vshll.u32 %v4948_v10, %v1444_v63 }
 0x230   : > { %v1305_v6 = vmul.f32 %v1304_v23, %v1302_v18  ;;  %v2221_v33 = vshll.u32 %v4385_v56, 30  ;;  %v2487_v12 = vsel %vm3745_vm8, %v4003_v24, %v2053_v27  ;;  %v1453_v42 = vshll.u32 %v4949_v48, %v1444_v63  ;;  %v710_v18 = vpop.permute.xlu1 %709 }
 0x231   : > { %v1456_v5 = vshll.u32 %v4952_v38, %v1444_v63  ;;  %v1457_v60 = vshrl.u32 %v2933_v51, %v1445_v1  ;;  %2504 = vst.msk [vmem:[%s3814_s26 + $0x58] sm:$0xff] %vm2492_vm12, %v2487_v12  ;;  %v1449_v26 = vor.u32 %v1448_v30, %v1447_v52  ;;  %v1452_v61 = vor.u32 %v1451_v39, %v1450_v14 }
 0x232   : > { %v1306_v20 = vxor.u32 2147483648, %v1305_v6  ;;  %v4403_v25 = vsub.s32 %v2218_v17, %v2221_v33  ;;  %v1455_v22 = vor.u32 %v1454_v62, %v1453_v42  ;;  %v1459_v36 = vshll.u32 %v2933_v51, %v1444_v63 }
 0x233   : > { %v1458_v4 = vor.u32 %v1457_v60, %v1456_v5  ;;  %v1460_v34 = vshrl.u32 %v4953_v54, %v1445_v1  ;;  %v1315_v16 = vadd.s32 3, %v1311_v41  ;;  %v1478_v13 = vshll.u32 %v1438_v31, 8 }
 0x234   : > { %v1307_v24 = vsel %vm1224_vm5, %v1306_v20, %v1305_v6  ;;  %v2224_v37 = vsub.s32 0, %v4403_v25  ;;  %vm2160_vm14 = vcmp.lt.s32.totalorder %v4249_v53, 0  ;;  %v1446_v0 = vshrl.u32 %v2929_v8, %v1445_v1 }
 0x235   : > { %v1310_v17 = vsel %vm4355_vm1, %v4148_v9, %v1307_v24  ;;  %v1461_v46 = vor.u32 %v1460_v34, %v1459_v36  ;;  %v4416_v63 = vadd.f32 %v4060_v7, %v783_v19  ;;  %vm1462_vm5 = vcmp.lt.s32.totalorder %v1443_v35, 1 }
 0x236   : > { %2825 = vcosq.f32 %v1310_v17  ;;  %v2647_v23 = vmin.u32 %v2224_v37, %v4403_v25  ;;  %vm1465_vm10 = vcmp.lt.s32.totalorder %v1443_v35, 4  ;;  %v1470_v31 = vsel %vm1462_vm5, %v1449_v26, %v1452_v61 }
 0x237   : > { %2827 = vsinq.f32 %v1310_v17  ;;  %v1467_v41 = vsel %vm1465_vm10, %v1455_v22, 2102212464  ;;  %v1471_v30 = vsel %vm1465_vm10, %v1458_v4, 920167782  ;;  %vm1463_vm15 = vcmp.lt.s32.totalorder %v1443_v35, 2 }
 0x238   : > { %v2226_v2 = vclz %v2647_v23  ;;  %vm1464_vm0 = vcmp.lt.s32.totalorder %v1443_v35, 3  ;;  %v1466_v29 = vsel %vm1462_vm5, %v1446_v0, %v1449_v26  ;;  %v1474_v21 = vsel %vm1462_vm5, %v1452_v61, %v1455_v22 }
 0x239   : > { %v1468_v39 = vsel %vm1464_vm0, %v1452_v61, %v1467_v41  ;;  %v1472_v1 = vsel %vm1464_vm0, %v1455_v22, %v1471_v30  ;;  %v1475_v52 = vsel %vm1465_vm10, %v1461_v46, 1326507024  ;;  %v2244_v62 = vsub.s32 4, %v4385_v56 }
 0x23a   : > { %v2648_v19 = vadd.s32 4294967294, %v2226_v2  ;;  %v1473_v27 = vsel %vm1463_vm15, %v1470_v31, %v1472_v1  ;;  %v1476_v6 = vsel %vm1464_vm0, %v1458_v4, %v1475_v52  ;;  %v4428_v42 = vsel %vm3424_vm9, %v710_v18, %v3403_v40 }
 0x23b   : > { %v1477_v33 = vsel %vm1463_vm15, %v1474_v21, %v1476_v6  ;;  %v4422_v14 = vmul.u32.u64.low %v1478_v13, %v1473_v27  ;;  %v4423_v12 = vmul.u32.u64.high %v1478_v13, %v1473_v27, %v4422_v14  ;;  %v1469_v5 = vsel %vm1463_vm15, %v1466_v29, %v1468_v39 }
 0x23c   : > { %vm2649_vm1 = vcmp.lt.s32.totalorder %v2648_v19, 0  ;;  %v4431_v60 = vmul.u32.u64.low %v1478_v13, %v1477_v33  ;;  %v4432_v20 = vmul.u32.u64.high %v1478_v13, %v1477_v33, %v4431_v60  ;;  %v1316_v26 = vand.u32 3, %v1315_v16 }
 0x23d   : > { %vm4436_vm2 = vcmp.le.f32.partialorder %v2158_v28, 0.7853982  ;;  %v2229_v22 = vsel %vm2649_vm1, 0, %v2648_v19  ;;  %v2369_v4 = vand.u32 2139095040, %v4416_v63  ;;  %v2214_v40 = vadd.s32 %v4349_v15, %v4347_v49 }
 0x23e   : > { %v2230_v36 = vsub.s32 32, %v2229_v22  ;;  %v2234_v34 = vsub.s32 4294967266, %v2229_v22  ;;  %v2245_v35 = vsel %vm2160_vm14, %v2244_v62, %v4385_v56  ;;  %v1485_v24 = vmul.u32 %v1478_v13, %v1469_v5 }
 0x23f   : > { %v1488_v16 = vadd.s32 1, %v4423_v12  ;;  %v2370_v37 = vshrl.u32 %v2369_v4, 23  ;;  %v776_v28 = vmul.f32 %v4018_v59, %v4428_v42  ;;  %v2231_v17 = vshll.u32 %v4403_v25, %v2229_v22 }
 0x240   : > { %v2232_v0 = vshrl.u32 %v2214_v40, %v2230_v36  ;;  %v2235_v46 = vadd.s32 127, %v2234_v34  ;;  %vm1487_vm3 = vc.u32 %v4432_v20, %v4422_v14  ;;  %v2247_v49 = vsel %vm4436_vm2, 0, %v2245_v35 }
 0x241   : > { %v1489_v15 = vsel %vm1487_vm3, %v1488_v16, %v4423_v12  ;;  %v2366_v56 = vand.u32 2147483647, %v4416_v63  ;;  %v2654_v13 = vadd.s32 4294967169, %v2370_v37  ;;  %vm1318_vm4 = vcmp.eq.s32.totalorder %v1316_v26, 0 }
 0x242   : > { %v2233_v23 = vor.u32 %v2232_v0, %v2231_v17  ;;  %v2236_v41 = vshll.u32 %v2235_v46, 23  ;;  %v1490_v31 = vadd.s32 %v1489_v15, %v1485_v24  ;;  %vm1321_vm6 = vcmp.eq.s32.totalorder %v1316_v26, 2 }
 0x243   : > { %v2826_v30 = vpop.eup %2825  ;;  %v2376_v59 = vadd.s32 1, %v2654_v13  ;;  %v4456_v25 = vadd.f32 %v4060_v7, %v776_v28  ;;  %v2251_v39 = vadd.s32 3, %v2247_v49  ;;  %v2373_v19 = vand.u32 8388607, %v2366_v56 }
 0x244   : > { %v2828_v2 = vpop.eup %2827  ;;  %v1322_v29 = vxor.u32 2147483648, %v2826_v30  ;;  %v2237_v18 = vor.u32 4788187, %v2236_v41  ;;  %v1491_v1 = vadd.s32 536870912, %v1490_v31  ;;  %v2240_v52 = vcvt.s32.f32 %v2233_v23 }
 0x245   : > { %v1319_v21 = vxor.u32 2147483648, %v2828_v2  ;;  %vm2377_vm7 = vcmp.gt.s32.totalorder %v2376_v59, 0  ;;  %vm1317_vm11 = vcmp.lt.s32.totalorder %v1316_v26, 2  ;;  %v1641_v5 = vand.u32 2139095040, %v4456_v25 }
 0x246   : > { %v1323_v62 = vsel %vm1321_vm6, %v1322_v29, %v2828_v2  ;;  %v2238_v27 = vand.u32 2147483647, %v2237_v18  ;;  %v4460_v6 = vshrl.u32 %v1491_v1, 30  ;;  %v2378_v33 = vsel %vm2377_vm7, %v2376_v59, 0 }
 0x247   : > { %v1320_v7 = vsel %vm1318_vm4, %v2826_v30, %v1319_v21  ;;  %v2380_v12 = vand.u32 31, %v2378_v33  ;;  %vm1314_vm13 = vweird.f32 %v4148_v9  ;;  %v4466_v36 = vand.u32 3, %v2251_v39 }
 0x248   : > { %v1324_v60 = vsel %vm1317_vm11, %v1320_v7, %v1323_v62  ;;  %v2241_v22 = vmul.f32 %v2240_v52, %v2238_v27  ;;  %v1493_v4 = vshll.u32 %v4460_v6, 30  ;;  %v1486_v34 = vadd.s32 %v4422_v14, %v4432_v20 }
 0x249   : > { %v1325_v40 = vsel %vm1314_vm13, nan, %v1324_v60  ;;  %v2381_v35 = vsub.s32 32, %v2380_v12  ;;  %v2374_v37 = vor.u32 8388608, %v2373_v19  ;;  %v1638_v17 = vand.u32 2147483647, %v4456_v25 }
 0x24a   : > { %v2480_v26 = vsel %vm3745_vm8, %v4111_v55, %v1325_v40  ;;  %v2242_v24 = vxor.u32 2147483648, %v2241_v22  ;;  %v4472_v16 = vsub.s32 %v1490_v31, %v1493_v4  ;;  %v1642_v0 = vshrl.u32 %v1641_v5, 23 }
 0x24b   : > { %2497 = vst.msk [vmem:[%s3814_s26 + $0x20] sm:$0xff] %vm2492_vm12, %v2480_v26  ;;  %v2384_v9 = vshrl.u32 %v4948_v10, %v2381_v35  ;;  %v2387_v28 = vshrl.u32 %v4949_v48, %v2381_v35  ;;  %v2383_v55 = vshll.u32 %v2929_v8, %v2380_v12  ;;  %v2386_v46 = vshll.u32 %v4948_v10, %v2380_v12 }
 0x24c   : > { %v2243_v14 = vsel %vm2160_vm14, %v2242_v24, %v2241_v22  ;;  %v1496_v20 = vsub.s32 0, %v4472_v16  ;;  %v2379_v15 = vshrl.u32 %v2378_v33, 5  ;;  %v2389_v13 = vshll.u32 %v4949_v48, %v2380_v12 }
 0x24d   : > { %v2246_v49 = vsel %vm4436_vm2, %v4249_v53, %v2243_v14  ;;  %v2390_v23 = vshrl.u32 %v4952_v38, %v2381_v35  ;;  %v2385_v31 = vor.u32 %v2384_v9, %v2383_v55  ;;  %v2388_v30 = vor.u32 %v2387_v28, %v2386_v46  ;;  %v718_v46 = vpop.permute.xlu1 %717 }
 0x24e   : > { %2829 = vcosq.f32 %v2246_v49  ;;  %v2619_v41 = vmin.u32 %v1496_v20, %v4472_v16  ;;  %v2392_v2 = vshll.u32 %v4952_v38, %v2380_v12  ;;  %v2393_v29 = vshrl.u32 %v2933_v51, %v2381_v35 }
 0x24f   : > { %2831 = vsinq.f32 %v2246_v49  ;;  %v2391_v59 = vor.u32 %v2390_v23, %v2389_v13  ;;  %vm1432_vm14 = vcmp.lt.s32.totalorder %v4311_v50, 0  ;;  %v1516_v18 = vsub.s32 4, %v4460_v6 }
 0x250   : > { %v1498_v61 = vclz %v2619_v41  ;;  %v4494_v39 = vshll.u32 %v2374_v37, 8  ;;  %v2626_v1 = vadd.s32 4294967169, %v1642_v0  ;;  %v2382_v21 = vshrl.u32 %v2929_v8, %v2381_v35 }
 0x251   : > { %v2394_v52 = vor.u32 %v2393_v29, %v2392_v2  ;;  %v2395_v19 = vshll.u32 %v2933_v51, %v2380_v12  ;;  %v2396_v62 = vshrl.u32 %v4953_v54, %v2381_v35  ;;  %vm2398_vm5 = vcmp.lt.s32.totalorder %v2379_v15, 1 }
 0x252   : > { %v2620_v27 = vadd.s32 4294967294, %v1498_v61  ;;  %vm2400_vm10 = vcmp.lt.s32.totalorder %v2379_v15, 3  ;;  %vm2401_vm15 = vcmp.lt.s32.totalorder %v2379_v15, 4  ;;  %v2406_v5 = vsel %vm2398_vm5, %v2385_v31, %v2388_v30 }
 0x253   : > { %v2397_v33 = vor.u32 %v2396_v62, %v2395_v19  ;;  %v2403_v7 = vsel %vm2401_vm15, %v2391_v59, 2102212464  ;;  %v2407_v60 = vsel %vm2401_vm15, %v2394_v52, 920167782  ;;  %vm2399_vm1 = vcmp.lt.s32.totalorder %v2379_v15, 2 }
 0x254   : > { %vm2621_vm0 = vcmp.lt.s32.totalorder %v2620_v27, 0  ;;  %v2408_v22 = vsel %vm2400_vm10, %v2391_v59, %v2407_v60  ;;  %v2410_v4 = vsel %vm2398_vm5, %v2388_v30, %v2391_v59  ;;  %v2402_v26 = vsel %vm2398_vm5, %v2382_v21, %v2385_v31 }
 0x255   : > { %v1501_v40 = vsel %vm2621_vm0, 0, %v2620_v27  ;;  %v2409_v24 = vsel %vm2399_vm1, %v2406_v5, %v2408_v22  ;;  %v2411_v12 = vsel %vm2401_vm15, %v2397_v33, 1326507024  ;;  %v2404_v9 = vsel %vm2400_vm10, %v2388_v30, %v2403_v7 }
 0x256   : > { %v1502_v37 = vsub.s32 32, %v1501_v40  ;;  %v1506_v35 = vsub.s32 4294967266, %v1501_v40  ;;  %v2412_v28 = vsel %vm2400_vm10, %v2394_v52, %v2411_v12  ;;  %v1503_v0 = vshll.u32 %v4472_v16, %v1501_v40 }
 0x257   : > { %v2413_v14 = vsel %vm2399_vm1, %v2410_v4, %v2412_v28  ;;  %v4506_v20 = vmul.u32.u64.low %v4494_v39, %v2409_v24  ;;  %v4507_v55 = vmul.u32.u64.high %v4494_v39, %v2409_v24, %v4506_v20  ;;  %vm4516_vm2 = vcmp.le.f32.partialorder %v1430_v3, 0.7853982  ;;  %v4551_v28 = vld [vmem:[%s4917_s1] ss:$0 sm:$0xff] }
 0x258   : > { %v1504_v49 = vshrl.u32 %v1486_v34, %v1502_v37  ;;  %v1507_v13 = vadd.s32 127, %v1506_v35  ;;  %v4511_v23 = vmul.u32.u64.low %v4494_v39, %v2413_v14  ;;  %v4512_v41 = vmul.u32.u64.high %v4494_v39, %v2413_v14, %v4511_v23 }
 0x259   : > { %v1517_v16 = vsel %vm1432_vm14, %v1516_v18, %v4460_v6  ;;  %v1648_v30 = vadd.s32 1, %v2626_v1  ;;  %v2405_v34 = vsel %vm2399_vm1, %v2402_v26, %v2404_v9  ;;  %v4527_v29 = vsel %vm3424_vm9, %v718_v46, %v3407_v43 }
 0x25a   : > { %v1505_v59 = vor.u32 %v1504_v49, %v1503_v0  ;;  %v1508_v2 = vshll.u32 %v1507_v13, 23  ;;  %vm2254_vm3 = vcmp.eq.s32.totalorder %v4466_v36, 0  ;;  %vm2257_vm4 = vcmp.eq.s32.totalorder %v4466_v36, 2 }
 0x25b   : > { %v2830_v61 = vpop.eup %2829  ;;  %v2424_v3 = vadd.s32 1, %v4507_v55  ;;  %vm1649_vm6 = vcmp.gt.s32.totalorder %v1648_v30, 0  ;;  %v1519_v15 = vsel %vm4516_vm2, 0, %v1517_v16  ;;  %v1645_v1 = vand.u32 8388607, %v1638_v17 }
 0x25c   : > { %v2832_v21 = vpop.eup %2831  ;;  %v2258_v6 = vxor.u32 2147483648, %v2830_v61  ;;  %v1509_v18 = vor.u32 4788187, %v1508_v2  ;;  %v2421_v43 = vmul.u32 %v4494_v39, %v2405_v34  ;;  %vm2423_vm7 = vc.u32 %v4512_v41, %v4506_v20 }
 0x25d   : > { %v2255_v52 = vxor.u32 2147483648, %v2832_v21  ;;  %v1650_v19 = vsel %vm1649_vm6, %v1648_v30, 0  ;;  %v1512_v33 = vcvt.s32.f32 %v1505_v59  ;;  %v2425_v7 = vsel %vm2423_vm7, %v2424_v3, %v4507_v55 }
 0x25e   : > { %v2259_v62 = vsel %vm2257_vm4, %v2258_v6, %v2832_v21  ;;  %v1510_v27 = vand.u32 2147483647, %v1509_v18  ;;  %vm2253_vm11 = vcmp.lt.s32.totalorder %v4466_v36, 2  ;;  %v2426_v60 = vadd.s32 %v2425_v7, %v2421_v43 }
 0x25f   : > { %v2256_v5 = vsel %vm2254_vm3, %v2830_v61, %v2255_v52  ;;  %v1652_v22 = vand.u32 31, %v1650_v19  ;;  %vm2250_vm13 = vweird.f32 %v4249_v53  ;;  %v1523_v40 = vadd.s32 3, %v1519_v15  ;;  %v4578_v52 = vld [vmem:[%s4918_s2] ss:$0 sm:$0xff] }
 0x260   : > { %v2260_v39 = vsel %vm2253_vm11, %v2256_v5, %v2259_v62  ;;  %v1513_v4 = vmul.f32 %v1512_v33, %v1510_v27  ;;  %v2427_v24 = vadd.s32 536870912, %v2426_v60  ;;  %v1646_v12 = vor.u32 8388608, %v1645_v1 }
 0x261   : > { %v2261_v26 = vsel %vm2250_vm13, nan, %v2260_v39  ;;  %v1653_v37 = vsub.s32 32, %v1652_v22  ;;  %v1655_v36 = vshll.u32 %v2929_v8, %v1652_v22  ;;  %v778_v53 = vmul.f32 %v4551_v28, %v4527_v29 }
 0x262   : > { %v2489_v35 = vsel %vm3745_vm8, %v4197_v11, %v2261_v26  ;;  %v1514_v9 = vxor.u32 2147483648, %v1513_v4  ;;  %v2428_v0 = vshrl.u32 %v2427_v24, 30  ;;  %v1658_v55 = vshll.u32 %v4948_v10, %v1652_v22 }
 0x263   : > { %2506 = vst.msk [vmem:[%s3814_s26 + $0x68] sm:$0xff] %vm2492_vm12, %v2489_v35  ;;  %v1656_v14 = vshrl.u32 %v4948_v10, %v1653_v37  ;;  %v1659_v11 = vshrl.u32 %v4949_v48, %v1653_v37  ;;  %v1662_v49 = vshrl.u32 %v4952_v38, %v1653_v37  ;;  %v1664_v13 = vshll.u32 %v4952_v38, %v1652_v22 }
 0x264   : > { %v1515_v46 = vsel %vm1432_vm14, %v1514_v9, %v1513_v4  ;;  %v1665_v23 = vshrl.u32 %v2933_v51, %v1653_v37  ;;  %v2429_v30 = vshll.u32 %v2428_v0, 30  ;;  %v1651_v59 = vshrl.u32 %v1650_v19, 5 }
 0x265   : > { %v1518_v16 = vsel %vm4516_vm2, %v4311_v50, %v1515_v46  ;;  %v1661_v2 = vshll.u32 %v4949_v48, %v1652_v22  ;;  %v1657_v34 = vor.u32 %v1656_v14, %v1655_v36  ;;  %v1660_v61 = vor.u32 %v1659_v11, %v1658_v55  ;;  %v726_v14 = vpop.permute.xlu1 %725 }
 0x266   : > { %2833 = vcosq.f32 %v1518_v16  ;;  %v1666_v3 = vor.u32 %v1665_v23, %v1664_v13  ;;  %v4569_v21 = vand.u32 3, %v1523_v40  ;;  %v4571_v6 = vsub.s32 %v2426_v60, %v2429_v30 }
 0x267   : > { %2835 = vsinq.f32 %v1518_v16  ;;  %v1663_v18 = vor.u32 %v1662_v49, %v1661_v2  ;;  %v1667_v15 = vshll.u32 %v2933_v51, %v1652_v22  ;;  %v1668_v1 = vshrl.u32 %v4953_v54, %v1653_v37 }
 0x268   : > { %v1686_v31 = vshll.u32 %v1646_v12, 8  ;;  %v4581_v43 = vadd.f32 %v4578_v52, %v778_v53  ;;  %v2432_v19 = vsub.s32 0, %v4571_v6  ;;  %vm1670_vm14 = vcmp.lt.s32.totalorder %v1651_v59, 1 }
 0x269   : > { %vm1671_vm5 = vcmp.lt.s32.totalorder %v1651_v59, 2  ;;  %vm1673_vm10 = vcmp.lt.s32.totalorder %v1651_v59, 4  ;;  %v1669_v62 = vor.u32 %v1668_v1, %v1667_v15  ;;  %vm1672_vm15 = vcmp.lt.s32.totalorder %v1651_v59, 3 }
 0x26a   : > { %v1678_v27 = vsel %vm1670_vm14, %v1657_v34, %v1660_v61  ;;  %v1679_v33 = vsel %vm1673_vm10, %v1666_v3, 920167782  ;;  %v2655_v7 = vmin.u32 %v2432_v19, %v4571_v6  ;;  %v1654_v5 = vshrl.u32 %v2929_v8, %v1653_v37 }
 0x26b   : > { %v1675_v60 = vsel %vm1673_vm10, %v1663_v18, 2102212464  ;;  %v1680_v22 = vsel %vm1672_vm15, %v1663_v18, %v1679_v33  ;;  %v2452_v39 = vsub.s32 4, %v2428_v0  ;;  %v1682_v40 = vsel %vm1670_vm14, %v1660_v61, %v1663_v18 }
 0x26c   : > { %v1681_v4 = vsel %vm1671_vm5, %v1678_v27, %v1680_v22  ;;  %v1683_v26 = vsel %vm1673_vm10, %v1669_v62, 1326507024  ;;  %vm4592_vm0 = vcmp.le.f32.partialorder %v2366_v56, 0.7853982  ;;  %vm2368_vm1 = vcmp.lt.s32.totalorder %v4416_v63, 0 }
 0x26d   : > { %v2434_v12 = vclz %v2655_v7  ;;  %v1674_v37 = vsel %vm1670_vm14, %v1654_v5, %v1657_v34  ;;  %v1676_v35 = vsel %vm1672_vm15, %v1660_v61, %v1675_v60  ;;  %v1684_v9 = vsel %vm1672_vm15, %v1666_v3, %v1683_v26 }
 0x26e   : > { %v4600_v36 = vmul.u32.u64.low %v1686_v31, %v1681_v4  ;;  %v4601_v53 = vmul.u32.u64.high %v1686_v31, %v1681_v4, %v4600_v36  ;;  %vm1526_vm2 = vcmp.eq.s32.totalorder %v4569_v21, 0  ;;  %v1685_v56 = vsel %vm1671_vm5, %v1682_v40, %v1684_v9 }
 0x26f   : > { %v2656_v55 = vadd.s32 4294967294, %v2434_v12  ;;  %v1849_v11 = vand.u32 2139095040, %v4581_v43  ;;  %vm1522_vm3 = vweird.f32 %v4311_v50  ;;  %vm1529_vm4 = vcmp.eq.s32.totalorder %v4569_v21, 2 }
 0x270   : > { %v2453_v46 = vsel %vm2368_vm1, %v2452_v39, %v2428_v0  ;;  %v4610_v49 = vmul.u32.u64.low %v1686_v31, %v1685_v56  ;;  %v4611_v13 = vmul.u32.u64.high %v1686_v31, %v1685_v56, %v4610_v49  ;;  %v1677_v23 = vsel %vm1671_vm5, %v1674_v37, %v1676_v35 }
 0x271   : > { %vm2657_vm6 = vcmp.lt.s32.totalorder %v2656_v55, 0  ;;  %v1850_v16 = vshrl.u32 %v1849_v11, 23  ;;  %v4617_v30 = vsel %vm3424_vm9, %v726_v14, %v3413_v47  ;;  %v2422_v2 = vadd.s32 %v4506_v20, %v4512_v41 }
 0x272   : > { %v2437_v34 = vsel %vm2657_vm6, 0, %v2656_v55  ;;  %v1696_v61 = vadd.s32 1, %v4601_v53  ;;  %v1846_v0 = vand.u32 2147483647, %v4581_v43  ;;  %v2455_v59 = vsel %vm4592_vm0, 0, %v2453_v46 }
 0x273   : > { %v2834_v3 = vpop.eup %2833  ;;  %v2438_v18 = vsub.s32 32, %v2437_v34  ;;  %v2442_v15 = vsub.s32 4294967266, %v2437_v34  ;;  %v2634_v1 = vadd.s32 4294967169, %v1850_v16  ;;  %v2439_v47 = vshll.u32 %v4571_v6, %v2437_v34 }
 0x274   : > { %v2836_v19 = vpop.eup %2835  ;;  %v1530_v62 = vxor.u32 2147483648, %v2834_v3  ;;  %v1693_v27 = vmul.u32 %v1686_v31, %v1677_v23  ;;  %vm1695_vm7 = vc.u32 %v4611_v13, %v4600_v36  ;;  %v1853_v22 = vand.u32 8388607, %v1846_v0 }
 0x275   : > { %v1527_v20 = vxor.u32 2147483648, %v2836_v19  ;;  %v2440_v41 = vshrl.u32 %v2422_v2, %v2438_v18  ;;  %v2443_v33 = vadd.s32 127, %v2442_v15  ;;  %v1697_v7 = vsel %vm1695_vm7, %v1696_v61, %v4601_v53 }
 0x276   : > { %v1531_v5 = vsel %vm1529_vm4, %v1530_v62, %v2836_v19  ;;  %v1698_v60 = vadd.s32 %v1697_v7, %v1693_v27  ;;  %v1856_v39 = vadd.s32 1, %v2634_v1  ;;  %vm1525_vm11 = vcmp.lt.s32.totalorder %v4569_v21, 2 }
 0x277   : > { %v1528_v6 = vsel %vm1526_vm2, %v2834_v3, %v1527_v20  ;;  %v2441_v31 = vor.u32 %v2440_v41, %v2439_v47  ;;  %v2444_v4 = vshll.u32 %v2443_v33, 23  ;;  %v2459_v26 = vadd.s32 3, %v2455_v59 }
 0x278   : > { %v1532_v40 = vsel %vm1525_vm11, %v1528_v6, %v1531_v5  ;;  %v1699_v12 = vadd.s32 536870912, %v1698_v60  ;;  %vm1857_vm13 = vcmp.gt.s32.totalorder %v1856_v39, 0  ;;  %v780_v53 = vmul.f32 %v4551_v28, %v4617_v30 }
 0x279   : > { %v1533_v37 = vsel %vm1522_vm3, nan, %v1532_v40  ;;  %v2445_v35 = vor.u32 4788187, %v2444_v4  ;;  %v1858_v9 = vsel %vm1857_vm13, %v1856_v39, 0  ;;  %v1854_v55 = vor.u32 8388608, %v1853_v22 }
 0x27a   : > { %v2482_v21 = vsel %vm3745_vm8, %v4209_v44, %v1533_v37  ;;  %v4642_v14 = vshrl.u32 %v1699_v12, 30  ;;  %v1860_v56 = vand.u32 31, %v1858_v9  ;;  %v2448_v46 = vcvt.s32.f32 %v2441_v31 }
 0x27b   : > { %2499 = vst.msk [vmem:[%s3814_s26 + $0x30] sm:$0xff] %vm2492_vm12, %v2482_v21  ;;  %v2446_v11 = vand.u32 2147483647, %v2445_v35  ;;  %v4647_v16 = vand.u32 3, %v2459_v26  ;;  %v4650_v2 = vadd.f32 %v4578_v52, %v780_v53  ;;  %v1694_v34 = vadd.s32 %v4600_v36, %v4611_v13 }
 0x27c   : > { %v1701_v50 = vshll.u32 %v4642_v14, 30  ;;  %v1861_v49 = vsub.s32 32, %v1860_v56  ;;  %v4656_v3 = vshll.u32 %v1854_v55, 8  ;;  %v1863_v15 = vshll.u32 %v2929_v8, %v1860_v56 }
 0x27d   : > { %v2449_v23 = vmul.f32 %v2448_v46, %v2446_v11  ;;  %v1866_v62 = vshll.u32 %v4948_v10, %v1860_v56  ;;  %v1869_v47 = vshll.u32 %v4949_v48, %v1860_v56  ;;  %v1859_v27 = vshrl.u32 %v1858_v9, 5 }
 0x27e   : > { %v4653_v44 = vsub.s32 %v1698_v60, %v1701_v50  ;;  %v1864_v61 = vshrl.u32 %v4948_v10, %v1861_v49  ;;  %v1867_v59 = vshrl.u32 %v4949_v48, %v1861_v49  ;;  %v1870_v1 = vshrl.u32 %v4952_v38, %v1861_v49 }
 0x27f   : > { %v2450_v18 = vxor.u32 2147483648, %v2449_v23  ;;  %v1873_v36 = vshrl.u32 %v2933_v51, %v1861_v49  ;;  %v1872_v41 = vshll.u32 %v4952_v38, %v1860_v56  ;;  %v1875_v39 = vshll.u32 %v2933_v51, %v1860_v56 }
 0x280   : > { %v1704_v19 = vsub.s32 0, %v4653_v44  ;;  %v1865_v20 = vor.u32 %v1864_v61, %v1863_v15  ;;  %v1868_v5 = vor.u32 %v1867_v59, %v1866_v62  ;;  %v1871_v60 = vor.u32 %v1870_v1, %v1869_v47 }
 0x281   : > { %v2451_v13 = vsel %vm2368_vm1, %v2450_v18, %v2449_v23  ;;  %v1874_v22 = vor.u32 %v1873_v36, %v1872_v41  ;;  %v1876_v6 = vshrl.u32 %v4953_v54, %v1861_v49  ;;  %v2054_v4 = vand.u32 2147483647, %v4650_v2 }
 0x282   : > { %v2454_v33 = vsel %vm4592_vm0, %v4416_v63, %v2451_v13  ;;  %v2627_v7 = vmin.u32 %v1704_v19, %v4653_v44  ;;  %v2057_v40 = vand.u32 2139095040, %v4650_v2  ;;  %v1724_v26 = vsub.s32 4, %v4642_v14 }
 0x283   : > { %2837 = vcosq.f32 %v2454_v33  ;;  %v1862_v24 = vshrl.u32 %v2929_v8, %v1861_v49  ;;  %v1877_v12 = vor.u32 %v1876_v6, %v1875_v39  ;;  %vm1878_vm14 = vcmp.lt.s32.totalorder %v1859_v27, 1 }
 0x284   : > { %2839 = vsinq.f32 %v2454_v33  ;;  %v1706_v31 = vclz %v2627_v7  ;;  %vm1880_vm5 = vcmp.lt.s32.totalorder %v1859_v27, 3  ;;  %vm1881_vm10 = vcmp.lt.s32.totalorder %v1859_v27, 4  ;;  %v734_v33 = vpop.permute.xlu1 %733 }
 0x285   : > { %v1886_v35 = vsel %vm1878_vm14, %v1865_v20, %v1868_v5  ;;  %v1883_v9 = vsel %vm1881_vm10, %v1871_v60, 2102212464  ;;  %v1887_v53 = vsel %vm1881_vm10, %v1874_v22, 920167782  ;;  %v1890_v21 = vsel %vm1878_vm14, %v1868_v5, %v1871_v60 }
 0x286   : > { %v2628_v37 = vadd.s32 4294967294, %v1706_v31  ;;  %v1891_v55 = vsel %vm1881_vm10, %v1877_v12, 1326507024  ;;  %vm1879_vm0 = vcmp.lt.s32.totalorder %v1859_v27, 2  ;;  %v1888_v56 = vsel %vm1880_vm5, %v1871_v60, %v1887_v53 }
 0x287   : > { %v1892_v11 = vsel %vm1880_vm5, %v1874_v22, %v1891_v55  ;;  %v1882_v50 = vsel %vm1878_vm14, %v1862_v24, %v1865_v20  ;;  %v1889_v49 = vsel %vm1879_vm0, %v1886_v35, %v1888_v56  ;;  %v1884_v15 = vsel %vm1880_vm5, %v1868_v5, %v1883_v9 }
 0x288   : > { %vm2629_vm15 = vcmp.lt.s32.totalorder %v2628_v37, 0  ;;  %v1893_v23 = vsel %vm1879_vm0, %v1890_v21, %v1892_v11  ;;  %v2058_v59 = vshrl.u32 %v2057_v40, 23  ;;  %vm4695_vm1 = vcmp.le.f32.partialorder %v1638_v17, 0.7853982 }
 0x289   : > { %v1709_v46 = vsel %vm2629_vm15, 0, %v2628_v37  ;;  %v4684_v1 = vmul.u32.u64.low %v4656_v3, %v1893_v23  ;;  %v4685_v19 = vmul.u32.u64.high %v4656_v3, %v1893_v23, %v4684_v1  ;;  %vm1640_vm2 = vcmp.lt.s32.totalorder %v4456_v25, 0 }
 0x28a   : > { %v1710_v61 = vsub.s32 32, %v1709_v46  ;;  %v1714_v18 = vsub.s32 4294967266, %v1709_v46  ;;  %v4688_v62 = vmul.u32.u64.low %v4656_v3, %v1889_v49  ;;  %v4689_v47 = vmul.u32.u64.high %v4656_v3, %v1889_v49, %v4688_v62 }
 0x28b   : > { %v1711_v36 = vshll.u32 %v4653_v44, %v1709_v46  ;;  %v2642_v41 = vadd.s32 4294967169, %v2058_v59  ;;  %v1885_v5 = vsel %vm1879_vm0, %v1882_v50, %v1884_v15  ;;  %v1725_v44 = vsel %vm1640_vm2, %v1724_v26, %v4642_v14 }
 0x28c   : > { %v1712_v13 = vshrl.u32 %v1694_v34, %v1710_v61  ;;  %v1715_v20 = vadd.s32 127, %v1714_v18  ;;  %vm2465_vm3 = vcmp.eq.s32.totalorder %v4647_v16, 2  ;;  %vm1903_vm4 = vc.u32 %v4685_v19, %v4688_v62 }
 0x28d   : > { %v2064_v34 = vadd.s32 1, %v2642_v41  ;;  %v1904_v17 = vadd.s32 1, %v4689_v47  ;;  %v4711_v39 = vsel %vm3424_vm9, %v734_v33, %v3422_v57  ;;  %v1901_v31 = vmul.u32 %v4656_v3, %v1885_v5 }
 0x28e   : > { %v1713_v60 = vor.u32 %v1712_v13, %v1711_v36  ;;  %v1716_v22 = vshll.u32 %v1715_v20, 23  ;;  %v2061_v14 = vand.u32 8388607, %v2054_v4  ;;  %v1727_v24 = vsel %vm4695_vm1, 0, %v1725_v44 }
 0x28f   : > { %vm2065_vm6 = vcmp.gt.s32.totalorder %v2064_v34, 0  ;;  %v1905_v12 = vsel %vm1903_vm4, %v1904_v17, %v4689_v47  ;;  %vm2458_vm9 = vweird.f32 %v4416_v63  ;;  %vm2462_vm7 = vcmp.eq.s32.totalorder %v4647_v16, 0 }
 0x290   : > { %v2838_v27 = vpop.eup %2837  ;;  %v1717_v6 = vor.u32 4788187, %v1716_v22  ;;  %v2066_v37 = vsel %vm2065_vm6, %v2064_v34, 0  ;;  %v1720_v57 = vcvt.s32.f32 %v1713_v60  ;;  %v1906_v9 = vadd.s32 %v1905_v12, %v1901_v31 }
 0x291   : > { %v2840_v40 = vpop.eup %2839  ;;  %v2466_v26 = vxor.u32 2147483648, %v2838_v27  ;;  %v2068_v53 = vand.u32 31, %v2066_v37  ;;  %vm2461_vm11 = vcmp.lt.s32.totalorder %v4647_v16, 2  ;;  %v1731_v46 = vadd.s32 3, %v1727_v24 }
 0x292   : > { %v2463_v35 = vxor.u32 2147483648, %v2840_v40  ;;  %v1718_v32 = vand.u32 2147483647, %v1717_v6  ;;  %v1907_v56 = vadd.s32 536870912, %v1906_v9  ;;  %v782_v49 = vmul.f32 %v4551_v28, %v4711_v39 }
 0x293   : > { %v2467_v3 = vsel %vm2465_vm3, %v2466_v26, %v2840_v40  ;;  %v2069_v50 = vsub.s32 32, %v2068_v53  ;;  %v2062_v18 = vor.u32 8388608, %v2061_v14  ;;  %v2071_v16 = vshll.u32 %v2929_v8, %v2068_v53 }
 0x294   : > { %v2464_v21 = vsel %vm2462_vm7, %v2838_v27, %v2463_v35  ;;  %v1721_v55 = vmul.f32 %v1720_v57, %v1718_v32  ;;  %v4726_v61 = vshrl.u32 %v1907_v56, 30  ;;  %v2074_v36 = vshll.u32 %v4948_v10, %v2068_v53 }
 0x295   : > { %v2468_v11 = vsel %vm2461_vm11, %v2464_v21, %v2467_v3  ;;  %v2072_v59 = vshrl.u32 %v4948_v10, %v2069_v50  ;;  %v2075_v1 = vshrl.u32 %v4949_v48, %v2069_v50  ;;  %v2078_v13 = vshrl.u32 %v4952_v38, %v2069_v50 }
 0x296   : > { %v2469_v23 = vsel %vm2458_vm9, nan, %v2468_v11  ;;  %v1722_v63 = vxor.u32 2147483648, %v1721_v55  ;;  %v1909_v47 = vshll.u32 %v4726_v61, 30  ;;  %v2067_v20 = vshrl.u32 %v2066_v37, 5 }
 0x297   : > { %v2491_v15 = vsel %vm3745_vm8, %v4364_v45, %v2469_v23  ;;  %v2077_v41 = vshll.u32 %v4949_v48, %v2068_v53  ;;  %v4746_v33 = vadd.f32 %v4578_v52, %v782_v49  ;;  %v2073_v60 = vor.u32 %v2072_v59, %v2071_v16 }
 0x298   : > { %2508 = vst.msk [vmem:[%s3814_s26 + $0x78] sm:$0xff] %vm2492_vm12, %v2491_v15  ;;  %v1723_v28 = vsel %vm1640_vm2, %v1722_v63, %v1721_v55  ;;  %v4748_v5 = vsub.s32 %v1906_v9, %v1909_v47  ;;  %v2076_v22 = vor.u32 %v2075_v1, %v2074_v36  ;;  %v2080_v34 = vshll.u32 %v4952_v38, %v2068_v53 }
 0x299   : > { %v1726_v45 = vsel %vm4695_vm1, %v4456_v25, %v1723_v28  ;;  %v2079_v44 = vor.u32 %v2078_v13, %v2077_v41  ;;  %v2081_v17 = vshrl.u32 %v2933_v51, %v2069_v50  ;;  %v2083_v27 = vshll.u32 %v2933_v51, %v2068_v53 }
 0x29a   : > { %2841 = vcosq.f32 %v1726_v45  ;;  %v1912_v7 = vsub.s32 0, %v4748_v5  ;;  %v2084_v6 = vshrl.u32 %v4953_v54, %v2069_v50  ;;  %v4755_v31 = vand.u32 3, %v1731_v46 }
 0x29b   : > { %2843 = vsinq.f32 %v1726_v45  ;;  %v2082_v52 = vor.u32 %v2081_v17, %v2080_v34  ;;  %v2102_v14 = vshll.u32 %v2062_v18, 8  ;;  %v2265_v40 = vand.u32 2139095040, %v4746_v33 }
 0x29c   : > { %v2635_v26 = vmin.u32 %v1912_v7, %v4748_v5  ;;  %v2085_v24 = vor.u32 %v2084_v6, %v2083_v27  ;;  %vm2086_vm13 = vcmp.lt.s32.totalorder %v2067_v20, 1  ;;  %vm2089_vm14 = vcmp.lt.s32.totalorder %v2067_v20, 4 }
 0x29d   : > { %v2070_v12 = vshrl.u32 %v2929_v8, %v2069_v50  ;;  %v2091_v37 = vsel %vm2089_vm14, %v2079_v44, 2102212464  ;;  %v2094_v35 = vsel %vm2086_vm13, %v2073_v60, %v2076_v22  ;;  %v2095_v32 = vsel %vm2089_vm14, %v2082_v52, 920167782 }
 0x29e   : > { %v1914_v57 = vclz %v2635_v26  ;;  %vm2087_vm5 = vcmp.lt.s32.totalorder %v2067_v20, 2  ;;  %vm2088_vm10 = vcmp.lt.s32.totalorder %v2067_v20, 3  ;;  %v2098_v9 = vsel %vm2086_vm13, %v2076_v22, %v2079_v44 }
 0x29f   : > { %v2090_v3 = vsel %vm2086_vm13, %v2070_v12, %v2073_v60  ;;  %v2096_v53 = vsel %vm2088_vm10, %v2079_v44, %v2095_v32  ;;  %v2099_v21 = vsel %vm2089_vm14, %v2085_v24, 1326507024  ;;  %v2266_v55 = vshrl.u32 %v2265_v40, 23 }
 0x2a0   : > { %v2636_v56 = vadd.s32 4294967294, %v1914_v57  ;;  %v2092_v11 = vsel %vm2088_vm10, %v2076_v22, %v2091_v37  ;;  %v2097_v46 = vsel %vm2087_vm5, %v2094_v35, %v2096_v53  ;;  %v2100_v49 = vsel %vm2088_vm10, %v2082_v52, %v2099_v21 }
 0x2a1   : > { %v2101_v23 = vsel %vm2087_vm5, %v2098_v9, %v2100_v49  ;;  %v4762_v63 = vmul.u32.u64.low %v2102_v14, %v2097_v46  ;;  %v4763_v50 = vmul.u32.u64.high %v2102_v14, %v2097_v46, %v4762_v63  ;;  %v2650_v18 = vadd.s32 4294967169, %v2266_v55 }
 0x2a2   : > { %vm2637_vm15 = vcmp.lt.s32.totalorder %v2636_v56, 0  ;;  %v4766_v15 = vmul.u32.u64.low %v2102_v14, %v2101_v23  ;;  %v4767_v16 = vmul.u32.u64.high %v2102_v14, %v2101_v23, %v4766_v15  ;;  %vm1733_vm0 = vcmp.lt.s32.totalorder %v4755_v31, 2 }
 0x2a3   : > { %v1917_v59 = vsel %vm2637_vm15, 0, %v2636_v56  ;;  %v2272_v1 = vadd.s32 1, %v2650_v18  ;;  %v1902_v28 = vadd.s32 %v4688_v62, %v4685_v19  ;;  %v2093_v13 = vsel %vm2087_vm5, %v2090_v3, %v2092_v11 }
 0x2a4   : > { %v1918_v47 = vsub.s32 32, %v1917_v59  ;;  %v1922_v36 = vsub.s32 4294967266, %v1917_v59  ;;  %vm1734_vm1 = vcmp.eq.s32.totalorder %v4755_v31, 0  ;;  %vm1737_vm2 = vcmp.eq.s32.totalorder %v4755_v31, 2 }
 0x2a5   : > { %v2112_v41 = vadd.s32 1, %v4763_v50  ;;  %vm2273_vm3 = vcmp.gt.s32.totalorder %v2272_v1, 0  ;;  %v1919_v44 = vshll.u32 %v4748_v5, %v1917_v59  ;;  %v2109_v19 = vmul.u32 %v2102_v14, %v2093_v13 }
 0x2a6   : > { %v1920_v34 = vshrl.u32 %v1902_v28, %v1918_v47  ;;  %v1923_v17 = vadd.s32 127, %v1922_v36  ;;  %vm2111_vm4 = vc.u32 %v4767_v16, %v4762_v63  ;;  %v2274_v62 = vsel %vm2273_vm3, %v2272_v1, 0 }
 0x2a7   : > { %v2842_v45 = vpop.eup %2841  ;;  %v2113_v52 = vsel %vm2111_vm4, %v2112_v41, %v4763_v50  ;;  %v2262_v5 = vand.u32 2147483647, %v4746_v33  ;;  %v2276_v24 = vand.u32 31, %v2274_v62  ;;  %vm1730_vm6 = vweird.f32 %v4456_v25 }
 0x2a8   : > { %v2844_v60 = vpop.eup %2843  ;;  %v1738_v22 = vxor.u32 2147483648, %v2842_v45  ;;  %v1921_v27 = vor.u32 %v1920_v34, %v1919_v44  ;;  %v1924_v6 = vshll.u32 %v1923_v17, 23  ;;  %v2114_v26 = vadd.s32 %v2113_v52, %v2109_v19 }
 0x2a9   : > { %v1735_v7 = vxor.u32 2147483648, %v2844_v60  ;;  %v1932_v35 = vsub.s32 4, %v4726_v61  ;;  %v2277_v57 = vsub.s32 32, %v2276_v24  ;;  %vm1848_vm9 = vcmp.lt.s32.totalorder %v4581_v43, 0 }
 0x2aa   : > { %v1739_v20 = vsel %vm1737_vm2, %v1738_v22, %v2844_v60  ;;  %v1925_v12 = vor.u32 4788187, %v1924_v6  ;;  %v2115_v32 = vadd.s32 536870912, %v2114_v26  ;;  %v1928_v53 = vcvt.s32.f32 %v1921_v27 }
 0x2ab   : > { %v1736_v40 = vsel %vm1734_vm1, %v2842_v45, %v1735_v7  ;;  %v2269_v31 = vand.u32 8388607, %v2262_v5  ;;  %v2280_v21 = vshrl.u32 %v4948_v10, %v2277_v57  ;;  %v2283_v55 = vshrl.u32 %v4949_v48, %v2277_v57 }
 0x2ac   : > { %v1740_v14 = vsel %vm1733_vm0, %v1736_v40, %v1739_v20  ;;  %v1926_v3 = vand.u32 2147483647, %v1925_v12  ;;  %v4793_v25 = vshrl.u32 %v2115_v32, 30  ;;  %v2279_v11 = vshll.u32 %v2929_v8, %v2276_v24 }
 0x2ad   : > { %v1741_v37 = vsel %vm1730_vm6, nan, %v1740_v14  ;;  %v2289_v46 = vshrl.u32 %v2933_v51, %v2277_v57  ;;  %v1933_v49 = vsel %vm1848_vm9, %v1932_v35, %v4726_v61  ;;  %v2275_v50 = vshrl.u32 %v2274_v62, 5 }
 0x2ae   : > { %v2484_v9 = vsel %vm3745_vm8, %v4428_v42, %v1741_v37  ;;  %v1929_v56 = vmul.f32 %v1928_v53, %v1926_v3  ;;  %v2286_v42 = vshrl.u32 %v4952_v38, %v2277_v57  ;;  %v2117_v23 = vshll.u32 %v4793_v25, 30 }
 0x2af   : > { %2501 = vst.msk [vmem:[%s3814_s26 + $0x40] sm:$0xff] %vm2492_vm12, %v2484_v9  ;;  %v2282_v18 = vshll.u32 %v4948_v10, %v2276_v24  ;;  %v2281_v59 = vor.u32 %v2280_v21, %v2279_v11  ;;  %v2285_v1 = vshll.u32 %v4949_v48, %v2276_v24  ;;  %v2288_v28 = vshll.u32 %v4952_v38, %v2276_v24 }
 0x2b0   : > { %v1930_v15 = vxor.u32 2147483648, %v1929_v56  ;;  %v2118_v47 = vsub.s32 %v2114_v26, %v2117_v23  ;;  %v2291_v13 = vshll.u32 %v2933_v51, %v2276_v24  ;;  %v2292_v45 = vshrl.u32 %v4953_v54, %v2277_v57 }
 0x2b1   : > { %v2284_v36 = vor.u32 %v2283_v55, %v2282_v18  ;;  %vm4813_vm7 = vcmp.le.f32.partialorder %v1846_v0, 0.7853982  ;;  %v2287_v41 = vor.u32 %v2286_v42, %v2285_v1  ;;  %v2290_v60 = vor.u32 %v2289_v46, %v2288_v28 }
 0x2b2   : > { %v1931_v10 = vsel %vm1848_vm9, %v1930_v15, %v1929_v56  ;;  %v2120_v38 = vsub.s32 0, %v2118_v47  ;;  %v2270_v22 = vor.u32 8388608, %v2269_v31  ;;  %v2293_v51 = vor.u32 %v2292_v45, %v2291_v13 }
 0x2b3   : > { %v1934_v48 = vsel %vm4813_vm7, %v4581_v43, %v1931_v10  ;;  %v1935_v54 = vsel %vm4813_vm7, 0, %v1933_v49  ;;  %v2278_v0 = vshrl.u32 %v2929_v8, %v2277_v57  ;;  %vm2294_vm11 = vcmp.lt.s32.totalorder %v2275_v50, 1 }
 0x2b4   : > { %2845 = vcosq.f32 %v1934_v48  ;;  %v2643_v44 = vmin.u32 %v2120_v38, %v2118_v47  ;;  %vm2297_vm13 = vcmp.lt.s32.totalorder %v2275_v50, 4  ;;  %v2302_v34 = vsel %vm2294_vm11, %v2281_v59, %v2284_v36 }
 0x2b5   : > { %2847 = vsinq.f32 %v1934_v48  ;;  %v2299_v17 = vsel %vm2297_vm13, %v2287_v41, 2102212464  ;;  %v2303_v7 = vsel %vm2297_vm13, %v2290_v60, 920167782  ;;  %v2306_v19 = vsel %vm2294_vm11, %v2284_v36, %v2287_v41 }
 0x2b6   : > { %v2307_v62 = vsel %vm2297_vm13, %v2293_v51, 1326507024  ;;  %v1939_v20 = vadd.s32 3, %v1935_v54  ;;  %v2122_v27 = vclz %v2643_v44  ;;  %vm2296_vm14 = vcmp.lt.s32.totalorder %v2275_v50, 3 }
 0x2b7   : > { %v2310_v6 = vshll.u32 %v2270_v22, 8  ;;  %vm2295_vm5 = vcmp.lt.s32.totalorder %v2275_v50, 2  ;;  %v2298_v52 = vsel %vm2294_vm11, %v2278_v0, %v2281_v59  ;;  %v2304_v40 = vsel %vm2296_vm14, %v2287_v41, %v2303_v7 }
 0x2b8   : > { %v2308_v26 = vsel %vm2296_vm14, %v2290_v60, %v2307_v62  ;;  %v2644_v24 = vadd.s32 4294967294, %v2122_v27  ;;  %v2300_v14 = vsel %vm2296_vm14, %v2284_v36, %v2299_v17  ;;  %v2305_v8 = vsel %vm2295_vm5, %v2302_v34, %v2304_v40 }
 0x2b9   : > { %v2309_v12 = vsel %vm2295_vm5, %v2306_v19, %v2308_v26  ;;  %v4828_v32 = vmul.u32.u64.low %v2310_v6, %v2305_v8  ;;  %v4829_v57 = vmul.u32.u64.high %v2310_v6, %v2305_v8, %v4828_v32  ;;  %v2301_v3 = vsel %vm2295_vm5, %v2298_v52, %v2300_v14 }
 0x2ba   : > { %v4825_v37 = vmul.u32.u64.low %v2310_v6, %v2309_v12  ;;  %v4826_v35 = vmul.u32.u64.high %v2310_v6, %v2309_v12, %v4825_v37  ;;  %vm2645_vm10 = vcmp.lt.s32.totalorder %v2644_v24, 0  ;;  %v2110_v53 = vadd.s32 %v4762_v63, %v4767_v16 }
 0x2bb   : > { %v2125_v9 = vsel %vm2645_vm10, 0, %v2644_v24  ;;  %v1940_v55 = vand.u32 3, %v1939_v20  ;;  %v2320_v56 = vadd.s32 1, %v4829_v57  ;;  %v2317_v49 = vmul.u32 %v2310_v6, %v2301_v3 }
 0x2bc   : > { %v2126_v31 = vsub.s32 32, %v2125_v9  ;;  %v2130_v21 = vsub.s32 4294967266, %v2125_v9  ;;  %vm2319_vm15 = vc.u32 %v4826_v35, %v4828_v32  ;;  %v2127_v11 = vshll.u32 %v2118_v47, %v2125_v9 }
 0x2bd   : > { %v2321_v23 = vsel %vm2319_vm15, %v2320_v56, %v4829_v57  ;;  %vm1945_vm0 = vcmp.eq.s32.totalorder %v1940_v55, 2  ;;  %vm1941_vm1 = vcmp.lt.s32.totalorder %v1940_v55, 2  ;;  %vm1942_vm2 = vcmp.eq.s32.totalorder %v1940_v55, 0 }
 0x2be   : > { %v2128_v42 = vshrl.u32 %v2110_v53, %v2126_v31  ;;  %v2131_v46 = vadd.s32 127, %v2130_v21  ;;  %v2322_v59 = vadd.s32 %v2321_v23, %v2317_v49  ;;  %vm1938_vm3 = vweird.f32 %v4581_v43 }
 0x2bf   : > { %vm2056_vm4 = vcmp.lt.s32.totalorder %v4650_v2, 0  ;;  %v2140_v0 = vsub.s32 4, %v4793_v25  ;;  %vm2055_vm6 = vcmp.le.f32.partialorder %v2054_v4, 0.7853982  ;;  %v2318_v6 = vadd.s32 %v4828_v32, %v4826_v35 }
 0x2c0   : > { %v2129_v18 = vor.u32 %v2128_v42, %v2127_v11  ;;  %v2132_v15 = vshll.u32 %v2131_v46, 23  ;;  %v2323_v36 = vadd.s32 536870912, %v2322_v59  ;;  %vm2146_vm14 = vweird.f32 %v4650_v2 }
 0x2c1   : > { %v2846_v50 = vpop.eup %2845  ;;  %v2141_v7 = vsel %vm2056_vm4, %v2140_v0, %v4793_v25  ;;  %vm2264_vm5 = vcmp.lt.s32.totalorder %v4746_v33, 0  ;;  %vm2263_vm10 = vcmp.le.f32.partialorder %v2262_v5, 0.7853982 }
 0x2c2   : > { %v2848_v1 = vpop.eup %2847  ;;  %v1946_v28 = vxor.u32 2147483648, %v2846_v50  ;;  %v2133_v16 = vor.u32 4788187, %v2132_v15  ;;  %v2136_v61 = vcvt.s32.f32 %v2129_v18  ;;  %v2324_v10 = vshrl.u32 %v2323_v36, 30 }
 0x2c3   : > { %v1943_v63 = vxor.u32 2147483648, %v2848_v1  ;;  %v2143_v19 = vsel %vm2055_vm6, 0, %v2141_v7 }
 0x2c4   : > { %v1947_v13 = vsel %vm1945_vm0, %v1946_v28, %v2848_v1  ;;  %v2134_v45 = vand.u32 2147483647, %v2133_v16  ;;  %v2325_v38 = vshll.u32 %v2324_v10, 30  ;;  %v2147_v20 = vadd.s32 3, %v2143_v19 }
 0x2c5   : > { %v1944_v47 = vsel %vm1942_vm2, %v2846_v50, %v1943_v63  ;;  %v2348_v46 = vsub.s32 4, %v2324_v10  ;;  %vm2354_vm2 = vweird.f32 %v4746_v33 }
 0x2c6   : > { %v1948_v41 = vsel %vm1941_vm1, %v1944_v47, %v1947_v13  ;;  %v2137_v48 = vmul.f32 %v2136_v61, %v2134_v45  ;;  %v2326_v54 = vsub.s32 %v2322_v59, %v2325_v38  ;;  %v2148_v14 = vand.u32 3, %v2147_v20 }
 0x2c7   : > { %v1949_v60 = vsel %vm1938_vm3, nan, %v1948_v41  ;;  %v2349_v23 = vsel %vm2264_vm5, %v2348_v46, %v2324_v10 }
 0x2c8   : > { %v2486_v22 = vsel %vm3745_vm8, %v4527_v29, %v1949_v60  ;;  %v2138_v51 = vxor.u32 2147483648, %v2137_v48  ;;  %v2328_v44 = vsub.s32 0, %v2326_v54  ;;  %vm2153_vm7 = vcmp.eq.s32.totalorder %v2148_v14, 2 }
 0x2c9   : > { %2503 = vst.msk [vmem:[%s3814_s26 + $0x50] sm:$0xff] %vm2492_vm12, %v2486_v22  ;;  %vm2150_vm11 = vcmp.eq.s32.totalorder %v2148_v14, 0  ;;  %vm2149_vm13 = vcmp.lt.s32.totalorder %v2148_v14, 2  ;;  %v2351_v50 = vsel %vm2263_vm10, 0, %v2349_v23 }
 0x2ca   : > { %v2139_v43 = vsel %vm2056_vm4, %v2138_v51, %v2137_v48  ;;  %v2651_v17 = vmin.u32 %v2328_v44, %v2326_v54  ;;  %v2355_v18 = vadd.s32 3, %v2351_v50 }
 0x2cb   : > { %v2142_v34 = vsel %vm2055_vm6, %v4650_v2, %v2139_v43 }
 0x2cc   : > { %2849 = vcosq.f32 %v2142_v34  ;;  %v2330_v29 = vclz %v2651_v17 }
 0x2cd   : > { %2851 = vsinq.f32 %v2142_v34 }
 0x2ce   : > { %v2652_v62 = vadd.s32 4294967294, %v2330_v29 }
 0x2d0   : > { %vm2653_vm9 = vcmp.lt.s32.totalorder %v2652_v62, 0 }
 0x2d1   : > { %v2333_v27 = vsel %vm2653_vm9, 0, %v2652_v62 }
 0x2d2   : > { %v2334_v52 = vsub.s32 32, %v2333_v27  ;;  %v2338_v40 = vsub.s32 4294967266, %v2333_v27  ;;  %v2335_v4 = vshll.u32 %v2326_v54, %v2333_v27 }
 0x2d4   : > { %v2336_v26 = vshrl.u32 %v2318_v6, %v2334_v52  ;;  %v2339_v24 = vadd.s32 127, %v2338_v40 }
 0x2d6   : > { %v2337_v8 = vor.u32 %v2336_v26, %v2335_v4  ;;  %v2340_v12 = vshll.u32 %v2339_v24, 23 }
 0x2d8   : > { %v2341_v9 = vor.u32 4788187, %v2340_v12  ;;  %v2344_v21 = vcvt.s32.f32 %v2337_v8 }
 0x2d9   : > { %v2850_v37 = vpop.eup %2849 }
 0x2da   : > { %v2852_v57 = vpop.eup %2851  ;;  %v2154_v25 = vxor.u32 2147483648, %v2850_v37  ;;  %v2342_v31 = vand.u32 2147483647, %v2341_v9 }
 0x2db   : > { %v2151_v3 = vxor.u32 2147483648, %v2852_v57 }
 0x2dc   : > { %v2155_v53 = vsel %vm2153_vm7, %v2154_v25, %v2852_v57  ;;  %v2345_v55 = vmul.f32 %v2344_v21, %v2342_v31 }
 0x2dd   : > { %v2152_v35 = vsel %vm2150_vm11, %v2850_v37, %v2151_v3 }
 0x2de   : > { %v2156_v32 = vsel %vm2149_vm13, %v2152_v35, %v2155_v53  ;;  %v2346_v42 = vxor.u32 2147483648, %v2345_v55 }
 0x2df   : > { %v2157_v56 = vsel %vm2146_vm14, nan, %v2156_v32 }
 0x2e0   : > { %v2488_v11 = vsel %vm3745_vm8, %v4617_v30, %v2157_v56  ;;  %v2347_v49 = vsel %vm2264_vm5, %v2346_v42, %v2345_v55  ;;  %v2356_v30 = vand.u32 3, %v2355_v18 }
 0x2e1   : > { %2505 = vst.msk [vmem:[%s3814_s26 + $0x60] sm:$0xff] %vm2492_vm12, %v2488_v11  ;;  %v2350_v2 = vsel %vm2263_vm10, %v4746_v33, %v2347_v49 }
 0x2e2   : > { %2853 = vcosq.f32 %v2350_v2  ;;  %vm2361_vm15 = vcmp.eq.s32.totalorder %v2356_v30, 2  ;;  %vm2358_vm0 = vcmp.eq.s32.totalorder %v2356_v30, 0  ;;  %vm2357_vm1 = vcmp.lt.s32.totalorder %v2356_v30, 2 }
 0x2e3   : > { %2855 = vsinq.f32 %v2350_v2 }
 0x2ef   : > { %v2854_v15 = vpop.eup %2853 }
 0x2f0   : > { %v2856_v59 = vpop.eup %2855  ;;  %v2362_v1 = vxor.u32 2147483648, %v2854_v15 }
 0x2f1   : > { %v2359_v28 = vxor.u32 2147483648, %v2856_v59 }
 0x2f2   : > { %v2363_v5 = vsel %vm2361_vm15, %v2362_v1, %v2856_v59 }
 0x2f3   : > { %v2360_v63 = vsel %vm2358_vm0, %v2854_v15, %v2359_v28 }
 0x2f4   : > { %v2364_v16 = vsel %vm2357_vm1, %v2360_v63, %v2363_v5 }
 0x2f5   : > { %v2365_v36 = vsel %vm2354_vm2, nan, %v2364_v16 }
 0x2f6   : > { %v2490_v13 = vsel %vm3745_vm8, %v4711_v39, %v2365_v36 }
 0x2f7   : > { %2507 = vst.msk [vmem:[%s3814_s26 + $0x70] sm:$0xff] %vm2492_vm12, %v2490_v13 }
 0x2f8   : > { %2874 = shalt.err (!%p2871_p3)
}
 0x2f9   : > { %s2875_s23 = scalar_lea.hbm %s4865_s17, 2048  ;;  %s2879_s9 = scalar_lea.hbm %s4921_s5, 4096 }
 0x2fa   : > { %p2876_p4 = scmp.ne.s32.totalorder %s4865_s17, %s2875_s23  ;;  %p2880_p9 = scmp.lt.s32.totalorder %s4865_s17, %s4921_s5 }
 0x2fb   : > { %p2881_p10 = scmp.lt.s32.totalorder %s2879_s9, %s2875_s23 }
 0x2fc   : > { %p2877_p7 = pnand %p2876_p4, %p3006_p5 }
 0x2fd   : > { %p2882_p11 = por %p2881_p10, %p2880_p9 }
 0x2fe   : > { %p2878_p8 = pneg %p2877_p7 }
 0x300   : > { %p2883_p12 = pnand %p2882_p11, %p2878_p8 }
 0x302   : > { %2886 = shalt.err (!%p2883_p12)
}
 0x303   : > { %s2936_s12 = smov 128   ;;  %s2937_s13 = smov 8  }
 0x304   : > { %2728 = dma.vmem_to_hbm [thread:$0]  (%p3006_p5), %s4867_s14, 2048, %s4865_s17, %s4876_s22, %s2936_s12, %s2936_s12, %s2937_s13  }
 0x305 PF: > { %p2734_p13 = scmp.ge.s32.totalorder %s2921_s21, 2  ;;  %s2538_s15 = sand.u32 1, %s2909_s18  }
 0x306   : > { %s2539_s16 = scalar_lea.sflag [#allocation3], %s2538_s15 }
 0x307   : > { %p2731_p0 = pnand %p2734_p13, %p3010_p6 }
 0x309   : > { %p2732_p1 = pneg %p2731_p0 }
 0x30b   : > { %2904 = dma.done.wait (%p2732_p1), %s2539_s16, 2048  }
 0x30c   : > { %2906 = vsyncadd (%p2732_p1), %s2539_s16, 4294965248  ;;  %p15_p2 = scmp.ge.s32.totalorder %s2993_s24, 4   ;;  %s4980_s18 = smov %s2913_s19 }
 0x30d   : > { %s4981_s19 = smov %s2917_s20  ;;  %s4982_s20 = smov %s3004_s27 }
 0x30e   : > { %s4983_s21 = smov %s2993_s24  ;;  %17 = sbr.rel (!%p15_p2) target bundleno = 3 (0x3), region = 75 }
 0x313   :  { %2544 = vsyncpa [#allocation3], 1 }
 0x314   :  { %2546 = vsyncpa [#allocation3 + $0x1], 1 }

</bundles_post_ra>
